<compile_context>
chip_gen: v6e
topology: v6e:2x2x1
jax: 0.10.0
libtpu: 0.0.40
codegen_flags: <defaults>
</compile_context>

<pallas_src>
import functools

import jax
import jax.numpy as jnp
from jax.experimental import pallas as pl
from jax.experimental.pallas import tpu as pltpu

FILTER = 7
PAD = 3


def _round_up(x, m):
    return ((x + m - 1) // m) * m


def _pick_c_block_and_budget(C, S, in_itemsize, out_itemsize):
    """Largest channel block whose REAL VMEM footprint (sublane/lane tile
    padding + Pallas' 2x input double buffering) fits a generation-aware budget."""
    try:
        vmem_cap = int(pltpu.get_tpu_info().vmem_capacity_bytes)
    except Exception:  # emulator / older runtime: assume smallest per-core VMEM (v7x)
        vmem_cap = 64 << 20
    # ~75% of physical VMEM: ~48 MiB on v7x (64 MiB/TC), ~96 MiB on v5e/v6e
    # (128 MiB).  Also passed back as vmem_limit_bytes.
    budget = int(vmem_cap * 3 // 4)

    s_lane = _round_up(S, 128)
    so = _round_up(S, 128)
    fixed = (
        2 * 8 * so * out_itemsize      # double-buffered (1,1,So) output tile
        + 2 * 8 * s_lane * 4           # resident (7,S) column-mask block
        + 2 * 8 * s_lane * 4           # sum/max f32 scratch
        + 48 * s_lane * 4              # finalize temporaries (padded maps, 14 windows, partials)
    )
    avail = budget - fixed
    sub = max(8, 32 // in_itemsize)    # sublane tile: 8 (f32) / 16 (bf16)

    def in_block_bytes(d):             # 2x double-buffered, tile-padded input block
        return 2 * _round_up(d, sub) * s_lane * in_itemsize

    divisors = [d for d in range(1, C + 1) if C % d == 0]
    aligned = [d for d in divisors if d == C or d % sub == 0]
    for cands in (aligned, divisors):
        fitting = [d for d in cands if in_block_bytes(d) <= avail]
        if fitting:
            return max(fitting), budget
    # TODO(synk): if even c_block == 1 overflows (huge H*W), tile S into row
    # strips with a 3-row halo instead of relying on a single flat block.
    return 1, budget


def _focus_spatial_kernel(x_ref, w_ref, mask_ref, o_ref, sum_ref, max_ref, *, W, S, So):
    """One (batch, channel-block) grid step.

    x_ref    : (1, c_block, S) VMEM -- lane-dense flattened channel block (S = H*W)
    w_ref    : (98,)          SMEM  -- conv taps, avg-channel pre-scaled by 1/C
    mask_ref : (7, S)         VMEM  -- per-dx 0/1 column masks (row-wrap removal)
    o_ref    : (1, 1, So)     VMEM  -- lane-dense flattened output (So % 128 == 0)
    sum_ref  : (1, S) f32     VMEM scratch -- running channel sum
    max_ref  : (1, S) f32     VMEM scratch -- running channel max
    """
    ci = pl.program_id(1)
    nc = pl.num_programs(1)

    @pl.when(ci == 0)
    def _():
        sum_ref[...] = jnp.zeros_like(sum_ref)
        max_ref[...] = jnp.full_like(max_ref, -jnp.inf)

    # Memory-bound phase: lane-dense channel reduction (upcast handles bf16 input).
    xb = x_ref[0].astype(jnp.float32)                       # (c_block, S)
    sum_ref[...] = sum_ref[...] + jnp.sum(xb, axis=0, keepdims=True)
    max_ref[...] = jnp.maximum(max_ref[...], jnp.max(xb, axis=0, keepdims=True))

    @pl.when(ci == nc - 1)
    def _():
        # Hoist all 98 SMEM scalar weight reads ahead of the MAC work.
        ws = [w_ref[i] for i in range(2 * FILTER * FILTER)]
        masks = mask_ref[...]                               # (7, S)

        # Zero-padded flat maps: the map sits lane-aligned at `off`, with
        # >= 3*W+3 zeros on both sides so row over/under-runs read zeros.
        halo = PAD * W + PAD
        off = _round_up(halo, 128)
        Sp = _round_up(off + S + halo, 128)

        def padded(flat_ref):
            v = flat_ref[...]                               # (1, S) f32
            return jnp.concatenate(
                [jnp.zeros((1, off), jnp.float32), v,
                 jnp.zeros((1, Sp - off - S), jnp.float32)], axis=1)

        pmaps = (padded(sum_ref), padded(max_ref))          # (avg via 1/C-scaled taps, max)

        # 14 row-offset windows (one lane shift each), shared by all 7 dx taps.
        Sw = S + 2 * PAD
        wins = [[pmaps[c][:, off - PAD + (ky - PAD) * W:
                          off - PAD + (ky - PAD) * W + Sw]
                 for ky in range(FILTER)] for c in range(2)]

        # Row-partial stencil: 98 shift-free VALU MACs into 7 per-dx partials,
        # then exactly 7 lane shifts + 7 masked adds (vs ~112 XLU shifts before).
        # TODO(synk): for very large H*W, strip-mine this over row bands so the
        # live windows stay inside the 64-vreg file instead of spilling to VMEM.
        acc = jnp.zeros((1, S), jnp.float32)
        for kx in range(FILTER):
            pw = jnp.zeros((1, Sw), jnp.float32)
            for c in range(2):
                base = c * FILTER * FILTER
                for ky in range(FILTER):
                    pw = pw + ws[base + ky * FILTER + kx] * wins[c][ky]
            acc = acc + masks[kx:kx + 1, :] * pw[:, kx:kx + S]

        att = jax.nn.sigmoid(acc)                           # (1, S), lane-dense
        if So > S:                                          # keep the store an unmasked vst
            att = jnp.concatenate(
                [att, jnp.zeros((1, So - S), att.dtype)], axis=1)
        o_ref[0] = att.astype(o_ref.dtype)


def focus_spatial(x, weight, *, c_block=None, vmem_limit_bytes=None):
    """x: (B, C, H, W) float32 or bfloat16.  weight: (1, 2, 7, 7) float32 (OIHW, no bias)."""
    B, C, H, W = x.shape
    assert weight.shape == (1, 2, FILTER, FILTER), weight.shape
    S = H * W
    So = _round_up(S, 128)                                  # lane-dense flat output width

    itemsize = jnp.dtype(x.dtype).itemsize
    auto_c_block, budget = _pick_c_block_and_budget(C, S, itemsize, itemsize)
    if c_block is None:
        c_block = auto_c_block
    assert C % c_block == 0, (C, c_block)
    # TODO(synk): for prime/awkward C, pad the channel axis (or add a masked tail)
    # instead of silently degrading to c_block = 1.
    nc = C // c_block

    # Fold 1/C into the avg-channel taps -> kernel only needs a channel SUM.
    scale = jnp.array([1.0 / C, 1.0], jnp.float32)[:, None, None]
    w_flat = (weight[0].astype(jnp.float32) * scale).reshape(-1)        # (98,)

    # Per-dx column-validity masks: kill taps whose column wrapped to the next
    # row in the flattened layout (computed once with plain JAX, tiny, resident).
    col = jnp.arange(S, dtype=jnp.int32) % W                            # (S,)
    shift = jnp.arange(FILTER, dtype=jnp.int32)[:, None] - PAD          # (7, 1)
    masks = ((col[None, :] + shift >= 0) &
             (col[None, :] + shift < W)).astype(jnp.float32)            # (7, S)

    x_flat = x.reshape(B, C, S)          # free: contiguous NCHW -> (B, C, H*W)

    kernel = functools.partial(_focus_spatial_kernel, W=W, S=S, So=So)

    out = pl.pallas_call(
        kernel,
        out_shape=jax.ShapeDtypeStruct((B, 1, So), x.dtype),
        grid=(B, nc),
        in_specs=[
            # TODO(synk): pipeline_mode=pl.Buffered(3) here (VMEM permitting) would
            # hide the per-batch finalize bubble behind the next block's DMA.
            pl.BlockSpec((1, c_block, S), lambda b, c: (b, c, 0)),
            pl.BlockSpec(memory_space=pltpu.MemorySpace.SMEM),
            pl.BlockSpec((FILTER, S), lambda b, c: (0, 0)),
        ],
        out_specs=pl.BlockSpec((1, 1, So), lambda b, c: (b, 0, 0)),
        scratch_shapes=[
            pltpu.VMEM((1, S), jnp.float32),     # running channel sum
            pltpu.VMEM((1, S), jnp.float32),     # running channel max
        ],
        compiler_params=pltpu.CompilerParams(
            # TODO(synk): when B == 1 on v7x, split H (or C, with a tiny merge
            # epilogue) into a second "parallel" axis so both TensorCores work.
            dimension_semantics=("parallel", "arbitrary"),
            vmem_limit_bytes=int(vmem_limit_bytes if vmem_limit_bytes is not None
                                 else budget),
        ),
    )(x_flat, w_flat, masks)

    return out[:, :, :S].reshape(B, 1, H, W)


def focus_spatial_reference(x, weight):
    """Pure-JAX reference reproducing the PyTorch forward."""
    xf = x.astype(jnp.float32)
    avg = jnp.mean(xf, axis=1, keepdims=True)
    mx = jnp.max(xf, axis=1, keepdims=True)
    comb = jnp.concatenate([avg, mx], axis=1)               # (B, 2, H, W)
    out = jax.lax.conv_general_dilated(
        comb, weight,
        window_strides=(1, 1),
        padding=((PAD, PAD), (PAD, PAD)),
        dimension_numbers=("NCHW", "OIHW", "NCHW"),
    )
    return jax.nn.sigmoid(out)


if __name__ == "__main__":
    key = jax.random.PRNGKey(0)
    k1, k2, kw = jax.random.split(key, 3)
    weight = 0.1 * jax.random.normal(kw, (1, 2, FILTER, FILTER), dtype=jnp.float32)

    # 1) f32, 16x16 spatial, whole channel axis in one block.
    x1 = jax.random.normal(k1, (2, 4, 16, 16), dtype=jnp.float32)
    out1 = jax.block_until_ready(focus_spatial(x1, weight))
    ref1 = focus_spatial_reference(x1, weight)
    assert out1.shape == (2, 1, 16, 16), out1.shape
    err1 = float(jnp.max(jnp.abs(out1 - ref1)))
    assert err1 < 5e-5, err1

    # 2) Odd spatial (7x7 -> lane-padded flat output) + multi-step channel accumulation.
    x2 = jax.random.normal(k2, (1, 16, 7, 7), dtype=jnp.float32)
    out2 = jax.block_until_ready(focus_spatial(x2, weight, c_block=8))
    ref2 = focus_spatial_reference(x2, weight)
    assert out2.shape == (1, 1, 7, 7), out2.shape
    err2 = float(jnp.max(jnp.abs(out2 - ref2)))
    assert err2 < 5e-5, err2

    # 3) bf16 input path (halves HBM read traffic; accumulation stays in f32).
    xb = x1.astype(jnp.bfloat16)
    outb = jax.block_until_ready(focus_spatial(xb, weight))
    refb = focus_spatial_reference(xb, weight)
    errb = float(jnp.max(jnp.abs(outb.astype(jnp.float32) - refb)))
    assert outb.dtype == jnp.bfloat16 and errb < 2e-2, (outb.dtype, errb)

    print("KERNEL_OK")
</pallas_src>

<mosaic_0001>
module attributes {stable_mosaic.version = 11 : i64} {
  func.func @_focus_spatial_kernel(%arg0: i32, %arg1: i32, %arg2: memref<1x4x256xf32, #tpu.memory_space<vmem>>, %arg3: memref<98xf32, #tpu.memory_space<smem>>, %arg4: memref<7x256xf32, #tpu.memory_space<vmem>>, %arg5: memref<1x1x256xf32, #tpu.memory_space<vmem>>, %arg6: memref<1x256xf32, #tpu.memory_space<vmem>>, %arg7: memref<1x256xf32, #tpu.memory_space<vmem>>) attributes {dimension_semantics = [#tpu.dimension_semantics<parallel>, #tpu.dimension_semantics<arbitrary>], iteration_bounds = array<i64: 2, 1>, scalar_prefetch = 0 : i64, scratch_operands = 2 : i64, tpu.core_type = #tpu.core_type<tc>, window_params = [{transform_indices = @transform_0, window_bounds = array<i64: 1, 4, 256>}, {transform_indices = @transform_1, window_bounds = array<i64: 98>}, {pipeline_mode = #tpu.pipeline_mode<synchronous>, transform_indices = @transform_2, window_bounds = array<i64: 7, 256>}, {transform_indices = @transform_3, window_bounds = array<i64: 1, 1, 256>}]} {
    %c0_i32 = arith.constant 0 : i32
    %0 = arith.cmpi eq, %arg1, %c0_i32 : i32
    %1 = arith.extui %0 : i1 to i32
    %c0_i32_0 = arith.constant 0 : i32
    %2 = arith.cmpi ne, %1, %c0_i32_0 : i32
    scf.if %2 {
      %cst_14 = arith.constant 0.000000e+00 : f32
      %18 = vector.broadcast %cst_14 : f32 to vector<1x256xf32>
      %c0_15 = arith.constant 0 : index
      %c0_16 = arith.constant 0 : index
      %19 = vector.load %arg6[%c0_15, %c0_16] : memref<1x256xf32, #tpu.memory_space<vmem>>, vector<1x256xf32>
      tpu.vector_store %arg6[%c0_15, %c0_16], %18 {strides = array<i32>} : memref<1x256xf32, #tpu.memory_space<vmem>>, vector<1x256xf32>,
      %cst_17 = arith.constant 0xFF800000 : f32
      %20 = vector.broadcast %cst_17 : f32 to vector<1x256xf32>
      %c0_18 = arith.constant 0 : index
      %c0_19 = arith.constant 0 : index
      %21 = vector.load %arg7[%c0_18, %c0_19] : memref<1x256xf32, #tpu.memory_space<vmem>>, vector<1x256xf32>
      tpu.vector_store %arg7[%c0_18, %c0_19], %20 {strides = array<i32>} : memref<1x256xf32, #tpu.memory_space<vmem>>, vector<1x256xf32>,
    } else {
    }
    %c0 = arith.constant 0 : index
    %c0_1 = arith.constant 0 : index
    %c0_2 = arith.constant 0 : index
    %3 = vector.load %arg2[%c0, %c0_1, %c0_2] : memref<1x4x256xf32, #tpu.memory_space<vmem>>, vector<1x4x256xf32>
    %4 = vector.shape_cast %3 : vector<1x4x256xf32> to vector<4x256xf32>
    %c0_3 = arith.constant 0 : index
    %c0_4 = arith.constant 0 : index
    %5 = vector.load %arg6[%c0_3, %c0_4] : memref<1x256xf32, #tpu.memory_space<vmem>>, vector<1x256xf32>
    %cst = arith.constant dense<0.000000e+00> : vector<256xf32>
    %6 = vector.multi_reduction <add>, %4, %cst [0] : vector<4x256xf32> to vector<256xf32>
    %7 = vector.shape_cast %6 : vector<256xf32> to vector<1x256xf32>
    %8 = arith.addf %5, %7 : vector<1x256xf32>
    %c0_5 = arith.constant 0 : index
    %c0_6 = arith.constant 0 : index
    %9 = vector.load %arg6[%c0_5, %c0_6] : memref<1x256xf32, #tpu.memory_space<vmem>>, vector<1x256xf32>
    tpu.vector_store %arg6[%c0_5, %c0_6], %8 {strides = array<i32>} : memref<1x256xf32, #tpu.memory_space<vmem>>, vector<1x256xf32>,
    %c0_7 = arith.constant 0 : index
    %c0_8 = arith.constant 0 : index
    %10 = vector.load %arg7[%c0_7, %c0_8] : memref<1x256xf32, #tpu.memory_space<vmem>>, vector<1x256xf32>
    %cst_9 = arith.constant dense<0xFF800000> : vector<256xf32>
    %11 = vector.multi_reduction <maximumf>, %4, %cst_9 [0] : vector<4x256xf32> to vector<256xf32>
    %12 = vector.shape_cast %11 : vector<256xf32> to vector<1x256xf32>
    %13 = arith.maximumf %10, %12 : vector<1x256xf32>
    %c0_10 = arith.constant 0 : index
    %c0_11 = arith.constant 0 : index
    %14 = vector.load %arg7[%c0_10, %c0_11] : memref<1x256xf32, #tpu.memory_space<vmem>>, vector<1x256xf32>
    tpu.vector_store %arg7[%c0_10, %c0_11], %13 {strides = array<i32>} : memref<1x256xf32, #tpu.memory_space<vmem>>, vector<1x256xf32>,
    %c0_i32_12 = arith.constant 0 : i32
    %15 = arith.cmpi eq, %arg1, %c0_i32_12 : i32
    %16 = arith.extui %15 : i1 to i32
    %c0_i32_13 = arith.constant 0 : i32
    %17 = arith.cmpi ne, %16, %c0_i32_13 : i32
    scf.if %17 {
      %c0_14 = arith.constant 0 : index
      %18 = memref.load %arg3[%c0_14] : memref<98xf32, #tpu.memory_space<smem>>
      %c1 = arith.constant 1 : index
      %19 = memref.load %arg3[%c1] : memref<98xf32, #tpu.memory_space<smem>>
      %c2 = arith.constant 2 : index
      %20 = memref.load %arg3[%c2] : memref<98xf32, #tpu.memory_space<smem>>
      %c3 = arith.constant 3 : index
      %21 = memref.load %arg3[%c3] : memref<98xf32, #tpu.memory_space<smem>>
      %c4 = arith.constant 4 : index
      %22 = memref.load %arg3[%c4] : memref<98xf32, #tpu.memory_space<smem>>
      %c5 = arith.constant 5 : index
      %23 = memref.load %arg3[%c5] : memref<98xf32, #tpu.memory_space<smem>>
      %c6 = arith.constant 6 : index
      %24 = memref.load %arg3[%c6] : memref<98xf32, #tpu.memory_space<smem>>
      %c7 = arith.constant 7 : index
      %25 = memref.load %arg3[%c7] : memref<98xf32, #tpu.memory_space<smem>>
      %c8 = arith.constant 8 : index
      %26 = memref.load %arg3[%c8] : memref<98xf32, #tpu.memory_space<smem>>
      %c9 = arith.constant 9 : index
      %27 = memref.load %arg3[%c9] : memref<98xf32, #tpu.memory_space<smem>>
      %c10 = arith.constant 10 : index
      %28 = memref.load %arg3[%c10] : memref<98xf32, #tpu.memory_space<smem>>
      %c11 = arith.constant 11 : index
      %29 = memref.load %arg3[%c11] : memref<98xf32, #tpu.memory_space<smem>>
      %c12 = arith.constant 12 : index
      %30 = memref.load %arg3[%c12] : memref<98xf32, #tpu.memory_space<smem>>
      %c13 = arith.constant 13 : index
      %31 = memref.load %arg3[%c13] : memref<98xf32, #tpu.memory_space<smem>>
      %c14 = arith.constant 14 : index
      %32 = memref.load %arg3[%c14] : memref<98xf32, #tpu.memory_space<smem>>
      %c15 = arith.constant 15 : index
      %33 = memref.load %arg3[%c15] : memref<98xf32, #tpu.memory_space<smem>>
      %c16 = arith.constant 16 : index
      %34 = memref.load %arg3[%c16] : memref<98xf32, #tpu.memory_space<smem>>
      %c17 = arith.constant 17 : index
      %35 = memref.load %arg3[%c17] : memref<98xf32, #tpu.memory_space<smem>>
      %c18 = arith.constant 18 : index
      %36 = memref.load %arg3[%c18] : memref<98xf32, #tpu.memory_space<smem>>
      %c19 = arith.constant 19 : index
      %37 = memref.load %arg3[%c19] : memref<98xf32, #tpu.memory_space<smem>>
      %c20 = arith.constant 20 : index
      %38 = memref.load %arg3[%c20] : memref<98xf32, #tpu.memory_space<smem>>
      %c21 = arith.constant 21 : index
      %39 = memref.load %arg3[%c21] : memref<98xf32, #tpu.memory_space<smem>>
      %c22 = arith.constant 22 : index
      %40 = memref.load %arg3[%c22] : memref<98xf32, #tpu.memory_space<smem>>
      %c23 = arith.constant 23 : index
      %41 = memref.load %arg3[%c23] : memref<98xf32, #tpu.memory_space<smem>>
      %c24 = arith.constant 24 : index
      %42 = memref.load %arg3[%c24] : memref<98xf32, #tpu.memory_space<smem>>
      %c25 = arith.constant 25 : index
      %43 = memref.load %arg3[%c25] : memref<98xf32, #tpu.memory_space<smem>>
      %c26 = arith.constant 26 : index
      %44 = memref.load %arg3[%c26] : memref<98xf32, #tpu.memory_space<smem>>
      %c27 = arith.constant 27 : index
      %45 = memref.load %arg3[%c27] : memref<98xf32, #tpu.memory_space<smem>>
      %c28 = arith.constant 28 : index
      %46 = memref.load %arg3[%c28] : memref<98xf32, #tpu.memory_space<smem>>
      %c29 = arith.constant 29 : index
      %47 = memref.load %arg3[%c29] : memref<98xf32, #tpu.memory_space<smem>>
      %c30 = arith.constant 30 : index
      %48 = memref.load %arg3[%c30] : memref<98xf32, #tpu.memory_space<smem>>
      %c31 = arith.constant 31 : index
      %49 = memref.load %arg3[%c31] : memref<98xf32, #tpu.memory_space<smem>>
      %c32 = arith.constant 32 : index
      %50 = memref.load %arg3[%c32] : memref<98xf32, #tpu.memory_space<smem>>
      %c33 = arith.constant 33 : index
      %51 = memref.load %arg3[%c33] : memref<98xf32, #tpu.memory_space<smem>>
      %c34 = arith.constant 34 : index
      %52 = memref.load %arg3[%c34] : memref<98xf32, #tpu.memory_space<smem>>
      %c35 = arith.constant 35 : index
      %53 = memref.load %arg3[%c35] : memref<98xf32, #tpu.memory_space<smem>>
      %c36 = arith.constant 36 : index
      %54 = memref.load %arg3[%c36] : memref<98xf32, #tpu.memory_space<smem>>
      %c37 = arith.constant 37 : index
      %55 = memref.load %arg3[%c37] : memref<98xf32, #tpu.memory_space<smem>>
      %c38 = arith.constant 38 : index
      %56 = memref.load %arg3[%c38] : memref<98xf32, #tpu.memory_space<smem>>
      %c39 = arith.constant 39 : index
      %57 = memref.load %arg3[%c39] : memref<98xf32, #tpu.memory_space<smem>>
      %c40 = arith.constant 40 : index
      %58 = memref.load %arg3[%c40] : memref<98xf32, #tpu.memory_space<smem>>
      %c41 = arith.constant 41 : index
      %59 = memref.load %arg3[%c41] : memref<98xf32, #tpu.memory_space<smem>>
      %c42 = arith.constant 42 : index
      %60 = memref.load %arg3[%c42] : memref<98xf32, #tpu.memory_space<smem>>
      %c43 = arith.constant 43 : index
      %61 = memref.load %arg3[%c43] : memref<98xf32, #tpu.memory_space<smem>>
      %c44 = arith.constant 44 : index
      %62 = memref.load %arg3[%c44] : memref<98xf32, #tpu.memory_space<smem>>
      %c45 = arith.constant 45 : index
      %63 = memref.load %arg3[%c45] : memref<98xf32, #tpu.memory_space<smem>>
      %c46 = arith.constant 46 : index
      %64 = memref.load %arg3[%c46] : memref<98xf32, #tpu.memory_space<smem>>
      %c47 = arith.constant 47 : index
      %65 = memref.load %arg3[%c47] : memref<98xf32, #tpu.memory_space<smem>>
      %c48 = arith.constant 48 : index
      %66 = memref.load %arg3[%c48] : memref<98xf32, #tpu.memory_space<smem>>
      %c49 = arith.constant 49 : index
      %67 = memref.load %arg3[%c49] : memref<98xf32, #tpu.memory_space<smem>>
      %c50 = arith.constant 50 : index
      %68 = memref.load %arg3[%c50] : memref<98xf32, #tpu.memory_space<smem>>
      %c51 = arith.constant 51 : index
      %69 = memref.load %arg3[%c51] : memref<98xf32, #tpu.memory_space<smem>>
      %c52 = arith.constant 52 : index
      %70 = memref.load %arg3[%c52] : memref<98xf32, #tpu.memory_space<smem>>
      %c53 = arith.constant 53 : index
      %71 = memref.load %arg3[%c53] : memref<98xf32, #tpu.memory_space<smem>>
      %c54 = arith.constant 54 : index
      %72 = memref.load %arg3[%c54] : memref<98xf32, #tpu.memory_space<smem>>
      %c55 = arith.constant 55 : index
      %73 = memref.load %arg3[%c55] : memref<98xf32, #tpu.memory_space<smem>>
      %c56 = arith.constant 56 : index
      %74 = memref.load %arg3[%c56] : memref<98xf32, #tpu.memory_space<smem>>
      %c57 = arith.constant 57 : index
      %75 = memref.load %arg3[%c57] : memref<98xf32, #tpu.memory_space<smem>>
      %c58 = arith.constant 58 : index
      %76 = memref.load %arg3[%c58] : memref<98xf32, #tpu.memory_space<smem>>
      %c59 = arith.constant 59 : index
      %77 = memref.load %arg3[%c59] : memref<98xf32, #tpu.memory_space<smem>>
      %c60 = arith.constant 60 : index
      %78 = memref.load %arg3[%c60] : memref<98xf32, #tpu.memory_space<smem>>
      %c61 = arith.constant 61 : index
      %79 = memref.load %arg3[%c61] : memref<98xf32, #tpu.memory_space<smem>>
      %c62 = arith.constant 62 : index
      %80 = memref.load %arg3[%c62] : memref<98xf32, #tpu.memory_space<smem>>
      %c63 = arith.constant 63 : index
      %81 = memref.load %arg3[%c63] : memref<98xf32, #tpu.memory_space<smem>>
      %c64 = arith.constant 64 : index
      %82 = memref.load %arg3[%c64] : memref<98xf32, #tpu.memory_space<smem>>
      %c65 = arith.constant 65 : index
      %83 = memref.load %arg3[%c65] : memref<98xf32, #tpu.memory_space<smem>>
      %c66 = arith.constant 66 : index
      %84 = memref.load %arg3[%c66] : memref<98xf32, #tpu.memory_space<smem>>
      %c67 = arith.constant 67 : index
      %85 = memref.load %arg3[%c67] : memref<98xf32, #tpu.memory_space<smem>>
      %c68 = arith.constant 68 : index
      %86 = memref.load %arg3[%c68] : memref<98xf32, #tpu.memory_space<smem>>
      %c69 = arith.constant 69 : index
      %87 = memref.load %arg3[%c69] : memref<98xf32, #tpu.memory_space<smem>>
      %c70 = arith.constant 70 : index
      %88 = memref.load %arg3[%c70] : memref<98xf32, #tpu.memory_space<smem>>
      %c71 = arith.constant 71 : index
      %89 = memref.load %arg3[%c71] : memref<98xf32, #tpu.memory_space<smem>>
      %c72 = arith.constant 72 : index
      %90 = memref.load %arg3[%c72] : memref<98xf32, #tpu.memory_space<smem>>
      %c73 = arith.constant 73 : index
      %91 = memref.load %arg3[%c73] : memref<98xf32, #tpu.memory_space<smem>>
      %c74 = arith.constant 74 : index
      %92 = memref.load %arg3[%c74] : memref<98xf32, #tpu.memory_space<smem>>
      %c75 = arith.constant 75 : index
      %93 = memref.load %arg3[%c75] : memref<98xf32, #tpu.memory_space<smem>>
      %c76 = arith.constant 76 : index
      %94 = memref.load %arg3[%c76] : memref<98xf32, #tpu.memory_space<smem>>
      %c77 = arith.constant 77 : index
      %95 = memref.load %arg3[%c77] : memref<98xf32, #tpu.memory_space<smem>>
      %c78 = arith.constant 78 : index
      %96 = memref.load %arg3[%c78] : memref<98xf32, #tpu.memory_space<smem>>
      %c79 = arith.constant 79 : index
      %97 = memref.load %arg3[%c79] : memref<98xf32, #tpu.memory_space<smem>>
      %c80 = arith.constant 80 : index
      %98 = memref.load %arg3[%c80] : memref<98xf32, #tpu.memory_space<smem>>
      %c81 = arith.constant 81 : index
      %99 = memref.load %arg3[%c81] : memref<98xf32, #tpu.memory_space<smem>>
      %c82 = arith.constant 82 : index
      %100 = memref.load %arg3[%c82] : memref<98xf32, #tpu.memory_space<smem>>
      %c83 = arith.constant 83 : index
      %101 = memref.load %arg3[%c83] : memref<98xf32, #tpu.memory_space<smem>>
      %c84 = arith.constant 84 : index
      %102 = memref.load %arg3[%c84] : memref<98xf32, #tpu.memory_space<smem>>
      %c85 = arith.constant 85 : index
      %103 = memref.load %arg3[%c85] : memref<98xf32, #tpu.memory_space<smem>>
      %c86 = arith.constant 86 : index
      %104 = memref.load %arg3[%c86] : memref<98xf32, #tpu.memory_space<smem>>
      %c87 = arith.constant 87 : index
      %105 = memref.load %arg3[%c87] : memref<98xf32, #tpu.memory_space<smem>>
      %c88 = arith.constant 88 : index
      %106 = memref.load %arg3[%c88] : memref<98xf32, #tpu.memory_space<smem>>
      %c89 = arith.constant 89 : index
      %107 = memref.load %arg3[%c89] : memref<98xf32, #tpu.memory_space<smem>>
      %c90 = arith.constant 90 : index
      %108 = memref.load %arg3[%c90] : memref<98xf32, #tpu.memory_space<smem>>
      %c91 = arith.constant 91 : index
      %109 = memref.load %arg3[%c91] : memref<98xf32, #tpu.memory_space<smem>>
      %c92 = arith.constant 92 : index
      %110 = memref.load %arg3[%c92] : memref<98xf32, #tpu.memory_space<smem>>
      %c93 = arith.constant 93 : index
      %111 = memref.load %arg3[%c93] : memref<98xf32, #tpu.memory_space<smem>>
      %c94 = arith.constant 94 : index
      %112 = memref.load %arg3[%c94] : memref<98xf32, #tpu.memory_space<smem>>
      %c95 = arith.constant 95 : index
      %113 = memref.load %arg3[%c95] : memref<98xf32, #tpu.memory_space<smem>>
      %c96 = arith.constant 96 : index
      %114 = memref.load %arg3[%c96] : memref<98xf32, #tpu.memory_space<smem>>
      %c97 = arith.constant 97 : index
      %115 = memref.load %arg3[%c97] : memref<98xf32, #tpu.memory_space<smem>>
      %c0_15 = arith.constant 0 : index
      %c0_16 = arith.constant 0 : index
      %116 = vector.load %arg4[%c0_15, %c0_16] : memref<7x256xf32, #tpu.memory_space<vmem>>, vector<7x256xf32>
      %c0_17 = arith.constant 0 : index
      %c0_18 = arith.constant 0 : index
      %117 = vector.load %arg6[%c0_17, %c0_18] : memref<1x256xf32, #tpu.memory_space<vmem>>, vector<1x256xf32>
      %cst_19 = arith.constant 0.000000e+00 : f32
      %118 = vector.broadcast %cst_19 : f32 to vector<1x128xf32>
      %cst_20 = arith.constant 0.000000e+00 : f32
      %119 = vector.broadcast %cst_20 : f32 to vector<1x128xf32>
      %120 = tpu.concatenate %118, %117, %119 in 1 : vector<1x128xf32>, vector<1x256xf32>, vector<1x128xf32> -> vector<1x512xf32>
      %c0_21 = arith.constant 0 : index
      %c0_22 = arith.constant 0 : index
      %121 = vector.load %arg7[%c0_21, %c0_22] : memref<1x256xf32, #tpu.memory_space<vmem>>, vector<1x256xf32>
      %cst_23 = arith.constant 0.000000e+00 : f32
      %122 = vector.broadcast %cst_23 : f32 to vector<1x128xf32>
      %cst_24 = arith.constant 0.000000e+00 : f32
      %123 = vector.broadcast %cst_24 : f32 to vector<1x128xf32>
      %124 = tpu.concatenate %122, %121, %123 in 1 : vector<1x128xf32>, vector<1x256xf32>, vector<1x128xf32> -> vector<1x512xf32>
      %125 = vector.extract_strided_slice %120 {offsets = [0, 77], sizes = [1, 262], strides = [1, 1]} : vector<1x512xf32> to vector<1x262xf32>
      %126 = vector.extract_strided_slice %120 {offsets = [0, 93], sizes = [1, 262], strides = [1, 1]} : vector<1x512xf32> to vector<1x262xf32>
      %127 = vector.extract_strided_slice %120 {offsets = [0, 109], sizes = [1, 262], strides = [1, 1]} : vector<1x512xf32> to vector<1x262xf32>
      %128 = vector.extract_strided_slice %120 {offsets = [0, 125], sizes = [1, 262], strides = [1, 1]} : vector<1x512xf32> to vector<1x262xf32>
      %129 = vector.extract_strided_slice %120 {offsets = [0, 141], sizes = [1, 262], strides = [1, 1]} : vector<1x512xf32> to vector<1x262xf32>
      %130 = vector.extract_strided_slice %120 {offsets = [0, 157], sizes = [1, 262], strides = [1, 1]} : vector<1x512xf32> to vector<1x262xf32>
      %131 = vector.extract_strided_slice %120 {offsets = [0, 173], sizes = [1, 262], strides = [1, 1]} : vector<1x512xf32> to vector<1x262xf32>
      %132 = vector.extract_strided_slice %124 {offsets = [0, 77], sizes = [1, 262], strides = [1, 1]} : vector<1x512xf32> to vector<1x262xf32>
      %133 = vector.extract_strided_slice %124 {offsets = [0, 93], sizes = [1, 262], strides = [1, 1]} : vector<1x512xf32> to vector<1x262xf32>
      %134 = vector.extract_strided_slice %124 {offsets = [0, 109], sizes = [1, 262], strides = [1, 1]} : vector<1x512xf32> to vector<1x262xf32>
      %135 = vector.extract_strided_slice %124 {offsets = [0, 125], sizes = [1, 262], strides = [1, 1]} : vector<1x512xf32> to vector<1x262xf32>
      %136 = vector.extract_strided_slice %124 {offsets = [0, 141], sizes = [1, 262], strides = [1, 1]} : vector<1x512xf32> to vector<1x262xf32>
      %137 = vector.extract_strided_slice %124 {offsets = [0, 157], sizes = [1, 262], strides = [1, 1]} : vector<1x512xf32> to vector<1x262xf32>
      %138 = vector.extract_strided_slice %124 {offsets = [0, 173], sizes = [1, 262], strides = [1, 1]} : vector<1x512xf32> to vector<1x262xf32>
      %cst_25 = arith.constant 0.000000e+00 : f32
      %139 = vector.broadcast %cst_25 : f32 to vector<1x256xf32>
      %cst_26 = arith.constant 0.000000e+00 : f32
      %140 = vector.broadcast %cst_26 : f32 to vector<1x262xf32>
      %141 = vector.broadcast %18 : f32 to vector<1x262xf32>
      %142 = arith.mulf %141, %125 : vector<1x262xf32>
      %143 = arith.addf %140, %142 : vector<1x262xf32>
      %144 = vector.broadcast %25 : f32 to vector<1x262xf32>
      %145 = arith.mulf %144, %126 : vector<1x262xf32>
      %146 = arith.addf %143, %145 : vector<1x262xf32>
      %147 = vector.broadcast %32 : f32 to vector<1x262xf32>
      %148 = arith.mulf %147, %127 : vector<1x262xf32>
      %149 = arith.addf %146, %148 : vector<1x262xf32>
      %150 = vector.broadcast %39 : f32 to vector<1x262xf32>
      %151 = arith.mulf %150, %128 : vector<1x262xf32>
      %152 = arith.addf %149, %151 : vector<1x262xf32>
      %153 = vector.broadcast %46 : f32 to vector<1x262xf32>
      %154 = arith.mulf %153, %129 : vector<1x262xf32>
      %155 = arith.addf %152, %154 : vector<1x262xf32>
      %156 = vector.broadcast %53 : f32 to vector<1x262xf32>
      %157 = arith.mulf %156, %130 : vector<1x262xf32>
      %158 = arith.addf %155, %157 : vector<1x262xf32>
      %159 = vector.broadcast %60 : f32 to vector<1x262xf32>
      %160 = arith.mulf %159, %131 : vector<1x262xf32>
      %161 = arith.addf %158, %160 : vector<1x262xf32>
      %162 = vector.broadcast %67 : f32 to vector<1x262xf32>
      %163 = arith.mulf %162, %132 : vector<1x262xf32>
      %164 = arith.addf %161, %163 : vector<1x262xf32>
      %165 = vector.broadcast %74 : f32 to vector<1x262xf32>
      %166 = arith.mulf %165, %133 : vector<1x262xf32>
      %167 = arith.addf %164, %166 : vector<1x262xf32>
      %168 = vector.broadcast %81 : f32 to vector<1x262xf32>
      %169 = arith.mulf %168, %134 : vector<1x262xf32>
      %170 = arith.addf %167, %169 : vector<1x262xf32>
      %171 = vector.broadcast %88 : f32 to vector<1x262xf32>
      %172 = arith.mulf %171, %135 : vector<1x262xf32>
      %173 = arith.addf %170, %172 : vector<1x262xf32>
      %174 = vector.broadcast %95 : f32 to vector<1x262xf32>
      %175 = arith.mulf %174, %136 : vector<1x262xf32>
      %176 = arith.addf %173, %175 : vector<1x262xf32>
      %177 = vector.broadcast %102 : f32 to vector<1x262xf32>
      %178 = arith.mulf %177, %137 : vector<1x262xf32>
      %179 = arith.addf %176, %178 : vector<1x262xf32>
      %180 = vector.broadcast %109 : f32 to vector<1x262xf32>
      %181 = arith.mulf %180, %138 : vector<1x262xf32>
      %182 = arith.addf %179, %181 : vector<1x262xf32>
      %183 = vector.extract_strided_slice %116 {offsets = [0, 0], sizes = [1, 256], strides = [1, 1]} : vector<7x256xf32> to vector<1x256xf32>
      %184 = vector.extract_strided_slice %182 {offsets = [0, 0], sizes = [1, 256], strides = [1, 1]} : vector<1x262xf32> to vector<1x256xf32>
      %185 = arith.mulf %183, %184 : vector<1x256xf32>
      %186 = arith.addf %139, %185 : vector<1x256xf32>
      %cst_27 = arith.constant 0.000000e+00 : f32
      %187 = vector.broadcast %cst_27 : f32 to vector<1x262xf32>
      %188 = vector.broadcast %19 : f32 to vector<1x262xf32>
      %189 = arith.mulf %188, %125 : vector<1x262xf32>
      %190 = arith.addf %187, %189 : vector<1x262xf32>
      %191 = vector.broadcast %26 : f32 to vector<1x262xf32>
      %192 = arith.mulf %191, %126 : vector<1x262xf32>
      %193 = arith.addf %190, %192 : vector<1x262xf32>
      %194 = vector.broadcast %33 : f32 to vector<1x262xf32>
      %195 = arith.mulf %194, %127 : vector<1x262xf32>
      %196 = arith.addf %193, %195 : vector<1x262xf32>
      %197 = vector.broadcast %40 : f32 to vector<1x262xf32>
      %198 = arith.mulf %197, %128 : vector<1x262xf32>
      %199 = arith.addf %196, %198 : vector<1x262xf32>
      %200 = vector.broadcast %47 : f32 to vector<1x262xf32>
      %201 = arith.mulf %200, %129 : vector<1x262xf32>
      %202 = arith.addf %199, %201 : vector<1x262xf32>
      %203 = vector.broadcast %54 : f32 to vector<1x262xf32>
      %204 = arith.mulf %203, %130 : vector<1x262xf32>
      %205 = arith.addf %202, %204 : vector<1x262xf32>
      %206 = vector.broadcast %61 : f32 to vector<1x262xf32>
      %207 = arith.mulf %206, %131 : vector<1x262xf32>
      %208 = arith.addf %205, %207 : vector<1x262xf32>
      %209 = vector.broadcast %68 : f32 to vector<1x262xf32>
      %210 = arith.mulf %209, %132 : vector<1x262xf32>
      %211 = arith.addf %208, %210 : vector<1x262xf32>
      %212 = vector.broadcast %75 : f32 to vector<1x262xf32>
      %213 = arith.mulf %212, %133 : vector<1x262xf32>
      %214 = arith.addf %211, %213 : vector<1x262xf32>
      %215 = vector.broadcast %82 : f32 to vector<1x262xf32>
      %216 = arith.mulf %215, %134 : vector<1x262xf32>
      %217 = arith.addf %214, %216 : vector<1x262xf32>
      %218 = vector.broadcast %89 : f32 to vector<1x262xf32>
      %219 = arith.mulf %218, %135 : vector<1x262xf32>
      %220 = arith.addf %217, %219 : vector<1x262xf32>
      %221 = vector.broadcast %96 : f32 to vector<1x262xf32>
      %222 = arith.mulf %221, %136 : vector<1x262xf32>
      %223 = arith.addf %220, %222 : vector<1x262xf32>
      %224 = vector.broadcast %103 : f32 to vector<1x262xf32>
      %225 = arith.mulf %224, %137 : vector<1x262xf32>
      %226 = arith.addf %223, %225 : vector<1x262xf32>
      %227 = vector.broadcast %110 : f32 to vector<1x262xf32>
      %228 = arith.mulf %227, %138 : vector<1x262xf32>
      %229 = arith.addf %226, %228 : vector<1x262xf32>
      %230 = vector.extract_strided_slice %116 {offsets = [1, 0], sizes = [1, 256], strides = [1, 1]} : vector<7x256xf32> to vector<1x256xf32>
      %231 = vector.extract_strided_slice %229 {offsets = [0, 1], sizes = [1, 256], strides = [1, 1]} : vector<1x262xf32> to vector<1x256xf32>
      %232 = arith.mulf %230, %231 : vector<1x256xf32>
      %233 = arith.addf %186, %232 : vector<1x256xf32>
      %cst_28 = arith.constant 0.000000e+00 : f32
      %234 = vector.broadcast %cst_28 : f32 to vector<1x262xf32>
      %235 = vector.broadcast %20 : f32 to vector<1x262xf32>
      %236 = arith.mulf %235, %125 : vector<1x262xf32>
      %237 = arith.addf %234, %236 : vector<1x262xf32>
      %238 = vector.broadcast %27 : f32 to vector<1x262xf32>
      %239 = arith.mulf %238, %126 : vector<1x262xf32>
      %240 = arith.addf %237, %239 : vector<1x262xf32>
      %241 = vector.broadcast %34 : f32 to vector<1x262xf32>
      %242 = arith.mulf %241, %127 : vector<1x262xf32>
      %243 = arith.addf %240, %242 : vector<1x262xf32>
      %244 = vector.broadcast %41 : f32 to vector<1x262xf32>
      %245 = arith.mulf %244, %128 : vector<1x262xf32>
      %246 = arith.addf %243, %245 : vector<1x262xf32>
      %247 = vector.broadcast %48 : f32 to vector<1x262xf32>
      %248 = arith.mulf %247, %129 : vector<1x262xf32>
      %249 = arith.addf %246, %248 : vector<1x262xf32>
      %250 = vector.broadcast %55 : f32 to vector<1x262xf32>
      %251 = arith.mulf %250, %130 : vector<1x262xf32>
      %252 = arith.addf %249, %251 : vector<1x262xf32>
      %253 = vector.broadcast %62 : f32 to vector<1x262xf32>
      %254 = arith.mulf %253, %131 : vector<1x262xf32>
      %255 = arith.addf %252, %254 : vector<1x262xf32>
      %256 = vector.broadcast %69 : f32 to vector<1x262xf32>
      %257 = arith.mulf %256, %132 : vector<1x262xf32>
      %258 = arith.addf %255, %257 : vector<1x262xf32>
      %259 = vector.broadcast %76 : f32 to vector<1x262xf32>
      %260 = arith.mulf %259, %133 : vector<1x262xf32>
      %261 = arith.addf %258, %260 : vector<1x262xf32>
      %262 = vector.broadcast %83 : f32 to vector<1x262xf32>
      %263 = arith.mulf %262, %134 : vector<1x262xf32>
      %264 = arith.addf %261, %263 : vector<1x262xf32>
      %265 = vector.broadcast %90 : f32 to vector<1x262xf32>
      %266 = arith.mulf %265, %135 : vector<1x262xf32>
      %267 = arith.addf %264, %266 : vector<1x262xf32>
      %268 = vector.broadcast %97 : f32 to vector<1x262xf32>
      %269 = arith.mulf %268, %136 : vector<1x262xf32>
      %270 = arith.addf %267, %269 : vector<1x262xf32>
      %271 = vector.broadcast %104 : f32 to vector<1x262xf32>
      %272 = arith.mulf %271, %137 : vector<1x262xf32>
      %273 = arith.addf %270, %272 : vector<1x262xf32>
      %274 = vector.broadcast %111 : f32 to vector<1x262xf32>
      %275 = arith.mulf %274, %138 : vector<1x262xf32>
      %276 = arith.addf %273, %275 : vector<1x262xf32>
      %277 = vector.extract_strided_slice %116 {offsets = [2, 0], sizes = [1, 256], strides = [1, 1]} : vector<7x256xf32> to vector<1x256xf32>
      %278 = vector.extract_strided_slice %276 {offsets = [0, 2], sizes = [1, 256], strides = [1, 1]} : vector<1x262xf32> to vector<1x256xf32>
      %279 = arith.mulf %277, %278 : vector<1x256xf32>
      %280 = arith.addf %233, %279 : vector<1x256xf32>
      %cst_29 = arith.constant 0.000000e+00 : f32
      %281 = vector.broadcast %cst_29 : f32 to vector<1x262xf32>
      %282 = vector.broadcast %21 : f32 to vector<1x262xf32>
      %283 = arith.mulf %282, %125 : vector<1x262xf32>
      %284 = arith.addf %281, %283 : vector<1x262xf32>
      %285 = vector.broadcast %28 : f32 to vector<1x262xf32>
      %286 = arith.mulf %285, %126 : vector<1x262xf32>
      %287 = arith.addf %284, %286 : vector<1x262xf32>
      %288 = vector.broadcast %35 : f32 to vector<1x262xf32>
      %289 = arith.mulf %288, %127 : vector<1x262xf32>
      %290 = arith.addf %287, %289 : vector<1x262xf32>
      %291 = vector.broadcast %42 : f32 to vector<1x262xf32>
      %292 = arith.mulf %291, %128 : vector<1x262xf32>
      %293 = arith.addf %290, %292 : vector<1x262xf32>
      %294 = vector.broadcast %49 : f32 to vector<1x262xf32>
      %295 = arith.mulf %294, %129 : vector<1x262xf32>
      %296 = arith.addf %293, %295 : vector<1x262xf32>
      %297 = vector.broadcast %56 : f32 to vector<1x262xf32>
      %298 = arith.mulf %297, %130 : vector<1x262xf32>
      %299 = arith.addf %296, %298 : vector<1x262xf32>
      %300 = vector.broadcast %63 : f32 to vector<1x262xf32>
      %301 = arith.mulf %300, %131 : vector<1x262xf32>
      %302 = arith.addf %299, %301 : vector<1x262xf32>
      %303 = vector.broadcast %70 : f32 to vector<1x262xf32>
      %304 = arith.mulf %303, %132 : vector<1x262xf32>
      %305 = arith.addf %302, %304 : vector<1x262xf32>
      %306 = vector.broadcast %77 : f32 to vector<1x262xf32>
      %307 = arith.mulf %306, %133 : vector<1x262xf32>
      %308 = arith.addf %305, %307 : vector<1x262xf32>
      %309 = vector.broadcast %84 : f32 to vector<1x262xf32>
      %310 = arith.mulf %309, %134 : vector<1x262xf32>
      %311 = arith.addf %308, %310 : vector<1x262xf32>
      %312 = vector.broadcast %91 : f32 to vector<1x262xf32>
      %313 = arith.mulf %312, %135 : vector<1x262xf32>
      %314 = arith.addf %311, %313 : vector<1x262xf32>
      %315 = vector.broadcast %98 : f32 to vector<1x262xf32>
      %316 = arith.mulf %315, %136 : vector<1x262xf32>
      %317 = arith.addf %314, %316 : vector<1x262xf32>
      %318 = vector.broadcast %105 : f32 to vector<1x262xf32>
      %319 = arith.mulf %318, %137 : vector<1x262xf32>
      %320 = arith.addf %317, %319 : vector<1x262xf32>
      %321 = vector.broadcast %112 : f32 to vector<1x262xf32>
      %322 = arith.mulf %321, %138 : vector<1x262xf32>
      %323 = arith.addf %320, %322 : vector<1x262xf32>
      %324 = vector.extract_strided_slice %116 {offsets = [3, 0], sizes = [1, 256], strides = [1, 1]} : vector<7x256xf32> to vector<1x256xf32>
      %325 = vector.extract_strided_slice %323 {offsets = [0, 3], sizes = [1, 256], strides = [1, 1]} : vector<1x262xf32> to vector<1x256xf32>
      %326 = arith.mulf %324, %325 : vector<1x256xf32>
      %327 = arith.addf %280, %326 : vector<1x256xf32>
      %cst_30 = arith.constant 0.000000e+00 : f32
      %328 = vector.broadcast %cst_30 : f32 to vector<1x262xf32>
      %329 = vector.broadcast %22 : f32 to vector<1x262xf32>
      %330 = arith.mulf %329, %125 : vector<1x262xf32>
      %331 = arith.addf %328, %330 : vector<1x262xf32>
      %332 = vector.broadcast %29 : f32 to vector<1x262xf32>
      %333 = arith.mulf %332, %126 : vector<1x262xf32>
      %334 = arith.addf %331, %333 : vector<1x262xf32>
      %335 = vector.broadcast %36 : f32 to vector<1x262xf32>
      %336 = arith.mulf %335, %127 : vector<1x262xf32>
      %337 = arith.addf %334, %336 : vector<1x262xf32>
      %338 = vector.broadcast %43 : f32 to vector<1x262xf32>
      %339 = arith.mulf %338, %128 : vector<1x262xf32>
      %340 = arith.addf %337, %339 : vector<1x262xf32>
      %341 = vector.broadcast %50 : f32 to vector<1x262xf32>
      %342 = arith.mulf %341, %129 : vector<1x262xf32>
      %343 = arith.addf %340, %342 : vector<1x262xf32>
      %344 = vector.broadcast %57 : f32 to vector<1x262xf32>
      %345 = arith.mulf %344, %130 : vector<1x262xf32>
      %346 = arith.addf %343, %345 : vector<1x262xf32>
      %347 = vector.broadcast %64 : f32 to vector<1x262xf32>
      %348 = arith.mulf %347, %131 : vector<1x262xf32>
      %349 = arith.addf %346, %348 : vector<1x262xf32>
      %350 = vector.broadcast %71 : f32 to vector<1x262xf32>
      %351 = arith.mulf %350, %132 : vector<1x262xf32>
      %352 = arith.addf %349, %351 : vector<1x262xf32>
      %353 = vector.broadcast %78 : f32 to vector<1x262xf32>
      %354 = arith.mulf %353, %133 : vector<1x262xf32>
      %355 = arith.addf %352, %354 : vector<1x262xf32>
      %356 = vector.broadcast %85 : f32 to vector<1x262xf32>
      %357 = arith.mulf %356, %134 : vector<1x262xf32>
      %358 = arith.addf %355, %357 : vector<1x262xf32>
      %359 = vector.broadcast %92 : f32 to vector<1x262xf32>
      %360 = arith.mulf %359, %135 : vector<1x262xf32>
      %361 = arith.addf %358, %360 : vector<1x262xf32>
      %362 = vector.broadcast %99 : f32 to vector<1x262xf32>
      %363 = arith.mulf %362, %136 : vector<1x262xf32>
      %364 = arith.addf %361, %363 : vector<1x262xf32>
      %365 = vector.broadcast %106 : f32 to vector<1x262xf32>
      %366 = arith.mulf %365, %137 : vector<1x262xf32>
      %367 = arith.addf %364, %366 : vector<1x262xf32>
      %368 = vector.broadcast %113 : f32 to vector<1x262xf32>
      %369 = arith.mulf %368, %138 : vector<1x262xf32>
      %370 = arith.addf %367, %369 : vector<1x262xf32>
      %371 = vector.extract_strided_slice %116 {offsets = [4, 0], sizes = [1, 256], strides = [1, 1]} : vector<7x256xf32> to vector<1x256xf32>
      %372 = vector.extract_strided_slice %370 {offsets = [0, 4], sizes = [1, 256], strides = [1, 1]} : vector<1x262xf32> to vector<1x256xf32>
      %373 = arith.mulf %371, %372 : vector<1x256xf32>
      %374 = arith.addf %327, %373 : vector<1x256xf32>
      %cst_31 = arith.constant 0.000000e+00 : f32
      %375 = vector.broadcast %cst_31 : f32 to vector<1x262xf32>
      %376 = vector.broadcast %23 : f32 to vector<1x262xf32>
      %377 = arith.mulf %376, %125 : vector<1x262xf32>
      %378 = arith.addf %375, %377 : vector<1x262xf32>
      %379 = vector.broadcast %30 : f32 to vector<1x262xf32>
      %380 = arith.mulf %379, %126 : vector<1x262xf32>
      %381 = arith.addf %378, %380 : vector<1x262xf32>
      %382 = vector.broadcast %37 : f32 to vector<1x262xf32>
      %383 = arith.mulf %382, %127 : vector<1x262xf32>
      %384 = arith.addf %381, %383 : vector<1x262xf32>
      %385 = vector.broadcast %44 : f32 to vector<1x262xf32>
      %386 = arith.mulf %385, %128 : vector<1x262xf32>
      %387 = arith.addf %384, %386 : vector<1x262xf32>
      %388 = vector.broadcast %51 : f32 to vector<1x262xf32>
      %389 = arith.mulf %388, %129 : vector<1x262xf32>
      %390 = arith.addf %387, %389 : vector<1x262xf32>
      %391 = vector.broadcast %58 : f32 to vector<1x262xf32>
      %392 = arith.mulf %391, %130 : vector<1x262xf32>
      %393 = arith.addf %390, %392 : vector<1x262xf32>
      %394 = vector.broadcast %65 : f32 to vector<1x262xf32>
      %395 = arith.mulf %394, %131 : vector<1x262xf32>
      %396 = arith.addf %393, %395 : vector<1x262xf32>
      %397 = vector.broadcast %72 : f32 to vector<1x262xf32>
      %398 = arith.mulf %397, %132 : vector<1x262xf32>
      %399 = arith.addf %396, %398 : vector<1x262xf32>
      %400 = vector.broadcast %79 : f32 to vector<1x262xf32>
      %401 = arith.mulf %400, %133 : vector<1x262xf32>
      %402 = arith.addf %399, %401 : vector<1x262xf32>
      %403 = vector.broadcast %86 : f32 to vector<1x262xf32>
      %404 = arith.mulf %403, %134 : vector<1x262xf32>
      %405 = arith.addf %402, %404 : vector<1x262xf32>
      %406 = vector.broadcast %93 : f32 to vector<1x262xf32>
      %407 = arith.mulf %406, %135 : vector<1x262xf32>
      %408 = arith.addf %405, %407 : vector<1x262xf32>
      %409 = vector.broadcast %100 : f32 to vector<1x262xf32>
      %410 = arith.mulf %409, %136 : vector<1x262xf32>
      %411 = arith.addf %408, %410 : vector<1x262xf32>
      %412 = vector.broadcast %107 : f32 to vector<1x262xf32>
      %413 = arith.mulf %412, %137 : vector<1x262xf32>
      %414 = arith.addf %411, %413 : vector<1x262xf32>
      %415 = vector.broadcast %114 : f32 to vector<1x262xf32>
      %416 = arith.mulf %415, %138 : vector<1x262xf32>
      %417 = arith.addf %414, %416 : vector<1x262xf32>
      %418 = vector.extract_strided_slice %116 {offsets = [5, 0], sizes = [1, 256], strides = [1, 1]} : vector<7x256xf32> to vector<1x256xf32>
      %419 = vector.extract_strided_slice %417 {offsets = [0, 5], sizes = [1, 256], strides = [1, 1]} : vector<1x262xf32> to vector<1x256xf32>
      %420 = arith.mulf %418, %419 : vector<1x256xf32>
      %421 = arith.addf %374, %420 : vector<1x256xf32>
      %cst_32 = arith.constant 0.000000e+00 : f32
      %422 = vector.broadcast %cst_32 : f32 to vector<1x262xf32>
      %423 = vector.broadcast %24 : f32 to vector<1x262xf32>
      %424 = arith.mulf %423, %125 : vector<1x262xf32>
      %425 = arith.addf %422, %424 : vector<1x262xf32>
      %426 = vector.broadcast %31 : f32 to vector<1x262xf32>
      %427 = arith.mulf %426, %126 : vector<1x262xf32>
      %428 = arith.addf %425, %427 : vector<1x262xf32>
      %429 = vector.broadcast %38 : f32 to vector<1x262xf32>
      %430 = arith.mulf %429, %127 : vector<1x262xf32>
      %431 = arith.addf %428, %430 : vector<1x262xf32>
      %432 = vector.broadcast %45 : f32 to vector<1x262xf32>
      %433 = arith.mulf %432, %128 : vector<1x262xf32>
      %434 = arith.addf %431, %433 : vector<1x262xf32>
      %435 = vector.broadcast %52 : f32 to vector<1x262xf32>
      %436 = arith.mulf %435, %129 : vector<1x262xf32>
      %437 = arith.addf %434, %436 : vector<1x262xf32>
      %438 = vector.broadcast %59 : f32 to vector<1x262xf32>
      %439 = arith.mulf %438, %130 : vector<1x262xf32>
      %440 = arith.addf %437, %439 : vector<1x262xf32>
      %441 = vector.broadcast %66 : f32 to vector<1x262xf32>
      %442 = arith.mulf %441, %131 : vector<1x262xf32>
      %443 = arith.addf %440, %442 : vector<1x262xf32>
      %444 = vector.broadcast %73 : f32 to vector<1x262xf32>
      %445 = arith.mulf %444, %132 : vector<1x262xf32>
      %446 = arith.addf %443, %445 : vector<1x262xf32>
      %447 = vector.broadcast %80 : f32 to vector<1x262xf32>
      %448 = arith.mulf %447, %133 : vector<1x262xf32>
      %449 = arith.addf %446, %448 : vector<1x262xf32>
      %450 = vector.broadcast %87 : f32 to vector<1x262xf32>
      %451 = arith.mulf %450, %134 : vector<1x262xf32>
      %452 = arith.addf %449, %451 : vector<1x262xf32>
      %453 = vector.broadcast %94 : f32 to vector<1x262xf32>
      %454 = arith.mulf %453, %135 : vector<1x262xf32>
      %455 = arith.addf %452, %454 : vector<1x262xf32>
      %456 = vector.broadcast %101 : f32 to vector<1x262xf32>
      %457 = arith.mulf %456, %136 : vector<1x262xf32>
      %458 = arith.addf %455, %457 : vector<1x262xf32>
      %459 = vector.broadcast %108 : f32 to vector<1x262xf32>
      %460 = arith.mulf %459, %137 : vector<1x262xf32>
      %461 = arith.addf %458, %460 : vector<1x262xf32>
      %462 = vector.broadcast %115 : f32 to vector<1x262xf32>
      %463 = arith.mulf %462, %138 : vector<1x262xf32>
      %464 = arith.addf %461, %463 : vector<1x262xf32>
      %465 = vector.extract_strided_slice %116 {offsets = [6, 0], sizes = [1, 256], strides = [1, 1]} : vector<7x256xf32> to vector<1x256xf32>
      %466 = vector.extract_strided_slice %464 {offsets = [0, 6], sizes = [1, 256], strides = [1, 1]} : vector<1x262xf32> to vector<1x256xf32>
      %467 = arith.mulf %465, %466 : vector<1x256xf32>
      %468 = arith.addf %421, %467 : vector<1x256xf32>
      %469 = arith.negf %468 : vector<1x256xf32>
      %470 = math.exp %469 : vector<1x256xf32>
      %cst_33 = arith.constant 1.000000e+00 : f32
      %471 = vector.broadcast %cst_33 : f32 to vector<1x256xf32>
      %472 = arith.addf %471, %470 : vector<1x256xf32>
      %473 = arith.divf %471, %472 : vector<1x256xf32>
      %c0_34 = arith.constant 0 : index
      %c0_35 = arith.constant 0 : index
      %c0_36 = arith.constant 0 : index
      %474 = vector.load %arg5[%c0_34, %c0_35, %c0_36] : memref<1x1x256xf32, #tpu.memory_space<vmem>>, vector<1x1x256xf32>
      %475 = vector.shape_cast %474 : vector<1x1x256xf32> to vector<1x256xf32>
      %476 = vector.shape_cast %473 : vector<1x256xf32> to vector<1x1x256xf32>
      tpu.vector_store %arg5[%c0_34, %c0_35, %c0_36], %476 {strides = array<i32>} : memref<1x1x256xf32, #tpu.memory_space<vmem>>, vector<1x1x256xf32>,
    } else {
    }
    return
  }
  func.func @transform_0(%arg0: i32, %arg1: i32) -> (i32, i32, i32) {
    %c0_i32 = arith.constant 0 : i32
    %c0_i32_0 = arith.constant 0 : i32
    return %arg0, %arg1, %c0_i32 : i32, i32, i32
  }
  func.func @transform_1(%arg0: i32, %arg1: i32) -> i32 {
    %c0_i32 = arith.constant 0 : i32
    %c0_i32_0 = arith.constant 0 : i32
    return %c0_i32 : i32
  }
  func.func @transform_2(%arg0: i32, %arg1: i32) -> (i32, i32) {
    %c0_i32 = arith.constant 0 : i32
    %c0_i32_0 = arith.constant 0 : i32
    %c0_i32_1 = arith.constant 0 : i32
    return %c0_i32, %c0_i32_0 : i32, i32
  }
  func.func @transform_3(%arg0: i32, %arg1: i32) -> (i32, i32, i32) {
    %c0_i32 = arith.constant 0 : i32
    %c0_i32_0 = arith.constant 0 : i32
    %c0_i32_1 = arith.constant 0 : i32
    return %arg0, %c0_i32, %c0_i32_0 : i32, i32, i32
  }
}

</mosaic_0001>

<bundles_post_ra>
// kernel: tpu_custom_call.1
= control target key start
LH: loop header
LB: loop body
LE: loop exit
PB: predicated region body
PF: predicated region fallthrough
CT: control target
= control target key end

     0   :  { %8 = vsyncpa [#allocation5], 0  ;;  %s4309_s0 = inlined_call_operand.hbm [shape: f32[2,4,256], index: 0, kind: input, shape index: {}]   ;;  %s4310_s1 = inlined_call_operand.vmem [shape: f32[98], index: 1, kind: input, shape index: {}]   ;;  %s4311_s2 = inlined_call_operand.hbm [shape: f32[7,256], index: 2, kind: input, shape index: {}]   ;;  %s4312_s3 = inlined_call_operand.hbm [shape: f32[2,1,256], index: 3, kind: output, shape index: {}]  }
   0x1   :  { %10 = vsyncpa [#allocation5 + $0x1], 0 }
   0x2   :  { %11 = vsyncpa [#allocation7], 0 }
   0x3   :  { %12 = vsyncpa [#allocation10], 0 }
   0x4   :  { %13 = vsyncpa [#allocation6], 0 }
   0x5   :  { %15 = vsyncpa [#allocation6 + $0x1], 0  ;;  %s3081_s12 = smov 0   ;;  %s3083_s13 = smov 0  }
   0x6   :  { %s3085_s14 = smov 0   ;;  %s3087_s15 = smov 0  }
   0x7   :  { %s3089_s16 = smov 0   ;;  %s3091_s17 = smov 0  }
   0x8 LB: > { %s2656_s18 = sadd.s32 4294967295, %s3040_s17   ;;  %s2657_s19 = sadd.s32 4294967294, %s3040_s17   ;;  %s3040_s17 = sphi %s3091_s17, %s21_s17   ;;  %s3036_s16 = sphi %s3089_s16, %s4362_s16   ;;  %s3032_s15 = sphi %s3087_s15, %s4361_s15   ;;  %s3028_s14 = sphi %s3085_s14, %s4360_s14   ;;  %s3024_s13 = sphi %s3083_s13, %s4359_s13   ;;  %s3020_s12 = sphi %s3081_s12, %s4358_s12  }
   0x9   : > { %p55_p0 = scmp.ne.s32.totalorder %s3024_s13, %s3020_s12  ;;  %p3115_p1 = scmp.eq.s32.totalorder %s2656_s18, 0 }
   0xa   : > { %p3119_p2 = scmp.eq.s32.totalorder %s2656_s18, 1  ;;  %p127_p3 = scmp.eq.s32.totalorder %s2657_s19, 1 }
   0xb   : > { %s4322_s20 = scalar_select %p3115_p1, 1, 0 }
   0xc   : > { %s4323_s21 = scalar_select %p3119_p2, 1, 0 }
   0xd   : > { %p3125_p4 = por %p3115_p1, %p55_p0  ;;  %p2658_p5 = scmp.ge.s32.totalorder %s3040_s17, 1 }
   0xe   : > { %p3130_p6 = por %p127_p3, %p55_p0  ;;  %p134_p7 = scmp.lt.s32.totalorder %s3040_s17, 3 }
   0xf   : > { %s4324_s22 = scalar_select %p3125_p4, 1, 0 }
  0x10   : > { %s4325_s23 = scalar_select %p3130_p6, 1, 0 }
  0x11   : > { %s147_s26 = sshll.u32 %s4310_s1, 4  ;;  %p3138_p8 = pnand %p2658_p5, %p134_p7  ;;  %s148_s26 = int_to_ptr.vmem [resolvable:$true] %s147_s26 }
  0x12   : > { %s3042_s28 = smov [#allocation9]   ;;  %s2883_s4 = scalar_lea.vmem %s148_s26, 16 }
  0x13   : > { %s4326_s27 = scalar_select %p3138_p8, 1, 0 }
  0x14   : > { %p2788_p10 = pneg %p3138_p8  ;;  %s158_s29 = sshll.u32 %s3042_s28, 4  ;;  %s159_s29 = int_to_ptr.vmem [resolvable:$true] %s158_s29 }
  0x15   : > { %p2884_p12 = scmp.ne.s32.totalorder %s148_s26, %s2883_s4  ;;  %p2891_p5 = scmp.lt.s32.totalorder %s148_s26, %s148_s26 }
  0x16   : > { %p3147_p11 = pnand %p2788_p10, %p3115_p1  ;;  %p2892_p7 = scmp.lt.s32.totalorder %s2883_s4, %s2883_s4 }
  0x18   : > { %p2885_p13 = pneg %p3147_p11  ;;  %p2893_p9 = por %p2892_p7, %p2891_p5 }
  0x1a   : > { %p2886_p0 = pnand %p2885_p13, %p2884_p12 }
  0x1c   : > { %p2887_p3 = pneg %p2886_p0 }
  0x1e   : > { %p2894_p6 = pnand %p2893_p9, %p2887_p3 }
  0x20   : > { %2897 = shalt.err (!%p2894_p6)
}
  0x21   : > { %s3043_s5 = smov [#allocation8]   ;;  %s2909_s6 = scalar_lea.vmem %s159_s29, 256 }
  0x22   : > { %2791 = dma.vmem_to_smem (!%p3147_p11), %s148_s26, 16, %s3043_s5, [#allocation7]  }
  0x23   : > { %p2910_p10 = scmp.ne.s32.totalorder %s159_s29, %s2909_s6  ;;  %p2917_p8 = scmp.lt.s32.totalorder %s159_s29, %s159_s29 }
  0x24   : > { %p2918_p2 = scmp.lt.s32.totalorder %s2909_s6, %s2909_s6 }
  0x25   : > { %p2912_p1 = pnand %p2910_p10, %p2885_p13 }
  0x26   : > { %p2919_p12 = por %p2918_p2, %p2917_p8 }
  0x27   : > { %p2913_p4 = pneg %p2912_p1 }
  0x29   : > { %p2920_p0 = pnand %p2919_p12, %p2913_p4 }
  0x2b   : > { %2923 = shalt.err (!%p2920_p0)
}
  0x2c   : > { %2794 = dma.hbm_to_vmem [thread:$0]  (!%p3147_p11), %s4311_s2, 256, %s159_s29, [#allocation10]  }
  0x2d   : > { %s33_s9 = sadd.s32 1, %s3036_s16  ;;  %s42_s10 = sadd.s32 1, %s3028_s14 }
  0x2e   : > { %p35_p1 = scmp.ge.s32.totalorder %s33_s9, 2  ;;  %p49_p2 = scmp.ne.s32.totalorder %s3028_s14, %s3024_s13 }
  0x2f   : > { %p50_p4 = scmp.eq.s32.totalorder %s3040_s17, 0  ;;  %p2805_p6 = scmp.lt.s32.totalorder %s3040_s17, 2 }
  0x30   : > { %s4364_s9 = smov (%p35_p1, %s33_s9), 0  ;;  %p4328_p9 = scmp.ne.s32.totalorder %s4323_s21, 0 }
  0x31   : > { %p51_p8 = por %p50_p4, %p49_p2  ;;  %s37_s18 = ssub.s32 %s3036_s16, %s4364_s9 }
  0x32   : > { %p3170_p13 = por %p4328_p9, %p49_p2  ;;  %s169_s19 = sand.u32 1, %s3028_s14  }
  0x33   : > { %p40_p3 = scmp.eq.s32.totalorder %s37_s18, 0  ;;  %s2662_s24 = sshll.u32 %s169_s19, 3 }
  0x34   : > { %s2774_s25 = sshll.u32 %s3036_s16, 7  ;;  %s173_s4 = scalar_lea.vmem [#allocation4], %s2662_s24 }
  0x35   : > { %s3179_s26 = scalar_select %p40_p3, %s3028_s14, %s42_s10  }
  0x36   : > { %s181_s30 = scalar_lea.hbm %s4309_s0, %s2774_s25  ;;  %s183_s5 = sshll.u32 %s173_s4, 4  ;;  %s184_s5 = int_to_ptr.vmem [resolvable:$true] %s183_s5 }
  0x37   : > { %p3186_p11 = pnand %p2805_p6, %p51_p8  ;;  %s170_s6 = scalar_lea.sflag [#allocation5], %s169_s19 }
  0x38   : > { %s2937_s7 = scalar_lea.vmem %s184_s5, 128  ;;  %s3044_s8 = smov [#allocation4]  }
  0x39   : > { %p2926_p5 = pneg %p3186_p11  ;;  %p2938_p7 = scmp.ne.s32.totalorder %s184_s5, %s2937_s7 }
  0x3a   : > { %s2942_s10 = sshll.u32 %s3044_s8, 4  ;;  %s2943_s10 = int_to_ptr.vmem [resolvable:$false] %s2942_s10 }
  0x3b   : > { %p2940_p10 = pnand %p2938_p7, %p2926_p5  ;;  %s2944_s18 = scalar_lea.vmem %s2943_s10, 256 }
  0x3c   : > { %p2945_p0 = scmp.lt.s32.totalorder %s184_s5, %s2943_s10  ;;  %p2946_p1 = scmp.lt.s32.totalorder %s2944_s18, %s2937_s7 }
  0x3d   : > { %p2941_p12 = pneg %p2940_p10 }
  0x3e   : > { %p2947_p2 = por %p2946_p1, %p2945_p0 }
  0x40   : > { %p2948_p4 = pnand %p2947_p2, %p2941_p12 }
  0x42   : > { %2951 = shalt.err (!%p2948_p4)
}
  0x43   : > { %2798 = dma.hbm_to_vmem [thread:$0]  (!%p3186_p11), %s181_s30, 128, %s184_s5, %s170_s6  }
  0x44   : > { %p4331_p6 = scmp.ne.s32.totalorder %s4326_s27, 0 }
  0x46   : > { %192 = sbr.rel (%p4331_p6) target bundleno = 1240 (0x4d8), region = 32 }
  0x4b   : > { %s3197_s19 = sand.u32 1, %s3024_s13   ;;  %p4332_p8 = scmp.ne.s32.totalorder %s4324_s22, 0 }
  0x4c   : > { %s2666_s24 = sshll.u32 %s3197_s19, 3  ;;  %s195_s25 = scalar_lea.sflag [#allocation5], %s3197_s19 }
  0x4d   : > { %s198_s28 = scalar_lea.vmem [#allocation4], %s2666_s24 }
  0x4e   : > { %3003 = dma.done.wait (%p4332_p8), %s195_s25, 128  }
  0x4f   : > { %3005 = vsyncadd (%p4332_p8), %s195_s25, 4294967168  ;;  %p4333_p9 = scmp.ne.s32.totalorder %s4322_s20, 0 }
  0x51   : > { %3007 = dma.done.wait (%p4333_p9), [#allocation7], 16  }
  0x52   : > { %3009 = vsyncadd (%p4333_p9), [#allocation7], 4294967280 }
  0x53   : > { %3011 = dma.done.wait (%p4333_p9), [#allocation10], 256  }
  0x54   : > { %3013 = vsyncadd (%p4333_p9), [#allocation10], 4294967040 }
  0x55   : > { %211 = sfence }
  0x56   : > { %s2676_s27 = sld [smem:[#allocation8 + $0x7]]  ;;  %v234_v0 = vlaneseq  ;;  %v240_v1 = vld [vmem:[%s198_s28] sm:$0xff]  ;;  %vm245_vm0 = vcmask 1043456   ;;  %v4334_v3 = vmov 0  ;;  %v3045_v5 = vmov 1966171168  }
  0x57   : > { %s2683_s29 = sld [smem:[#allocation8 + $0xe]]  ;;  %v243_v2 = vcombine.high %v240_v1, %v240_v1  ;;  %v246_v4 = vsel %vm245_vm0, %v240_v1, 0.0  ;;  %v264_v6 = vunpack.c.l.s4 %v3045_v5  ;;  %v3046_v7 = vmov 0.0   ;;  %s3048_s21 = smov 112  }
  0x58   : > { %s3213_s22 = sld [smem:[#allocation8 + $0x15]]  ;;  %vm3215_vm1 = vcmp.lt.s32.totalorder %v234_v0, 256  ;;  %v3047_v8 = vmov -inf   ;;  %v247_v9 = vrot.slane %v246_v4, 4  ;;  %v285_v11 = vsel %vm245_vm0, %v240_v1, -inf  ;;  %s3049_s6 = smov 96  }
  0x59   : > { %v4335_v3 = vsel %vm3215_vm1, 4294967295, %v4334_v3  ;;  %s3220_s30 = sld [smem:[#allocation8 + $0x1c]]  ;;  %238 = vst.msk [vmem:[#allocation2] sm:$0x3] %vm3215_vm1, %v3046_v7  ;;  %239 = vst.msk [vmem:[#allocation3] sm:$0x3] %vm3215_vm1, %v3047_v8  ;;  %v265_v20 = vunpack.c.0.s8 %v264_v6 }
  0x5a   : > { %4336 = vst [vmem:[#allocation16_spill] sm:$0xff] %v4335_v3  ;;  %v253_v10 = vsel %vm245_vm0, %v243_v2, 0.0  ;;  %s2704_s20 = sld [smem:[#allocation8 + $0x23]]  ;;  %v286_v13 = vrot.slane %v285_v11, 4  ;;  %v292_v14 = vsel %vm245_vm0, %v243_v2, -inf  ;;  %v248_v15 = vadd.f32 %v247_v9, %v246_v4  ;;  %s3050_s7 = smov 80  }
  0x5b   : > { %v254_v12 = vrot.slane %v253_v10, 4  ;;  %s2711_s4 = sld [smem:[#allocation8 + $0x2a]]  ;;  %v3229_v16 = vshrl.u32 %v234_v0, 7  ;;  %v293_v17 = vrot.slane %v292_v14, 4  ;;  %s3051_s8 = smov 64   ;;  %vm466_vm2 = vcmask 916480  }
  0x5c   : > { %v3231_v18 = vstv %s2676_s27  ;;  %s3233_s5 = sld [smem:[#allocation8 + $0x38]]  ;;  %v287_v21 = vmax.f32 %v285_v11, %v286_v13  ;;  %v249_v24 = vrot.slane %v248_v15, 2  ;;  %s3052_s10 = smov 48   ;;  %vm488_vm3 = vcmask 785408  }
  0x5d   : > { %v255_v19 = vadd.f32 %v254_v12, %v253_v10  ;;  %v454_v22 = vmul.f32 0.0, %v3231_v18  ;;  %v3236_v23 = vstv %s2683_s29  ;;  %v294_v25 = vmax.f32 %v292_v14, %v293_v17  ;;  %s3053_s18 = smov 32   ;;  %s2732_s24 = sld [smem:[#allocation8 + $0x3f]] }
  0x5e   : > { %v476_v26 = vmul.f32 0.0, %v3236_v23  ;;  %v3240_v27 = vstv %s3213_s22  ;;  %v288_v29 = vrot.slane %v287_v21, 2  ;;  %v250_v32 = vadd.f32 %v249_v24, %v248_v15  ;;  %s2739_s25 = sld [smem:[#allocation8 + $0x46]] }
  0x5f   : > { %v256_v28 = vrot.slane %v255_v19, 2  ;;  %460 = vrot.lane.b32.xlu0 %v454_v22, %s3048_s21  ;;  %v498_v30 = vmul.f32 0.0, %v3240_v27  ;;  %v3245_v31 = vstv %s3220_s30  ;;  %v295_v33 = vrot.slane %v294_v25, 2  ;;  %s2746_s28 = sld [smem:[#allocation8 + $0x4d]] }
  0x60   : > { %482 = vrot.lane.b32.xlu1 %v476_v26, %s3049_s6  ;;  %v523_v34 = vmul.f32 0.0, %v3245_v31  ;;  %v542_v35 = vstv %s2704_s20  ;;  %v289_v37 = vmax.f32 %v287_v21, %v288_v29  ;;  %v251_v39 = vrot.slane %v250_v32, 1  ;;  %v241_v56 = vld [vmem:[#allocation2] sm:$0x3]  ;;  %v284_v59 = vld [vmem:[#allocation3] sm:$0x3] }
  0x61   : > { %v257_v36 = vadd.f32 %v256_v28, %v255_v19  ;;  %v3249_v38 = vstv %s2711_s4  ;;  %v296_v40 = vmax.f32 %v294_v25, %v295_v33  ;;  %v545_v43 = vmul.f32 0.0, %v542_v35  ;;  %s2753_s27 = sld [smem:[#allocation8 + $0x54]] }
  0x62   : > { %v290_v42 = vrot.slane %v289_v37, 1  ;;  %v252_v44 = vadd.f32 %v251_v39, %v250_v32  ;;  %v3253_v45 = vsub.s32 %v265_v20, %v3229_v16  ;;  %v567_v47 = vmul.f32 0.0, %v3249_v38  ;;  %s2760_s29 = sld [smem:[#allocation8 + $0x5b]] }
  0x63   : > { %v258_v41 = vrot.slane %v257_v36, 1  ;;  %504 = vrot.lane.b32.xlu0 %v498_v30, %s3050_s7  ;;  %v297_v46 = vrot.slane %v296_v40, 1  ;;  %v593_v48 = vstv %s3233_s5  ;;  %v430_v63 = vsub.s32 1, %v3229_v16  ;;  %s2677_s22 = sld [smem:[#allocation8 + $0x8]] }
  0x64   : > { %4337 = vst [vmem:[#allocation17_spill] sm:$0xff] %v3253_v45  ;;  %531 = vrot.lane.b32.xlu1 %v523_v34, %s3051_s8  ;;  %v291_v50 = vmax.f32 %v289_v37, %v290_v42  ;;  %v594_v53 = vmul.f32 0.0, %v593_v48  ;;  %v426_v0 = vsub.s32 0, %v3229_v16  ;;  %v614_v22 = vstv %s2732_s24  ;;  %s2684_s30 = sld [smem:[#allocation8 + $0xf]] }
  0x65   : > { %v259_v49 = vadd.f32 %v258_v41, %v257_v36  ;;  %v298_v51 = vmax.f32 %v296_v40, %v297_v46  ;;  %v635_v25 = vstv %s2739_s25  ;;  %v657_v30 = vstv %s2746_s28  ;;  %s2691_s20 = sld [smem:[#allocation8 + $0x16]] }
  0x66   : > { %v660_v34 = vmul.f32 0.0, %v657_v30  ;;  %s2698_s4 = sld [smem:[#allocation8 + $0x1d]]  ;;  %vm510_vm4 = vcmask 654336   ;;  %vm533_vm5 = vcmask 523264   ;;  %vm555_vm6 = vcmask 392192  }
  0x67   : > { %v262_v52 = vcombine.low %v252_v44, %v259_v49  ;;  %553 = vrot.lane.b32.xlu0 %v545_v43, %s3052_s10  ;;  %v301_v54 = vcombine.low %v291_v50, %v298_v51  ;;  %v678_v33 = vstv %s2753_s27  ;;  %s2705_s5 = sld [smem:[#allocation8 + $0x24]]  ;;  %vm577_vm7 = vcmask 261120  }
  0x68   : > { %575 = vrot.lane.b32.xlu1 %v567_v47, %s3053_s18  ;;  %v681_v37 = vmul.f32 0.0, %v678_v33  ;;  %s2712_s24 = sld [smem:[#allocation8 + $0x2b]]  ;;  %vm1018_vm8 = vcmask 408576   ;;  %vm1313_vm9 = vcmask 400384   ;;  %vm1902_vm10 = vcmask 384000  }
  0x69   : > { %v269_v55 = vrot.slane %v262_v52, %v3253_v45  ;;  %v308_v57 = vrot.slane %v301_v54, %v3253_v45  ;;  %v745_v41 = vstv %s2677_s22  ;;  %s2726_s25 = sld [smem:[#allocation8 + $0x39]]  ;;  %vm729_vm11 = vcmask 416768  }
  0x6a   : > { %v766_v44 = vstv %s2684_s30  ;;  %v746_v46 = vmul.f32 0.0, %v745_v41  ;;  %s2733_s28 = sld [smem:[#allocation8 + $0x40]]  ;;  %vm2197_vm12 = vcmask 375808   ;;  %vm2492_vm13 = vcmask 367616  }
  0x6b   : > { %v276_v58 = vrot.slane %v269_v55, %v3253_v45  ;;  %600 = vrot.lane.b32.xlu0 %v594_v53, %s3048_s21  ;;  %v315_v60 = vrot.slane %v308_v57, %v3253_v45  ;;  %v767_v47 = vmul.f32 0.0, %v766_v44  ;;  %v787_v50 = vstv %s2691_s20  ;;  %s2740_s27 = sld [smem:[#allocation8 + $0x47]] }
  0x6c   : > { %v809_v53 = vstv %s2698_s4  ;;  %v788_v54 = vmul.f32 0.0, %v787_v50  ;;  %s2754_s22 = sld [smem:[#allocation8 + $0x55]] }
  0x6d   : > { %v278_v61 = vadd.f32 %v276_v58, %v241_v56  ;;  %v317_v62 = vmax.f32 %v284_v59, %v315_v60  ;;  %v812_v57 = vmul.f32 0.0, %v809_v53  ;;  %v830_v58 = vstv %s2705_s5  ;;  %s2761_s30 = sld [smem:[#allocation8 + $0x5c]] }
  0x6e   : > { %s2678_s20 = sld [smem:[#allocation8 + $0x9]] }
  0x6f   : > { %283 = vst.msk [vmem:[#allocation2] sm:$0x3] %vm3215_vm1, %v278_v61  ;;  %318 = vst.msk [vmem:[#allocation3] sm:$0x3] %vm3215_vm1, %v317_v62  ;;  %v851_v61 = vstv %s2712_s24  ;;  %s2685_s4 = sld [smem:[#allocation8 + $0x10]] }
  0x70   : > { %s322_s5 = sld [smem:[#allocation8]] }
  0x71   : > { %s2692_s24 = sld [smem:[#allocation8 + $0x17]] }
  0x76   : > { %v422_v1 = vld [vmem:[#allocation2] sm:$0x3]  ;;  %v434_v15 = vld [vmem:[#allocation3] sm:$0x3] }
  0x77   : > { %v3271_v2 = vrot.slane %v422_v1, %v430_v63  ;;  %v3273_v4 = vrot.slane %v422_v1, %v426_v0  ;;  %v3301_v16 = vrot.slane %v434_v15, %v426_v0  ;;  %v3309_v19 = vrot.slane %v434_v15, %v430_v63 }
  0x78   : > { %v833_v0 = vmul.f32 0.0, %v830_v58  ;;  %v854_v1 = vmul.f32 0.0, %v851_v61 }
  0x79   : > { %v456_v5 = vmul.f32 %v3231_v18, %v3271_v2  ;;  %v455_v6 = vmul.f32 %v3231_v18, %v3273_v4  ;;  %v478_v7 = vmul.f32 %v3236_v23, %v3271_v2  ;;  %v477_v8 = vmul.f32 %v3236_v23, %v3273_v4 }
  0x7a   : > { %v499_v9 = vmul.f32 %v3240_v27, %v3273_v4  ;;  %v500_v10 = vmul.f32 %v3240_v27, %v3271_v2  ;;  %v521_v11 = vmul.f32 %v3245_v31, %v3273_v4  ;;  %v522_v12 = vmul.f32 %v3245_v31, %v3271_v2 }
  0x7b   : > { %464 = vrot.lane.b32.xlu1 %v456_v5, %s3048_s21  ;;  %462 = vrot.lane.b32.xlu0 %v455_v6, %s3048_s21  ;;  %v544_v13 = vmul.f32 %v542_v35, %v3271_v2  ;;  %v543_v14 = vmul.f32 %v542_v35, %v3273_v4  ;;  %v565_v17 = vmul.f32 %v3249_v38, %v3273_v4  ;;  %v615_v23 = vmul.f32 0.0, %v614_v22 }
  0x7c   : > { %v566_v18 = vmul.f32 %v3249_v38, %v3271_v2  ;;  %v595_v20 = vmul.f32 %v593_v48, %v3301_v16  ;;  %v596_v21 = vmul.f32 %v593_v48, %v3309_v19  ;;  %v616_v24 = vmul.f32 %v614_v22, %v3301_v16 }
  0x7d   : > { %v617_v26 = vmul.f32 %v614_v22, %v3309_v19  ;;  %v636_v27 = vmul.f32 0.0, %v635_v25  ;;  %v637_v28 = vmul.f32 %v635_v25, %v3301_v16  ;;  %v638_v29 = vmul.f32 %v635_v25, %v3309_v19 }
  0x7e   : > { %v658_v31 = vmul.f32 %v657_v30, %v3301_v16  ;;  %v659_v32 = vmul.f32 %v657_v30, %v3309_v19  ;;  %v679_v35 = vmul.f32 %v678_v33, %v3301_v16  ;;  %v680_v36 = vmul.f32 %v678_v33, %v3309_v19 }
  0x7f   : > { %486 = vrot.lane.b32.xlu1 %v478_v7, %s3049_s6  ;;  %484 = vrot.lane.b32.xlu0 %v477_v8, %s3049_s6  ;;  %v699_v38 = vstv %s2760_s29  ;;  %v747_v43 = vmul.f32 %v745_v41, %v3273_v4  ;;  %v748_v48 = vmul.f32 %v745_v41, %v3271_v2  ;;  %v769_v49 = vmul.f32 %v766_v44, %v3271_v2  ;;  %s2747_s29 = sld [smem:[#allocation8 + $0x4e]] }
  0x80   : > { %v700_v39 = vmul.f32 %v699_v38, %v3301_v16  ;;  %v701_v40 = vmul.f32 %v699_v38, %v3309_v19  ;;  %v702_v42 = vmul.f32 0.0, %v699_v38  ;;  %v768_v51 = vmul.f32 %v766_v44, %v3273_v4 }
  0x81   : > { %v789_v52 = vmul.f32 %v787_v50, %v3273_v4  ;;  %v810_v55 = vmul.f32 %v809_v53, %v3273_v4  ;;  %v790_v56 = vmul.f32 %v787_v50, %v3271_v2  ;;  %v811_v59 = vmul.f32 %v809_v53, %v3271_v2 }
  0x82   : > { %v832_v60 = vmul.f32 %v830_v58, %v3271_v2  ;;  %v831_v62 = vmul.f32 %v830_v58, %v3273_v4  ;;  %v852_v63 = vmul.f32 %v851_v61, %v3273_v4  ;;  %v879_v5 = vstv %s2726_s25  ;;  %s2699_s25 = sld [smem:[#allocation8 + $0x1e]] }
  0x83   : > { %506 = vrot.lane.b32.xlu1 %v499_v9, %s3050_s7  ;;  %508 = vrot.lane.b32.xlu0 %v500_v10, %s3050_s7  ;;  %v853_v6 = vmul.f32 %v851_v61, %v3271_v2  ;;  %v881_v7 = vmul.f32 %v879_v5, %v3301_v16  ;;  %v900_v8 = vstv %s2733_s28  ;;  %v880_v10 = vmul.f32 0.0, %v879_v5  ;;  %s3457_s28 = sld [smem:[#allocation8 + $0x25]] }
  0x84   : > { %v903_v15 = vmul.f32 %v900_v8, %v3309_v19  ;;  %v964_v30 = vstv %s2754_s22  ;;  %v985_v33 = vstv %s2761_s30  ;;  %v1040_v44 = vstv %s2678_s20  ;;  %s2670_s22 = sld [smem:[#allocation8 + $0x1]] }
  0x85   : > { %v988_v41 = vmul.f32 0.0, %v985_v33  ;;  %v1042_v50 = vmul.f32 %v1040_v44, %v3273_v4  ;;  %s2719_s30 = sld [smem:[#allocation8 + $0x32]] }
  0x86   : > { %s2713_s20 = sld [smem:[#allocation8 + $0x2c]] }
  0x87   : > { %527 = vrot.lane.b32.xlu1 %v521_v11, %s3051_s8  ;;  %529 = vrot.lane.b32.xlu0 %v522_v12, %s3051_s8  ;;  %v901_v11 = vmul.f32 0.0, %v900_v8  ;;  %v882_v12 = vmul.f32 %v879_v5, %v3309_v19 }
  0x8b   : > { %551 = vrot.lane.b32.xlu1 %v544_v13, %s3052_s10  ;;  %549 = vrot.lane.b32.xlu0 %v543_v14, %s3052_s10 }
  0x8f   : > { %571 = vrot.lane.b32.xlu1 %v565_v17, %s3053_s18  ;;  %573 = vrot.lane.b32.xlu0 %v566_v18, %s3053_s18  ;;  %v921_v17 = vstv %s2740_s27  ;;  %v902_v18 = vmul.f32 %v900_v8, %v3301_v16  ;;  %s3463_s27 = sld [smem:[#allocation8 + $0x31]] }
  0x93   : > { %602 = vrot.lane.b32.xlu1 %v595_v20, %s3048_s21  ;;  %604 = vrot.lane.b32.xlu0 %v596_v21, %s3048_s21  ;;  %v923_v20 = vmul.f32 %v921_v17, %v3301_v16  ;;  %v943_v21 = vstv %s2747_s29  ;;  %s3054_s29 = smov 51  }
  0x94   : > { %v944_v25 = vmul.f32 %v943_v21, %v3301_v16 }
  0x97   : > { %621 = vrot.lane.b32.xlu1 %v615_v23, %s3049_s6  ;;  %623 = vrot.lane.b32.xlu0 %v616_v24, %s3049_s6  ;;  %v922_v24 = vmul.f32 0.0, %v921_v17 }
  0x9b   : > { %625 = vrot.lane.b32.xlu1 %v617_v26, %s3049_s6  ;;  %642 = vrot.lane.b32.xlu0 %v636_v27, %s3050_s7 }
  0x9f   : > { %644 = vrot.lane.b32.xlu1 %v637_v28, %s3050_s7  ;;  %646 = vrot.lane.b32.xlu0 %v638_v29, %s3050_s7  ;;  %v924_v28 = vmul.f32 %v921_v17, %v3309_v19  ;;  %v946_v29 = vmul.f32 0.0, %v943_v21 }
  0xa3   : > { %664 = vrot.lane.b32.xlu1 %v658_v31, %s3051_s8  ;;  %666 = vrot.lane.b32.xlu0 %v659_v32, %s3051_s8  ;;  %v945_v31 = vmul.f32 %v943_v21, %v3309_v19  ;;  %v966_v32 = vmul.f32 %v964_v30, %v3309_v19 }
  0xa7   : > { %668 = vrot.lane.b32.xlu1 %v660_v34, %s3051_s8  ;;  %685 = vrot.lane.b32.xlu0 %v679_v35, %s3052_s10 }
  0xab   : > { %687 = vrot.lane.b32.xlu1 %v680_v36, %s3052_s10  ;;  %689 = vrot.lane.b32.xlu0 %v681_v37, %s3052_s10  ;;  %v965_v36 = vmul.f32 %v964_v30, %v3301_v16  ;;  %v986_v37 = vmul.f32 %v985_v33, %v3301_v16 }
  0xaf   : > { %706 = vrot.lane.b32.xlu1 %v700_v39, %s3053_s18  ;;  %708 = vrot.lane.b32.xlu0 %v701_v40, %s3053_s18  ;;  %v967_v40 = vmul.f32 0.0, %v964_v30 }
  0xb3   : > { %710 = vrot.lane.b32.xlu1 %v702_v42, %s3053_s18  ;;  %754 = vrot.lane.b32.xlu0 %v747_v43, %s3048_s21 }
  0xb7   : > { %752 = vrot.lane.b32.xlu1 %v746_v46, %s3048_s21  ;;  %773 = vrot.lane.b32.xlu0 %v767_v47, %s3049_s6  ;;  %v987_v46 = vmul.f32 %v985_v33, %v3309_v19  ;;  %v1041_v47 = vmul.f32 0.0, %v1040_v44 }
  0xbb   : > { %756 = vrot.lane.b32.xlu1 %v748_v48, %s3048_s21  ;;  %777 = vrot.lane.b32.xlu0 %v769_v49, %s3049_s6 }
  0xbf   : > { %775 = vrot.lane.b32.xlu1 %v768_v51, %s3049_s6  ;;  %796 = vrot.lane.b32.xlu0 %v789_v52, %s3050_s7  ;;  %v1043_v51 = vmul.f32 %v1040_v44, %v3271_v2  ;;  %v1061_v52 = vstv %s2685_s4  ;;  %v586_v44 = vstv %s3463_s27  ;;  %s2727_s4 = sld [smem:[#allocation8 + $0x3a]] }
  0xc0   : > { %s2755_s27 = sld [smem:[#allocation8 + $0x56]] }
  0xc3   : > { %794 = vrot.lane.b32.xlu1 %v788_v54, %s3050_s7  ;;  %816 = vrot.lane.b32.xlu0 %v810_v55, %s3051_s8  ;;  %v1062_v55 = vmul.f32 0.0, %v1061_v52 }
  0xc7   : > { %798 = vrot.lane.b32.xlu1 %v790_v56, %s3050_s7  ;;  %820 = vrot.lane.b32.xlu0 %v812_v57, %s3051_s8  ;;  %v1063_v56 = vmul.f32 %v1061_v52, %v3273_v4  ;;  %v446_v57 = vstv %s322_s5  ;;  %s3055_s5 = smov 50  }
  0xc8   : > { %v448_v61 = vmul.f32 %v446_v57, %v3273_v4 }
  0xcb   : > { %818 = vrot.lane.b32.xlu1 %v811_v59, %s3051_s8  ;;  %839 = vrot.lane.b32.xlu0 %v832_v60, %s3052_s10  ;;  %v1082_v60 = vstv %s2692_s24  ;;  %s2734_s24 = sld [smem:[#allocation8 + $0x41]] }
  0xcf   : > { %837 = vrot.lane.b32.xlu1 %v831_v62, %s3052_s10  ;;  %858 = vrot.lane.b32.xlu0 %v852_v63, %s3053_s18  ;;  %v1064_v62 = vmul.f32 %v1061_v52, %v3271_v2  ;;  %v1083_v63 = vmul.f32 0.0, %v1082_v60  ;;  %v588_v52 = vmul.f32 %v586_v44, %v3301_v16 }
  0xd1   : > { %v3372_v9 = vpop.permute.xlu0 %460 }
  0xd2   : > { %v3379_v13 = vpop.permute.xlu1 %482 }
  0xd3   : > { %841 = vrot.lane.b32.xlu1 %v833_v0, %s3052_s10  ;;  %862 = vrot.lane.b32.xlu0 %v854_v1, %s3053_s18 }
  0xd5   : > { %v3381_v14 = vpop.permute.xlu0 %504 }
  0xd6   : > { %v3388_v22 = vpop.permute.xlu1 %531 }
  0xd7   : > { %860 = vrot.lane.b32.xlu1 %v853_v6, %s3053_s18  ;;  %888 = vrot.lane.b32.xlu0 %v881_v7, %s3048_s21  ;;  %v449_v6 = vmul.f32 %v446_v57, %v3271_v2  ;;  %v447_v7 = vmul.f32 0.0, %v446_v57 }
  0xd9   : > { %v3390_v23 = vpop.permute.xlu0 %553 }
  0xda   : > { %v3396_v26 = vpop.permute.xlu1 %575 }
  0xdb   : > { %886 = vrot.lane.b32.xlu1 %v880_v10, %s3048_s21  ;;  %907 = vrot.lane.b32.xlu0 %v901_v11, %s3049_s6  ;;  %v1084_v11 = vmul.f32 %v1082_v60, %v3273_v4 }
  0xdd   : > { %v3398_v27 = vpop.permute.xlu0 %600 }
  0xdf   : > { %890 = vrot.lane.b32.xlu1 %v882_v12, %s3048_s21  ;;  %911 = vrot.lane.b32.xlu0 %v903_v15, %s3049_s6  ;;  %v1104_v12 = vstv %s2699_s25  ;;  %v1085_v15 = vmul.f32 %v1082_v60, %v3271_v2  ;;  %s2741_s25 = sld [smem:[#allocation8 + $0x48]] }
  0xe3   : > { %909 = vrot.lane.b32.xlu1 %v902_v18, %s3049_s6  ;;  %930 = vrot.lane.b32.xlu0 %v923_v20, %s3050_s7 }
  0xe7   : > { %928 = vrot.lane.b32.xlu1 %v922_v24, %s3050_s7  ;;  %950 = vrot.lane.b32.xlu0 %v944_v25, %s3051_s8 }
  0xeb   : > { %932 = vrot.lane.b32.xlu1 %v924_v28, %s3050_s7  ;;  %954 = vrot.lane.b32.xlu0 %v946_v29, %s3051_s8  ;;  %v1106_v29 = vmul.f32 %v1104_v12, %v3271_v2 }
  0xed   : > { %v3406_v34 = vpop.permute.xlu1 %464  ;;  %v3408_v35 = vpop.permute.xlu0 %462 }
  0xee   : > { %v468_v0 = vsel %vm466_vm2, %v3408_v35, %v3406_v34  ;;  %v467_v17 = vsel %vm466_vm2, %v3372_v9, %v3408_v35  ;;  %v1105_v9 = vmul.f32 %v1104_v12, %v3273_v4  ;;  %v474_v30 = vadd.f32 %v3406_v34, %v449_v6 }
  0xef   : > { %952 = vrot.lane.b32.xlu1 %v945_v31, %s3051_s8  ;;  %973 = vrot.lane.b32.xlu0 %v966_v32, %s3052_s10  ;;  %v473_v10 = vadd.f32 %v468_v0, %v448_v61  ;;  %v472_v31 = vadd.f32 %v467_v17, %v447_v7 }
  0xf1   : > { %v3414_v38 = vpop.permute.xlu1 %486  ;;  %v3416_v39 = vpop.permute.xlu0 %484 }
  0xf2   : > { %v490_v8 = vsel %vm488_vm3, %v3416_v39, %v3414_v38  ;;  %v489_v25 = vsel %vm488_vm3, %v3379_v13, %v3416_v39  ;;  %v496_v35 = vadd.f32 %v3414_v38, %v474_v30 }
  0xf3   : > { %971 = vrot.lane.b32.xlu1 %v965_v36, %s3052_s10  ;;  %992 = vrot.lane.b32.xlu0 %v986_v37, %s3053_s18  ;;  %v495_v20 = vadd.f32 %v490_v8, %v473_v10  ;;  %v494_v36 = vadd.f32 %v489_v25, %v472_v31 }
  0xf5   : > { %v3420_v42 = vpop.permute.xlu1 %506  ;;  %v3422_v43 = vpop.permute.xlu0 %508 }
  0xf6   : > { %v512_v18 = vsel %vm510_vm4, %v3420_v42, %v3422_v43  ;;  %v511_v13 = vsel %vm510_vm4, %v3381_v14, %v3420_v42  ;;  %v513_v33 = vsel %vm510_vm4, %v3422_v43, %v3381_v14 }
  0xf7   : > { %975 = vrot.lane.b32.xlu1 %v967_v40, %s3052_s10  ;;  %996 = vrot.lane.b32.xlu0 %v988_v41, %s3053_s18  ;;  %v518_v32 = vadd.f32 %v512_v18, %v495_v20  ;;  %v3501_v41 = vstv %s3457_s28  ;;  %v519_v38 = vadd.f32 %v513_v33, %v496_v35  ;;  %s2748_s28 = sld [smem:[#allocation8 + $0x4f]] }
  0xf8   : > { %v1126_v43 = vmul.f32 %v3501_v41, %v3273_v4 }
  0xf9   : > { %v3427_v48 = vpop.permute.xlu1 %527  ;;  %v3429_v49 = vpop.permute.xlu0 %529 }
  0xfa   : > { %v534_v28 = vsel %vm533_vm5, %v3427_v48, %v3429_v49  ;;  %v535_v42 = vsel %vm533_vm5, %v3429_v49, %v3388_v22 }
  0xfb   : > { %994 = vrot.lane.b32.xlu1 %v987_v46, %s3053_s18  ;;  %1047 = vrot.lane.b32.xlu0 %v1041_v47, %s3048_s21  ;;  %v540_v37 = vadd.f32 %v534_v28, %v518_v32  ;;  %v517_v46 = vadd.f32 %v511_v13, %v494_v36  ;;  %v541_v49 = vadd.f32 %v535_v42, %v519_v38 }
  0xfd   : > { %v3435_v53 = vpop.permute.xlu1 %551  ;;  %v3437_v54 = vpop.permute.xlu0 %549  ;;  %v539_v60 = vadd.f32 %v3427_v48, %v517_v46  ;;  %v587_v48 = vmul.f32 0.0, %v586_v44 }
  0xfe   : > { %v556_v34 = vsel %vm555_vm6, %v3437_v54, %v3435_v53  ;;  %v557_v22 = vsel %vm555_vm6, %v3435_v53, %v3390_v23 }
  0xff   : > { %1049 = vrot.lane.b32.xlu1 %v1042_v50, %s3048_s21  ;;  %1051 = vrot.lane.b32.xlu0 %v1043_v51, %s3048_s21  ;;  %v562_v47 = vadd.f32 %v556_v34, %v540_v37  ;;  %v1107_v50 = vmul.f32 0.0, %v1104_v12  ;;  %v563_v61 = vadd.f32 %v557_v22, %v541_v49  ;;  %v561_v23 = vadd.f32 %v3437_v54, %v539_v60 }
 0x101   : > { %v3442_v58 = vpop.permute.xlu1 %571  ;;  %v3444_v59 = vpop.permute.xlu0 %573 }
 0x102   : > { %v578_v14 = vsel %vm577_vm7, %v3442_v58, %v3444_v59  ;;  %v579_v57 = vsel %vm577_vm7, %v3444_v59, %v3396_v26  ;;  %v583_v59 = vadd.f32 %v3442_v58, %v561_v23 }
 0x103   : > { %1068 = vrot.lane.b32.xlu1 %v1062_v55, %s3049_s6  ;;  %1070 = vrot.lane.b32.xlu0 %v1063_v56, %s3049_s6  ;;  %v584_v51 = vadd.f32 %v578_v14, %v562_v47  ;;  %v585_v53 = vadd.f32 %v579_v57, %v563_v61 }
 0x104   : > { %v590_v17 = vadd.f32 %v587_v48, %v583_v59  ;;  %v738_v59 = vstv %s2670_s22  ;;  %s2671_s22 = sld [smem:[#allocation8 + $0x2]] }
 0x105   : > { %v3453_v1 = vpop.permute.xlu1 %602  ;;  %v3455_v5 = vpop.permute.xlu0 %604  ;;  %v591_v0 = vadd.f32 %v588_v52, %v584_v51 }
 0x106   : > { %v607_v26 = vsel %vm466_vm2, %v3453_v1, %v3455_v5  ;;  %v606_v20 = vsel %vm466_vm2, %v3398_v27, %v3453_v1 }
 0x107   : > { %1072 = vrot.lane.b32.xlu1 %v1064_v62, %s3049_s6  ;;  %1089 = vrot.lane.b32.xlu0 %v1083_v63, %s3050_s7  ;;  %v1127_v62 = vmul.f32 %v3501_v41, %v3271_v2  ;;  %v589_v63 = vmul.f32 %v586_v44, %v3309_v19  ;;  %v612_v54 = vadd.f32 %v607_v26, %v591_v0 }
 0x108   : > { %v611_v13 = vadd.f32 %v606_v20, %v590_v17 }
 0x109   : > { %v3475_v21 = vpop.permute.xlu1 %621  ;;  %v3477_v24 = vpop.permute.xlu0 %623  ;;  %v592_v10 = vadd.f32 %v589_v63, %v585_v53 }
 0x10a   : > { %v627_v30 = vsel %vm488_vm3, %v3475_v21, %v3477_v24 }
 0x10b   : > { %1091 = vrot.lane.b32.xlu1 %v1084_v11, %s3050_s7  ;;  %1093 = vrot.lane.b32.xlu0 %v1085_v15, %s3050_s7  ;;  %v613_v58 = vadd.f32 %v3455_v5, %v592_v10  ;;  %v632_v35 = vadd.f32 %v627_v30, %v611_v13 }
 0x10d   : > { %v626_v39 = vpop.permute.xlu1 %625  ;;  %v643_v40 = vpop.permute.xlu0 %642 }
 0x10e   : > { %v628_v8 = vsel %vm488_vm3, %v3477_v24, %v626_v39  ;;  %v634_v33 = vadd.f32 %v626_v39, %v613_v58  ;;  %v740_v58 = vmul.f32 %v738_v59, %v3273_v4 }
 0x10f   : > { %1111 = vrot.lane.b32.xlu1 %v1105_v9, %s3051_s8  ;;  %1113 = vrot.lane.b32.xlu0 %v1106_v29, %s3051_s8  ;;  %v633_v18 = vadd.f32 %v628_v8, %v612_v54  ;;  %v739_v54 = vmul.f32 0.0, %v738_v59 }
 0x111   : > { %v645_v55 = vpop.permute.xlu1 %644  ;;  %v647_v56 = vpop.permute.xlu0 %646 }
 0x112   : > { %v649_v15 = vsel %vm510_vm4, %v645_v55, %v647_v56  ;;  %v650_v31 = vsel %vm510_vm4, %v647_v56, %v643_v40  ;;  %v648_v27 = vsel %vm510_vm4, %v643_v40, %v645_v55 }
 0x113   : > { %1115 = vrot.lane.b32.xlu1 %v1107_v50, %s3051_s8  ;;  %1132 = vrot.lane.b32.xlu0 %v1126_v43, %s3052_s10  ;;  %v655_v28 = vadd.f32 %v649_v15, %v633_v18  ;;  %v656_v5 = vadd.f32 %v650_v31, %v634_v33  ;;  %v654_v24 = vadd.f32 %v648_v27, %v632_v35 }
 0x115   : > { %v665_v6 = vpop.permute.xlu1 %664  ;;  %v667_v7 = vpop.permute.xlu0 %666 }
 0x116   : > { %v670_v25 = vsel %vm533_vm5, %v665_v6, %v667_v7  ;;  %v675_v47 = vadd.f32 %v665_v6, %v654_v24 }
 0x117   : > { %1134 = vrot.lane.b32.xlu1 %v1127_v62, %s3052_s10  ;;  %v676_v34 = vadd.f32 %v670_v25, %v655_v28 }
 0x119   : > { %v669_v11 = vpop.permute.xlu1 %668  ;;  %v686_v12 = vpop.permute.xlu0 %685 }
 0x11a   : > { %v671_v1 = vsel %vm533_vm5, %v667_v7, %v669_v11  ;;  %v696_v22 = vadd.f32 %v686_v12, %v675_v47 }
 0x11b   : > { %v677_v14 = vadd.f32 %v671_v1, %v656_v5 }
 0x11d   : > { %v688_v9 = vpop.permute.xlu1 %687  ;;  %v690_v29 = vpop.permute.xlu0 %689 }
 0x11e   : > { %v691_v32 = vsel %vm555_vm6, %v686_v12, %v688_v9  ;;  %v692_v44 = vsel %vm555_vm6, %v688_v9, %v690_v29  ;;  %v741_v12 = vmul.f32 %v738_v59, %v3271_v2 }
 0x11f   : > { %v697_v36 = vadd.f32 %v691_v32, %v676_v34  ;;  %v698_v46 = vadd.f32 %v692_v44, %v677_v14 }
 0x121   : > { %v707_v37 = vpop.permute.xlu1 %706  ;;  %v709_v42 = vpop.permute.xlu0 %708 }
 0x122   : > { %v712_v21 = vsel %vm577_vm7, %v707_v37, %v709_v42  ;;  %v717_v52 = vadd.f32 %v707_v37, %v696_v22 }
 0x123   : > { %v718_v43 = vadd.f32 %v712_v21, %v697_v36 }
 0x125   : > { %v711_v38 = vpop.permute.xlu1 %710  ;;  %725 = vrot.lane.b32.xlu1 %v718_v43, %s3054_s29  ;;  %v755_v39 = vpop.permute.xlu0 %754 }
 0x126   : > { %v713_v40 = vsel %vm577_vm7, %v709_v42, %v711_v38  ;;  %v872_v38 = vstv %s2719_s30  ;;  %s2720_s30 = sld [smem:[#allocation8 + $0x33]] }
 0x127   : > { %v719_v50 = vadd.f32 %v713_v40, %v698_v46 }
 0x129   : > { %v753_v49 = vpop.permute.xlu1 %752  ;;  %727 = vrot.lane.b32.xlu0 %v719_v50, %s3054_s29  ;;  %v774_v51 = vpop.permute.xlu0 %773 }
 0x12a   : > { %v758_v11 = vsel %vm466_vm2, %v753_v49, %v755_v39 }
 0x12b   : > { %v763_v20 = vadd.f32 %v758_v11, %v739_v54 }
 0x12d   : > { %v757_v55 = vpop.permute.xlu1 %756  ;;  %723 = vrot.lane.b32.xlu0 %v717_v52, %s3054_s29  ;;  %v778_v56 = vpop.permute.xlu0 %777  ;;  %v873_v52 = vmul.f32 0.0, %v872_v38  ;;  %s2762_s29 = sld [smem:[#allocation8 + $0x5d]] }
 0x12e   : > { %v765_v28 = vadd.f32 %v757_v55, %v741_v12  ;;  %v759_v31 = vsel %vm466_vm2, %v755_v39, %v757_v55 }
 0x12f   : > { %v764_v34 = vadd.f32 %v759_v31, %v740_v58 }
 0x130   : > { %v786_v27 = vadd.f32 %v778_v56, %v765_v28 }
 0x131   : > { %v776_v57 = vpop.permute.xlu1 %775  ;;  %v797_v60 = vpop.permute.xlu0 %796 }
 0x132   : > { %v779_v18 = vsel %vm488_vm3, %v774_v51, %v776_v57  ;;  %v780_v13 = vsel %vm488_vm3, %v776_v57, %v778_v56 }
 0x133   : > { %v784_v9 = vadd.f32 %v779_v18, %v763_v20  ;;  %v785_v37 = vadd.f32 %v780_v13, %v764_v34 }
 0x135   : > { %v795_v61 = vpop.permute.xlu1 %794  ;;  %v817_v62 = vpop.permute.xlu0 %816 }
 0x136   : > { %v800_v25 = vsel %vm510_vm4, %v795_v61, %v797_v60 }
 0x137   : > { %v806_v32 = vadd.f32 %v800_v25, %v784_v9 }
 0x139   : > { %v799_v23 = vpop.permute.xlu1 %798  ;;  %v821_v53 = vpop.permute.xlu0 %820  ;;  %v827_v42 = vadd.f32 %v817_v62, %v806_v32 }
 0x13a   : > { %v802_v33 = vsel %vm510_vm4, %v799_v23, %v795_v61  ;;  %v801_v5 = vsel %vm510_vm4, %v797_v60, %v799_v23  ;;  %v875_v60 = vmul.f32 %v872_v38, %v3309_v19 }
 0x13b   : > { %v808_v44 = vadd.f32 %v802_v33, %v786_v27  ;;  %v807_v14 = vadd.f32 %v801_v5, %v785_v37 }
 0x13d   : > { %v819_v63 = vpop.permute.xlu1 %818  ;;  %v840_v0 = vpop.permute.xlu0 %839 }
 0x13e   : > { %v823_v36 = vsel %vm533_vm5, %v819_v63, %v821_v53  ;;  %v822_v21 = vsel %vm533_vm5, %v817_v62, %v819_v63  ;;  %v874_v53 = vmul.f32 %v872_v38, %v3301_v16 }
 0x13f   : > { %v829_v43 = vadd.f32 %v823_v36, %v808_v44  ;;  %v828_v22 = vadd.f32 %v822_v21, %v807_v14 }
 0x141   : > { %v838_v7 = vpop.permute.xlu1 %837  ;;  %v859_v6 = vpop.permute.xlu0 %858 }
 0x142   : > { %v848_v46 = vadd.f32 %v838_v7, %v827_v42  ;;  %v843_v47 = vsel %vm555_vm6, %v838_v7, %v840_v0 }
 0x143   : > { %v849_v55 = vadd.f32 %v843_v47, %v828_v22 }
 0x144   : > { %v869_v56 = vadd.f32 %v859_v6, %v848_v46 }
 0x145   : > { %v842_v26 = vpop.permute.xlu1 %841  ;;  %v863_v48 = vpop.permute.xlu0 %862 }
 0x146   : > { %v844_v24 = vsel %vm555_vm6, %v840_v0, %v842_v26  ;;  %v876_v0 = vadd.f32 %v873_v52, %v869_v56  ;;  %v1174_v52 = vstv %s2727_s4  ;;  %s2686_s4 = sld [smem:[#allocation8 + $0x11]] }
 0x147   : > { %v850_v49 = vadd.f32 %v844_v24, %v829_v43 }
 0x149   : > { %v861_v8 = vpop.permute.xlu1 %860  ;;  %v889_v10 = vpop.permute.xlu0 %888 }
 0x14a   : > { %v865_v50 = vsel %vm577_vm7, %v861_v8, %v863_v48  ;;  %v864_v51 = vsel %vm577_vm7, %v859_v6, %v861_v8 }
 0x14b   : > { %v871_v57 = vadd.f32 %v865_v50, %v850_v49  ;;  %v870_v23 = vadd.f32 %v864_v51, %v849_v55  ;;  %v1146_v50 = vstv %s2713_s20  ;;  %v1175_v55 = vmul.f32 0.0, %v1174_v52  ;;  %s2679_s20 = sld [smem:[#allocation8 + $0xa]] }
 0x14c   : > { %v1148_v49 = vmul.f32 %v1146_v50, %v3271_v2  ;;  %v1147_v51 = vmul.f32 %v1146_v50, %v3273_v4  ;;  %v1149_v56 = vmul.f32 0.0, %v1146_v50 }
 0x14d   : > { %v887_v15 = vpop.permute.xlu1 %886  ;;  %v908_v17 = vpop.permute.xlu0 %907  ;;  %v878_v7 = vadd.f32 %v875_v60, %v871_v57  ;;  %v877_v6 = vadd.f32 %v874_v53, %v870_v23  ;;  %v1176_v57 = vmul.f32 %v1174_v52, %v3301_v16  ;;  %v1195_v60 = vstv %s2734_s24  ;;  %s2693_s24 = sld [smem:[#allocation8 + $0x18]] }
 0x14e   : > { %v892_v63 = vsel %vm466_vm2, %v887_v15, %v889_v10  ;;  %v1216_v23 = vstv %s2741_s25  ;;  %s2700_s25 = sld [smem:[#allocation8 + $0x1f]] }
 0x14f   : > { %v897_v54 = vadd.f32 %v892_v63, %v876_v0  ;;  %v1217_v53 = vmul.f32 0.0, %v1216_v23  ;;  %v1198_v63 = vmul.f32 %v1195_v60, %v3309_v19  ;;  %v1219_v0 = vmul.f32 %v1216_v23, %v3309_v19 }
 0x151   : > { %v891_v29 = vpop.permute.xlu1 %890  ;;  %v912_v30 = vpop.permute.xlu0 %911 }
 0x152   : > { %v893_v59 = vsel %vm466_vm2, %v889_v10, %v891_v29  ;;  %v899_v11 = vadd.f32 %v891_v29, %v878_v7  ;;  %v1218_v7 = vmul.f32 %v1216_v23, %v3301_v16 }
 0x153   : > { %v898_v20 = vadd.f32 %v893_v59, %v877_v6 }
 0x154   : > { %v920_v9 = vadd.f32 %v912_v30, %v899_v11 }
 0x155   : > { %v910_v1 = vpop.permute.xlu1 %909  ;;  %v931_v35 = vpop.permute.xlu0 %930 }
 0x156   : > { %v913_v8 = vsel %vm488_vm3, %v908_v17, %v910_v1  ;;  %v914_v12 = vsel %vm488_vm3, %v910_v1, %v912_v30 }
 0x157   : > { %v918_v25 = vadd.f32 %v913_v8, %v897_v54  ;;  %v919_v31 = vadd.f32 %v914_v12, %v898_v20  ;;  %v1259_v8 = vstv %s2755_s27  ;;  %s2714_s27 = sld [smem:[#allocation8 + $0x2d]] }
 0x158   : > { %v1260_v54 = vmul.f32 %v1259_v8, %v3301_v16  ;;  %v1262_v11 = vmul.f32 0.0, %v1259_v8  ;;  %v1261_v12 = vmul.f32 %v1259_v8, %v3309_v19 }
 0x159   : > { %v929_v39 = vpop.permute.xlu1 %928  ;;  %v951_v40 = vpop.permute.xlu0 %950 }
 0x15a   : > { %v934_v18 = vsel %vm510_vm4, %v929_v39, %v931_v35 }
 0x15b   : > { %v940_v32 = vadd.f32 %v934_v18, %v918_v25  ;;  %v1280_v18 = vstv %s2762_s29  ;;  %s2728_s29 = sld [smem:[#allocation8 + $0x3b]] }
 0x15c   : > { %v1282_v20 = vmul.f32 %v1280_v18, %v3309_v19  ;;  %v1281_v25 = vmul.f32 %v1280_v18, %v3301_v16 }
 0x15d   : > { %v933_v61 = vpop.permute.xlu1 %932  ;;  %v955_v62 = vpop.permute.xlu0 %954  ;;  %v961_v5 = vadd.f32 %v951_v40, %v940_v32 }
 0x15e   : > { %v935_v15 = vsel %vm510_vm4, %v931_v35, %v933_v61  ;;  %v936_v28 = vsel %vm510_vm4, %v933_v61, %v929_v39  ;;  %v1197_v61 = vmul.f32 %v1195_v60, %v3301_v16 }
 0x15f   : > { %v941_v29 = vadd.f32 %v935_v15, %v919_v31  ;;  %v942_v33 = vadd.f32 %v936_v28, %v920_v9 }
 0x161   : > { %v953_v26 = vpop.permute.xlu1 %952  ;;  %v974_v48 = vpop.permute.xlu0 %973 }
 0x162   : > { %v956_v17 = vsel %vm533_vm5, %v951_v40, %v953_v26  ;;  %v957_v13 = vsel %vm533_vm5, %v953_v26, %v955_v62  ;;  %v1128_v40 = vmul.f32 0.0, %v3501_v41  ;;  %v1177_v41 = vmul.f32 %v1174_v52, %v3309_v19 }
 0x163   : > { %v962_v36 = vadd.f32 %v956_v17, %v941_v29  ;;  %v963_v35 = vadd.f32 %v957_v13, %v942_v33  ;;  %v1196_v62 = vmul.f32 0.0, %v1195_v60  ;;  %v1238_v26 = vstv %s2748_s28  ;;  %s2707_s28 = sld [smem:[#allocation8 + $0x26]] }
 0x164   : > { %v1239_v59 = vmul.f32 %v1238_v26, %v3301_v16  ;;  %v1241_v6 = vmul.f32 0.0, %v1238_v26 }
 0x165   : > { %v972_v58 = vpop.permute.xlu1 %971  ;;  %v993_v10 = vpop.permute.xlu0 %992 }
 0x166   : > { %v977_v27 = vsel %vm555_vm6, %v972_v58, %v974_v48  ;;  %v982_v30 = vadd.f32 %v972_v58, %v961_v5  ;;  %v1283_v58 = vmul.f32 0.0, %v1280_v18 }
 0x167   : > { %v983_v42 = vadd.f32 %v977_v27, %v962_v36 }
 0x168   : > { %v1003_v38 = vadd.f32 %v993_v10, %v982_v30 }
 0x169   : > { %v976_v34 = vpop.permute.xlu1 %975  ;;  %v997_v37 = vpop.permute.xlu0 %996 }
 0x16a   : > { %v978_v1 = vsel %vm555_vm6, %v974_v48, %v976_v34  ;;  %v1009_v22 = vrot.slane %v1003_v38, 7  ;;  %v1240_v48 = vmul.f32 %v1238_v26, %v3309_v19 }
 0x16b   : > { %v984_v44 = vadd.f32 %v978_v1, %v963_v35 }
 0x16d   : > { %v995_v21 = vpop.permute.xlu1 %994  ;;  %v1048_v15 = vpop.permute.xlu0 %1047 }
 0x16e   : > { %v998_v24 = vsel %vm577_vm7, %v993_v10, %v995_v21  ;;  %v999_v14 = vsel %vm577_vm7, %v995_v21, %v997_v37 }
 0x16f   : > { %v1005_v43 = vadd.f32 %v999_v14, %v984_v44  ;;  %v1004_v46 = vadd.f32 %v998_v24, %v983_v42  ;;  %v1033_v44 = vstv %s2671_s22  ;;  %s2735_s22 = sld [smem:[#allocation8 + $0x42]] }
 0x170   : > { %v1034_v14 = vmul.f32 0.0, %v1033_v44 }
 0x171   : > { %v1011_v39 = vrot.slane %v1005_v43, 7  ;;  %v1010_v47 = vrot.slane %v1004_v46, 7  ;;  %v1050_v28 = vpop.permute.xlu1 %1049  ;;  %v1052_v9 = vpop.permute.xlu0 %1051  ;;  %v1035_v46 = vmul.f32 %v1033_v44, %v3273_v4 }
 0x172   : > { %v1053_v43 = vsel %vm466_vm2, %v1048_v15, %v1050_v28 }
 0x173   : > { %1014 = vrot.lane.b32.xlu0 %v1010_v47, %s3055_s5  ;;  %1016 = vrot.lane.b32.xlu1 %v1011_v39, %s3055_s5  ;;  %v1058_v47 = vadd.f32 %v1053_v43, %v1034_v14 }
 0x175   : > { %v1069_v31 = vpop.permute.xlu1 %1068  ;;  %v1071_v32 = vpop.permute.xlu0 %1070 }
 0x176   : > { %v1074_v50 = vsel %vm488_vm3, %v1069_v31, %v1071_v32 }
 0x177   : > { %1136 = vrot.lane.b32.xlu0 %v1128_v40, %s3052_s10  ;;  %1012 = vrot.lane.b32.xlu1 %v1009_v22, %s3055_s5  ;;  %v1054_v40 = vsel %vm466_vm2, %v1050_v28, %v1052_v9  ;;  %v1036_v22 = vmul.f32 %v1033_v44, %v3271_v2  ;;  %s3056_s5 = smov 49  }
 0x179   : > { %v1073_v10 = vpop.permute.xlu1 %1072  ;;  %v1090_v17 = vpop.permute.xlu0 %1089 }
 0x17b   : > { %1155 = vrot.lane.b32.xlu0 %v1148_v49, %s3053_s18  ;;  %1153 = vrot.lane.b32.xlu1 %v1147_v51, %s3053_s18  ;;  %v1059_v49 = vadd.f32 %v1054_v40, %v1035_v46 }
 0x17d   : > { %v1092_v13 = vpop.permute.xlu1 %1091  ;;  %v1094_v29 = vpop.permute.xlu0 %1093 }
 0x17f   : > { %1181 = vrot.lane.b32.xlu0 %v1175_v55, %s3048_s21  ;;  %1157 = vrot.lane.b32.xlu1 %v1149_v56, %s3053_s18  ;;  %v1075_v55 = vsel %vm488_vm3, %v1071_v32, %v1073_v10  ;;  %v1079_v56 = vadd.f32 %v1074_v50, %v1058_v47 }
 0x180   : > { %v1080_v60 = vadd.f32 %v1075_v55, %v1059_v49 }
 0x181   : > { %v1112_v33 = vpop.permute.xlu1 %1111  ;;  %v1114_v34 = vpop.permute.xlu0 %1113 }
 0x183   : > { %1185 = vrot.lane.b32.xlu0 %v1177_v41, %s3048_s21  ;;  %1183 = vrot.lane.b32.xlu1 %v1176_v57, %s3048_s21  ;;  %v1095_v41 = vsel %vm510_vm4, %v1090_v17, %v1092_v13  ;;  %v1060_v57 = vadd.f32 %v1052_v9, %v1036_v22 }
 0x184   : > { %v1101_v23 = vadd.f32 %v1095_v41, %v1079_v56 }
 0x185   : > { %v1116_v27 = vpop.permute.xlu1 %1115  ;;  %v1133_v1 = vpop.permute.xlu0 %1132 }
 0x186   : > { %v1122_v8 = vadd.f32 %v1112_v33, %v1101_v23 }
 0x187   : > { %1204 = vrot.lane.b32.xlu0 %v1197_v61, %s3049_s6  ;;  %1202 = vrot.lane.b32.xlu1 %v1196_v62, %s3049_s6 }
 0x189   : > { %v1135_v5 = vpop.permute.xlu1 %1134 }
 0x18b   : > { %1223 = vrot.lane.b32.xlu0 %v1217_v53, %s3050_s7  ;;  %1206 = vrot.lane.b32.xlu1 %v1198_v63, %s3049_s6  ;;  %v1096_v53 = vsel %vm510_vm4, %v1092_v13, %v1094_v29  ;;  %v1081_v63 = vadd.f32 %v1073_v10, %v1060_v57 }
 0x18f   : > { %1227 = vrot.lane.b32.xlu0 %v1219_v0, %s3050_s7  ;;  %1225 = vrot.lane.b32.xlu1 %v1218_v7, %s3050_s7  ;;  %v1102_v0 = vadd.f32 %v1096_v53, %v1080_v60 }
 0x193   : > { %1247 = vrot.lane.b32.xlu0 %v1240_v48, %s3051_s8  ;;  %1245 = vrot.lane.b32.xlu1 %v1239_v59, %s3051_s8  ;;  %v1097_v48 = vsel %vm510_vm4, %v1094_v29, %v1090_v17  ;;  %v1117_v59 = vsel %vm533_vm5, %v1112_v33, %v1114_v34 }
 0x197   : > { %1266 = vrot.lane.b32.xlu0 %v1260_v54, %s3052_s10  ;;  %1249 = vrot.lane.b32.xlu1 %v1241_v6, %s3051_s8  ;;  %v3620_v35 = vpop.permute.xlu1 %725  ;;  %v1103_v54 = vadd.f32 %v1097_v48, %v1081_v63  ;;  %v1123_v6 = vadd.f32 %v1117_v59, %v1102_v0 }
 0x198   : > { %4339 = vst [vmem:[#allocation19_spill] sm:$0xff] %v3620_v35 }
 0x19b   : > { %1270 = vrot.lane.b32.xlu0 %v1262_v11, %s3052_s10  ;;  %1268 = vrot.lane.b32.xlu1 %v1261_v12, %s3052_s10  ;;  %v3618_v36 = vpop.permute.xlu0 %727  ;;  %v1167_v11 = vstv %s2720_s30  ;;  %s2742_s30 = sld [smem:[#allocation8 + $0x49]] }
 0x19c   : > { %4338 = vst [vmem:[#allocation18_spill] sm:$0xff] %v3618_v36  ;;  %v1168_v28 = vmul.f32 0.0, %v1167_v11  ;;  %v1169_v14 = vmul.f32 %v1167_v11, %v3301_v16 }
 0x19f   : > { %1289 = vrot.lane.b32.xlu0 %v1282_v20, %s3053_s18  ;;  %1287 = vrot.lane.b32.xlu1 %v1281_v25, %s3053_s18  ;;  %v3622_v37 = vpop.permute.xlu0 %723  ;;  %v1118_v20 = vsel %vm533_vm5, %v1114_v34, %v1116_v27  ;;  %v1138_v25 = vsel %vm555_vm6, %v1133_v1, %v1135_v5 }
 0x1a0   : > { %4340 = vst [vmem:[#allocation20_spill] sm:$0xff] %v3622_v37  ;;  %v1124_v32 = vadd.f32 %v1118_v20, %v1103_v54  ;;  %v1144_v10 = vadd.f32 %v1138_v25, %v1123_v6 }
 0x1a3   : > { %1291 = vrot.lane.b32.xlu1 %v1283_v58, %s3053_s18  ;;  %v1143_v58 = vadd.f32 %v1133_v1, %v1122_v8  ;;  %v1170_v1 = vmul.f32 %v1167_v11, %v3309_v19 }
 0x1e5   : > { %v3624_v30 = vpop.permute.xlu0 %1014  ;;  %v3626_v42 = vpop.permute.xlu1 %1016 }
 0x1e6   : > { %4341 = vst [vmem:[#allocation21_spill] sm:$0xff] %v3626_v42 }
 0x1e9   : > { %v1137_v21 = vpop.permute.xlu0 %1136  ;;  %v3628_v24 = vpop.permute.xlu1 %1012 }
 0x1ea   : > { %v1139_v15 = vsel %vm555_vm6, %v1135_v5, %v1137_v21 }
 0x1eb   : > { %v1145_v33 = vadd.f32 %v1139_v15, %v1124_v32 }
 0x1ed   : > { %v1156_v38 = vpop.permute.xlu0 %1155  ;;  %v1154_v39 = vpop.permute.xlu1 %1153 }
 0x1ee   : > { %v1159_v9 = vsel %vm577_vm7, %v1154_v39, %v1156_v38  ;;  %v1164_v31 = vadd.f32 %v1154_v39, %v1143_v58 }
 0x1ef   : > { %v1165_v44 = vadd.f32 %v1159_v9, %v1144_v10 }
 0x1f0   : > { %v1171_v27 = vadd.f32 %v1168_v28, %v1164_v31  ;;  %v1335_v31 = vstv %s2679_s20  ;;  %s2749_s20 = sld [smem:[#allocation8 + $0x50]] }
 0x1f1   : > { %v1182_v51 = vpop.permute.xlu0 %1181  ;;  %v1158_v52 = vpop.permute.xlu1 %1157  ;;  %v1172_v40 = vadd.f32 %v1169_v14, %v1165_v44  ;;  %v1338_v44 = vmul.f32 %v1335_v31, %v3271_v2  ;;  %v1337_v14 = vmul.f32 %v1335_v31, %v3273_v4 }
 0x1f2   : > { %v1160_v29 = vsel %vm577_vm7, %v1156_v38, %v1158_v52 }
 0x1f3   : > { %v1166_v5 = vadd.f32 %v1160_v29, %v1145_v33  ;;  %v1336_v29 = vmul.f32 0.0, %v1335_v31 }
 0x1f5   : > { %v1186_v61 = vpop.permute.xlu0 %1185  ;;  %v1184_v62 = vpop.permute.xlu1 %1183  ;;  %v1173_v49 = vadd.f32 %v1170_v1, %v1166_v5  ;;  %v1377_v5 = vstv %s2693_s24  ;;  %s2672_s24 = sld [smem:[#allocation8 + $0x3]] }
 0x1f6   : > { %v1187_v34 = vsel %vm466_vm2, %v1182_v51, %v1184_v62  ;;  %v1188_v39 = vsel %vm466_vm2, %v1184_v62, %v1186_v61 }
 0x1f7   : > { %v1192_v47 = vadd.f32 %v1187_v34, %v1171_v27  ;;  %v1193_v52 = vadd.f32 %v1188_v39, %v1172_v40  ;;  %v1194_v23 = vadd.f32 %v1186_v61, %v1173_v49  ;;  %v1356_v34 = vstv %s2686_s4  ;;  %s2756_s4 = sld [smem:[#allocation8 + $0x57]] }
 0x1f8   : > { %v1358_v27 = vmul.f32 %v1356_v34, %v3273_v4  ;;  %v1357_v1 = vmul.f32 0.0, %v1356_v34  ;;  %v1379_v39 = vmul.f32 %v1377_v5, %v3273_v4 }
 0x1f9   : > { %v1205_v7 = vpop.permute.xlu0 %1204  ;;  %v1203_v26 = vpop.permute.xlu1 %1202 }
 0x1fa   : > { %v1208_v21 = vsel %vm488_vm3, %v1203_v26, %v1205_v7 }
 0x1fb   : > { %v1213_v50 = vadd.f32 %v1208_v21, %v1192_v47  ;;  %v1378_v21 = vmul.f32 0.0, %v1377_v5  ;;  %v1399_v47 = vstv %s2700_s25  ;;  %s2721_s25 = sld [smem:[#allocation8 + $0x34]] }
 0x1fc   : > { %v1401_v40 = vmul.f32 %v1399_v47, %v3271_v2  ;;  %v1402_v49 = vmul.f32 0.0, %v1399_v47 }
 0x1fd   : > { %v1224_v12 = vpop.permute.xlu0 %1223  ;;  %v1207_v18 = vpop.permute.xlu1 %1206 }
 0x1fe   : > { %v1209_v22 = vsel %vm488_vm3, %v1205_v7, %v1207_v18  ;;  %v1215_v48 = vadd.f32 %v1207_v18, %v1194_v23 }
 0x1ff   : > { %v1214_v57 = vadd.f32 %v1209_v22, %v1193_v52 }
 0x201   : > { %v1228_v17 = vpop.permute.xlu0 %1227  ;;  %v1226_v13 = vpop.permute.xlu1 %1225 }
 0x202   : > { %v1229_v38 = vsel %vm510_vm4, %v1224_v12, %v1226_v13  ;;  %v1230_v56 = vsel %vm510_vm4, %v1226_v13, %v1228_v17  ;;  %v1231_v0 = vsel %vm510_vm4, %v1228_v17, %v1224_v12 }
 0x203   : > { %v1235_v41 = vadd.f32 %v1229_v38, %v1213_v50  ;;  %v1236_v62 = vadd.f32 %v1230_v56, %v1214_v57  ;;  %v1237_v6 = vadd.f32 %v1231_v0, %v1215_v48  ;;  %v1400_v38 = vmul.f32 %v1399_v47, %v3273_v4 }
 0x204   : > { %v1420_v50 = vstv %s2707_s28  ;;  %v1469_v57 = vstv %s2728_s29  ;;  %s2680_s28 = sld [smem:[#allocation8 + $0xb]] }
 0x205   : > { %v1248_v43 = vpop.permute.xlu0 %1247  ;;  %v1246_v46 = vpop.permute.xlu1 %1245  ;;  %v1421_v22 = vmul.f32 %v1420_v50, %v3273_v4  ;;  %v1423_v52 = vmul.f32 0.0, %v1420_v50  ;;  %s2694_s29 = sld [smem:[#allocation8 + $0x19]] }
 0x206   : > { %v1251_v60 = vsel %vm533_vm5, %v1246_v46, %v1248_v43  ;;  %v1256_v26 = vadd.f32 %v1246_v46, %v1235_v41  ;;  %v1380_v46 = vmul.f32 %v1377_v5, %v3271_v2 }
 0x207   : > { %v1257_v59 = vadd.f32 %v1251_v60, %v1236_v62  ;;  %v1470_v60 = vmul.f32 0.0, %v1469_v57  ;;  %v1472_v62 = vmul.f32 %v1469_v57, %v3309_v19 }
 0x209   : > { %v1267_v51 = vpop.permute.xlu0 %1266  ;;  %v1250_v55 = vpop.permute.xlu1 %1249 }
 0x20a   : > { %v1277_v8 = vadd.f32 %v1267_v51, %v1256_v26  ;;  %v1252_v54 = vsel %vm533_vm5, %v1248_v43, %v1250_v55  ;;  %v1359_v43 = vmul.f32 %v1356_v34, %v3271_v2  ;;  %v1441_v55 = vstv %s2714_s27  ;;  %s2687_s27 = sld [smem:[#allocation8 + $0x12]] }
 0x20b   : > { %v1258_v28 = vadd.f32 %v1252_v54, %v1237_v6  ;;  %v1443_v56 = vmul.f32 %v1441_v55, %v3271_v2  ;;  %v1442_v41 = vmul.f32 %v1441_v55, %v3273_v4  ;;  %v1444_v23 = vmul.f32 0.0, %v1441_v55 }
 0x20c   : > { %v1533_v6 = vstv %s2749_s20  ;;  %s2715_s20 = sld [smem:[#allocation8 + $0x2e]] }
 0x20d   : > { %v1271_v53 = vpop.permute.xlu0 %1270  ;;  %v1269_v63 = vpop.permute.xlu1 %1268 }
 0x20e   : > { %v1272_v7 = vsel %vm555_vm6, %v1267_v51, %v1269_v63  ;;  %v1273_v58 = vsel %vm555_vm6, %v1269_v63, %v1271_v53  ;;  %v1422_v51 = vmul.f32 %v1420_v50, %v3271_v2  ;;  %v1471_v53 = vmul.f32 %v1469_v57, %v3301_v16 }
 0x20f   : > { %v1278_v11 = vadd.f32 %v1272_v7, %v1257_v59  ;;  %v1279_v32 = vadd.f32 %v1273_v58, %v1258_v28  ;;  %v1490_v63 = vstv %s2735_s22  ;;  %v1511_v7 = vstv %s2742_s30  ;;  %s2701_s22 = sld [smem:[#allocation8 + $0x20]] }
 0x210   : > { %v1492_v0 = vmul.f32 %v1490_v63, %v3301_v16  ;;  %v1491_v26 = vmul.f32 0.0, %v1490_v63  ;;  %v1512_v48 = vmul.f32 0.0, %v1511_v7  ;;  %v1493_v59 = vmul.f32 %v1490_v63, %v3309_v19  ;;  %s2708_s30 = sld [smem:[#allocation8 + $0x27]] }
 0x211   : > { %v1290_v20 = vpop.permute.xlu0 %1289  ;;  %v1288_v25 = vpop.permute.xlu1 %1287  ;;  %v1513_v54 = vmul.f32 %v1511_v7, %v3301_v16 }
 0x212   : > { %v1293_v61 = vsel %vm577_vm7, %v1288_v25, %v1290_v20  ;;  %v1298_v15 = vadd.f32 %v1288_v25, %v1277_v8  ;;  %v1514_v8 = vmul.f32 %v1511_v7, %v3309_v19  ;;  %v1554_v25 = vstv %s2756_s4  ;;  %s2729_s4 = sld [smem:[#allocation8 + $0x3c]] }
 0x213   : > { %v1299_v9 = vadd.f32 %v1293_v61, %v1278_v11  ;;  %v1535_v11 = vmul.f32 %v1533_v6, %v3309_v19  ;;  %v1555_v58 = vmul.f32 %v1554_v25, %v3301_v16  ;;  %v1536_v61 = vmul.f32 0.0, %v1533_v6 }
 0x214   : > { %v1304_v12 = vrot.slane %v1298_v15, 6  ;;  %v1557_v15 = vmul.f32 0.0, %v1554_v25  ;;  %v1556_v28 = vmul.f32 %v1554_v25, %v3309_v19 }
 0x215   : > { %v1305_v18 = vrot.slane %v1299_v9, 6  ;;  %v1292_v10 = vpop.permute.xlu1 %1291 }
 0x216   : > { %v1294_v17 = vsel %vm577_vm7, %v1290_v20, %v1292_v10  ;;  %1307 = vrot.lane.b32.xlu0 %v1304_v12, %s3056_s5  ;;  %v1534_v20 = vmul.f32 %v1533_v6, %v3301_v16 }
 0x217   : > { %v1300_v13 = vadd.f32 %v1294_v17, %v1279_v32  ;;  %1309 = vrot.lane.b32.xlu1 %v1305_v18, %s3056_s5 }
 0x219   : > { %v1306_v33 = vrot.slane %v1300_v13, 6 }
 0x21b   : > { %1342 = vrot.lane.b32.xlu1 %v1336_v29, %s3048_s21  ;;  %1311 = vrot.lane.b32.xlu0 %v1306_v33, %s3056_s5  ;;  %s2763_s5 = sld [smem:[#allocation8 + $0x5e]] }
 0x21f   : > { %1346 = vrot.lane.b32.xlu1 %v1338_v44, %s3048_s21  ;;  %1344 = vrot.lane.b32.xlu0 %v1337_v14, %s3048_s21 }
 0x221   : > { %v1575_v9 = vstv %s2763_s5  ;;  %s2681_s5 = sld [smem:[#allocation8 + $0xc]] }
 0x222   : > { %v1577_v12 = vmul.f32 %v1575_v9, %v3309_v19  ;;  %v1576_v31 = vmul.f32 %v1575_v9, %v3301_v16  ;;  %v1578_v32 = vmul.f32 0.0, %v1575_v9 }
 0x223   : > { %1365 = vrot.lane.b32.xlu1 %v1358_v27, %s3049_s6  ;;  %1363 = vrot.lane.b32.xlu0 %v1357_v1, %s3049_s6 }
 0x227   : > { %1384 = vrot.lane.b32.xlu1 %v1378_v21, %s3050_s7  ;;  %1367 = vrot.lane.b32.xlu0 %v1359_v43, %s3049_s6 }
 0x22b   : > { %1388 = vrot.lane.b32.xlu1 %v1380_v46, %s3050_s7  ;;  %1386 = vrot.lane.b32.xlu0 %v1379_v39, %s3050_s7 }
 0x22f   : > { %1408 = vrot.lane.b32.xlu1 %v1401_v40, %s3051_s8  ;;  %1406 = vrot.lane.b32.xlu0 %v1400_v38, %s3051_s8  ;;  %v1328_v38 = vstv %s2672_s24  ;;  %s2688_s24 = sld [smem:[#allocation8 + $0x13]] }
 0x230   : > { %v1330_v57 = vmul.f32 %v1328_v38, %v3273_v4 }
 0x233   : > { %1427 = vrot.lane.b32.xlu1 %v1421_v22, %s3052_s10  ;;  %1410 = vrot.lane.b32.xlu0 %v1402_v49, %s3051_s8  ;;  %v1329_v49 = vmul.f32 0.0, %v1328_v38 }
 0x237   : > { %1431 = vrot.lane.b32.xlu1 %v1423_v52, %s3052_s10  ;;  %1429 = vrot.lane.b32.xlu0 %v1422_v51, %s3052_s10 }
 0x23b   : > { %1450 = vrot.lane.b32.xlu1 %v1443_v56, %s3053_s18  ;;  %1448 = vrot.lane.b32.xlu0 %v1442_v41, %s3053_s18 }
 0x23f   : > { %1476 = vrot.lane.b32.xlu1 %v1470_v60, %s3048_s21  ;;  %1452 = vrot.lane.b32.xlu0 %v1444_v23, %s3053_s18 }
 0x243   : > { %1480 = vrot.lane.b32.xlu1 %v1472_v62, %s3048_s21  ;;  %1478 = vrot.lane.b32.xlu0 %v1471_v53, %s3048_s21 }
 0x247   : > { %1499 = vrot.lane.b32.xlu1 %v1492_v0, %s3049_s6  ;;  %1497 = vrot.lane.b32.xlu0 %v1491_v26, %s3049_s6  ;;  %v1331_v0 = vmul.f32 %v1328_v38, %v3271_v2 }
 0x24b   : > { %1518 = vrot.lane.b32.xlu1 %v1512_v48, %s3050_s7  ;;  %1501 = vrot.lane.b32.xlu0 %v1493_v59, %s3049_s6 }
 0x24f   : > { %1522 = vrot.lane.b32.xlu1 %v1514_v8, %s3050_s7  ;;  %1520 = vrot.lane.b32.xlu0 %v1513_v54, %s3050_s7 }
 0x253   : > { %1542 = vrot.lane.b32.xlu1 %v1535_v11, %s3051_s8  ;;  %1540 = vrot.lane.b32.xlu0 %v1534_v20, %s3051_s8 }
 0x257   : > { %1561 = vrot.lane.b32.xlu1 %v1555_v58, %s3052_s10  ;;  %1544 = vrot.lane.b32.xlu0 %v1536_v61, %s3051_s8 }
 0x25b   : > { %1565 = vrot.lane.b32.xlu1 %v1557_v15, %s3052_s10  ;;  %1563 = vrot.lane.b32.xlu0 %v1556_v28, %s3052_s10  ;;  %v1462_v28 = vstv %s2721_s25  ;;  %s2682_s25 = sld [smem:[#allocation8 + $0xd]] }
 0x25f   : > { %1584 = vrot.lane.b32.xlu1 %v1577_v12, %s3053_s18  ;;  %1582 = vrot.lane.b32.xlu0 %v1576_v31, %s3053_s18 }
 0x263   : > { %1586 = vrot.lane.b32.xlu0 %v1578_v32, %s3053_s18 }
 0x288   : > { %v3720_v18 = vpop.permute.xlu0 %1307 }
 0x289   : > { %v3722_v10 = vpop.permute.xlu1 %1309 }
 0x28d   : > { %v3724_v17 = vpop.permute.xlu0 %1311  ;;  %v1343_v13 = vpop.permute.xlu1 %1342 }
 0x28e   : > { %4342 = vst [vmem:[#allocation22_spill] sm:$0xff] %v3724_v17 }
 0x291   : > { %v1345_v29 = vpop.permute.xlu0 %1344  ;;  %v1347_v33 = vpop.permute.xlu1 %1346 }
 0x292   : > { %v1348_v52 = vsel %vm466_vm2, %v1343_v13, %v1345_v29  ;;  %v1349_v53 = vsel %vm466_vm2, %v1345_v29, %v1347_v33  ;;  %v1355_v6 = vadd.f32 %v1347_v33, %v1331_v0 }
 0x293   : > { %v1353_v41 = vadd.f32 %v1348_v52, %v1329_v49  ;;  %v1354_v48 = vadd.f32 %v1349_v53, %v1330_v57 }
 0x295   : > { %v1364_v44 = vpop.permute.xlu0 %1363  ;;  %v1366_v14 = vpop.permute.xlu1 %1365 }
 0x296   : > { %v1369_v56 = vsel %vm488_vm3, %v1364_v44, %v1366_v14 }
 0x297   : > { %v1374_v63 = vadd.f32 %v1369_v56, %v1353_v41  ;;  %v1465_v41 = vmul.f32 %v1462_v28, %v3309_v19 }
 0x299   : > { %v1368_v34 = vpop.permute.xlu0 %1367  ;;  %v1385_v27 = vpop.permute.xlu1 %1384 }
 0x29a   : > { %v1370_v26 = vsel %vm488_vm3, %v1366_v14, %v1368_v34  ;;  %v1376_v61 = vadd.f32 %v1368_v34, %v1355_v6  ;;  %v1463_v14 = vmul.f32 0.0, %v1462_v28 }
 0x29b   : > { %v1375_v11 = vadd.f32 %v1370_v26, %v1354_v48 }
 0x29d   : > { %v1387_v1 = vpop.permute.xlu0 %1386  ;;  %v1389_v5 = vpop.permute.xlu1 %1388 }
 0x29e   : > { %v1390_v60 = vsel %vm510_vm4, %v1385_v27, %v1387_v1  ;;  %v1391_v54 = vsel %vm510_vm4, %v1387_v1, %v1389_v5  ;;  %v1392_v20 = vsel %vm510_vm4, %v1389_v5, %v1385_v27 }
 0x29f   : > { %v1396_v7 = vadd.f32 %v1390_v60, %v1374_v63  ;;  %v1397_v15 = vadd.f32 %v1391_v54, %v1375_v11  ;;  %v1398_v29 = vadd.f32 %v1392_v20, %v1376_v61 }
 0x2a1   : > { %v1407_v21 = vpop.permute.xlu0 %1406  ;;  %v1409_v43 = vpop.permute.xlu1 %1408 }
 0x2a2   : > { %v1417_v25 = vadd.f32 %v1407_v21, %v1396_v7  ;;  %v1412_v58 = vsel %vm533_vm5, %v1407_v21, %v1409_v43 }
 0x2a3   : > { %v1418_v44 = vadd.f32 %v1412_v58, %v1397_v15 }
 0x2a5   : > { %v1411_v46 = vpop.permute.xlu0 %1410  ;;  %v1428_v39 = vpop.permute.xlu1 %1427 }
 0x2a6   : > { %v1413_v31 = vsel %vm533_vm5, %v1409_v43, %v1411_v46  ;;  %v1438_v32 = vadd.f32 %v1428_v39, %v1417_v25  ;;  %v1464_v46 = vmul.f32 %v1462_v28, %v3301_v16 }
 0x2a7   : > { %v1419_v5 = vadd.f32 %v1413_v31, %v1398_v29 }
 0x2a9   : > { %v1430_v47 = vpop.permute.xlu0 %1429  ;;  %v1432_v40 = vpop.permute.xlu1 %1431 }
 0x2aa   : > { %v1433_v13 = vsel %vm555_vm6, %v1428_v39, %v1430_v47  ;;  %v1434_v33 = vsel %vm555_vm6, %v1430_v47, %v1432_v40 }
 0x2ab   : > { %v1439_v21 = vadd.f32 %v1433_v13, %v1418_v44  ;;  %v1440_v52 = vadd.f32 %v1434_v33, %v1419_v5 }
 0x2ad   : > { %v1449_v50 = vpop.permute.xlu0 %1448  ;;  %v1451_v22 = vpop.permute.xlu1 %1450 }
 0x2ae   : > { %v1459_v1 = vadd.f32 %v1449_v50, %v1438_v32  ;;  %v1454_v27 = vsel %vm577_vm7, %v1449_v50, %v1451_v22 }
 0x2af   : > { %v1460_v56 = vadd.f32 %v1454_v27, %v1439_v21 }
 0x2b0   : > { %v1466_v39 = vadd.f32 %v1463_v14, %v1459_v1 }
 0x2b1   : > { %v1453_v51 = vpop.permute.xlu0 %1452  ;;  %v1477_v55 = vpop.permute.xlu1 %1476  ;;  %v1467_v63 = vadd.f32 %v1464_v46, %v1460_v56 }
 0x2b2   : > { %v1455_v49 = vsel %vm577_vm7, %v1451_v22, %v1453_v51 }
 0x2b3   : > { %v1461_v47 = vadd.f32 %v1455_v49, %v1440_v52 }
 0x2b5   : > { %v1479_v23 = vpop.permute.xlu0 %1478  ;;  %v1481_v62 = vpop.permute.xlu1 %1480 }
 0x2b6   : > { %v1482_v43 = vsel %vm466_vm2, %v1477_v55, %v1479_v23  ;;  %v1483_v53 = vsel %vm466_vm2, %v1479_v23, %v1481_v62  ;;  %v1468_v55 = vadd.f32 %v1465_v41, %v1461_v47  ;;  %v1650_v47 = vstv %s2687_s27  ;;  %s2689_s27 = sld [smem:[#allocation8 + $0x14]] }
 0x2b7   : > { %v1487_v60 = vadd.f32 %v1482_v43, %v1466_v39  ;;  %v1488_v26 = vadd.f32 %v1483_v53, %v1467_v63 }
 0x2b8   : > { %v1489_v20 = vadd.f32 %v1481_v62, %v1468_v55 }
 0x2b9   : > { %v1498_v59 = vpop.permute.xlu0 %1497  ;;  %v1500_v8 = vpop.permute.xlu1 %1499 }
 0x2ba   : > { %v1503_v40 = vsel %vm488_vm3, %v1498_v59, %v1500_v8 }
 0x2bb   : > { %v1508_v51 = vadd.f32 %v1503_v40, %v1487_v60  ;;  %v1651_v40 = vmul.f32 0.0, %v1650_v47  ;;  %v1653_v60 = vmul.f32 %v1650_v47, %v3271_v2 }
 0x2bd   : > { %v1502_v9 = vpop.permute.xlu0 %1501  ;;  %v1519_v12 = vpop.permute.xlu1 %1518 }
 0x2be   : > { %v1504_v0 = vsel %vm488_vm3, %v1500_v8, %v1502_v9  ;;  %v1510_v28 = vadd.f32 %v1502_v9, %v1489_v20 }
 0x2bf   : > { %v1509_v11 = vadd.f32 %v1504_v0, %v1488_v26  ;;  %v1714_v26 = vstv %s2708_s30  ;;  %s2709_s30 = sld [smem:[#allocation8 + $0x28]] }
 0x2c1   : > { %v1521_v34 = vpop.permute.xlu0 %1520  ;;  %v1523_v38 = vpop.permute.xlu1 %1522 }
 0x2c2   : > { %v1524_v22 = vsel %vm510_vm4, %v1519_v12, %v1521_v34  ;;  %v1525_v6 = vsel %vm510_vm4, %v1521_v34, %v1523_v38  ;;  %v1526_v61 = vsel %vm510_vm4, %v1523_v38, %v1519_v12  ;;  %v1629_v34 = vstv %s2680_s28  ;;  %s2695_s28 = sld [smem:[#allocation8 + $0x1a]] }
 0x2c3   : > { %v1530_v54 = vadd.f32 %v1524_v22, %v1508_v51  ;;  %v1531_v25 = vadd.f32 %v1525_v6, %v1509_v11  ;;  %v1532_v29 = vadd.f32 %v1526_v61, %v1510_v28  ;;  %v1630_v43 = vmul.f32 0.0, %v1629_v34 }
 0x2c4   : > { %v1631_v39 = vmul.f32 %v1629_v34, %v3273_v4  ;;  %v1632_v41 = vmul.f32 %v1629_v34, %v3271_v2  ;;  %v1693_v51 = vstv %s2701_s22  ;;  %v1717_v6 = vmul.f32 0.0, %v1714_v26  ;;  %s2696_s22 = sld [smem:[#allocation8 + $0x1b]] }
 0x2c5   : > { %v1541_v57 = vpop.permute.xlu0 %1540  ;;  %v1543_v50 = vpop.permute.xlu1 %1542  ;;  %v1694_v0 = vmul.f32 %v1693_v51, %v3273_v4  ;;  %v1695_v55 = vmul.f32 %v1693_v51, %v3271_v2  ;;  %v1735_v11 = vstv %s2715_s20  ;;  %s2703_s20 = sld [smem:[#allocation8 + $0x22]] }
 0x2c6   : > { %v1546_v59 = vsel %vm533_vm5, %v1541_v57, %v1543_v50  ;;  %v1551_v15 = vadd.f32 %v1541_v57, %v1530_v54  ;;  %v1652_v57 = vmul.f32 %v1650_v47, %v3273_v4  ;;  %v1716_v54 = vmul.f32 %v1714_v26, %v3271_v2 }
 0x2c7   : > { %v1552_v31 = vadd.f32 %v1546_v59, %v1531_v25  ;;  %v1736_v59 = vmul.f32 %v1735_v11, %v3273_v4  ;;  %v1737_v20 = vmul.f32 %v1735_v11, %v3271_v2  ;;  %v1763_v25 = vstv %s2729_s4  ;;  %s2716_s4 = sld [smem:[#allocation8 + $0x2f]] }
 0x2c8   : > { %v1765_v61 = vmul.f32 %v1763_v25, %v3301_v16 }
 0x2c9   : > { %v1545_v7 = vpop.permute.xlu0 %1544  ;;  %v1562_v48 = vpop.permute.xlu1 %1561 }
 0x2ca   : > { %v1547_v32 = vsel %vm533_vm5, %v1543_v50, %v1545_v7  ;;  %v1572_v13 = vadd.f32 %v1562_v48, %v1551_v15  ;;  %v1671_v50 = vstv %s2694_s29  ;;  %v1696_v7 = vmul.f32 0.0, %v1693_v51  ;;  %s2702_s29 = sld [smem:[#allocation8 + $0x21]] }
 0x2cb   : > { %v1553_v5 = vadd.f32 %v1547_v32, %v1532_v29  ;;  %v1672_v53 = vmul.f32 0.0, %v1671_v50  ;;  %v1673_v63 = vmul.f32 %v1671_v50, %v3273_v4  ;;  %v1674_v22 = vmul.f32 %v1671_v50, %v3271_v2 }
 0x2cc   : > { %v1766_v15 = vmul.f32 %v1763_v25, %v3309_v19  ;;  %v1945_v32 = vstv %s2688_s24  ;;  %s2717_s24 = sld [smem:[#allocation8 + $0x30]] }
 0x2cd   : > { %v1564_v23 = vpop.permute.xlu0 %1563  ;;  %v1566_v58 = vpop.permute.xlu1 %1565  ;;  %v1946_v29 = vmul.f32 0.0, %v1945_v32 }
 0x2ce   : > { %v1567_v8 = vsel %vm555_vm6, %v1562_v48, %v1564_v23  ;;  %v1568_v1 = vsel %vm555_vm6, %v1564_v23, %v1566_v58  ;;  %v1715_v48 = vmul.f32 %v1714_v26, %v3273_v4  ;;  %v1738_v23 = vmul.f32 0.0, %v1735_v11 }
 0x2cf   : > { %v1573_v44 = vadd.f32 %v1567_v8, %v1552_v31  ;;  %v1574_v38 = vadd.f32 %v1568_v1, %v1553_v5  ;;  %v1764_v58 = vmul.f32 0.0, %v1763_v25  ;;  %v1924_v8 = vstv %s2681_s5  ;;  %s2710_s5 = sld [smem:[#allocation8 + $0x29]] }
 0x2d0   : > { %v1925_v28 = vmul.f32 0.0, %v1924_v8  ;;  %v1926_v31 = vmul.f32 %v1924_v8, %v3273_v4 }
 0x2d1   : > { %v1583_v33 = vpop.permute.xlu0 %1582  ;;  %v1585_v14 = vpop.permute.xlu1 %1584 }
 0x2d2   : > { %v1593_v62 = vadd.f32 %v1583_v33, %v1572_v13  ;;  %v1588_v27 = vsel %vm577_vm7, %v1583_v33, %v1585_v14  ;;  %v1927_v13 = vmul.f32 %v1924_v8, %v3271_v2  ;;  %v1948_v33 = vmul.f32 %v1945_v32, %v3271_v2 }
 0x2d3   : > { %v1594_v21 = vadd.f32 %v1588_v27, %v1573_v44  ;;  %v1947_v44 = vmul.f32 %v1945_v32, %v3273_v4  ;;  %v1966_v27 = vstv %s2695_s28  ;;  %s2730_s28 = sld [smem:[#allocation8 + $0x3d]] }
 0x2d4   : > { %v1599_v12 = vrot.slane %v1593_v62, 5  ;;  %v1969_v34 = vmul.f32 %v1966_v27, %v3271_v2 }
 0x2d5   : > { %v1600_v9 = vrot.slane %v1594_v21, 5  ;;  %v1587_v49 = vpop.permute.xlu0 %1586  ;;  %v1967_v21 = vmul.f32 0.0, %v1966_v27 }
 0x2d6   : > { %v1589_v52 = vsel %vm577_vm7, %v1585_v14, %v1587_v49  ;;  %1602 = vrot.lane.b32.xlu1 %v1599_v12, %s3052_s10  ;;  %v2219_v14 = vstv %s2682_s25  ;;  %v1968_v12 = vmul.f32 %v1966_v27, %v3273_v4  ;;  %s2736_s25 = sld [smem:[#allocation8 + $0x43]] }
 0x2d7   : > { %v1595_v56 = vadd.f32 %v1589_v52, %v1574_v38  ;;  %1604 = vrot.lane.b32.xlu0 %v1600_v9, %s3052_s10  ;;  %v2220_v1 = vmul.f32 0.0, %v2219_v14  ;;  %v2221_v62 = vmul.f32 %v2219_v14, %v3273_v4  ;;  %v2222_v5 = vmul.f32 %v2219_v14, %v3271_v2 }
 0x2d8   : > { %v2240_v38 = vstv %s2689_s27  ;;  %v1988_v52 = vstv %s2702_s29  ;;  %s2743_s27 = sld [smem:[#allocation8 + $0x4a]] }
 0x2d9   : > { %v1601_v46 = vrot.slane %v1595_v56, 5  ;;  %v2241_v9 = vmul.f32 0.0, %v2240_v38  ;;  %v2242_v49 = vmul.f32 %v2240_v38, %v3273_v4  ;;  %v2243_v56 = vmul.f32 %v2240_v38, %v3271_v2  ;;  %s2737_s29 = sld [smem:[#allocation8 + $0x44]] }
 0x2db   : > { %1606 = vrot.lane.b32.xlu1 %v1601_v46, %s3052_s10  ;;  %1636 = vrot.lane.b32.xlu0 %v1630_v43, %s3048_s21  ;;  %v1989_v43 = vmul.f32 %v1988_v52, %v3273_v4  ;;  %v1990_v46 = vmul.f32 %v1988_v52, %v3271_v2 }
 0x2dc   : > { %v1784_v8 = vstv %s2736_s25  ;;  %s2745_s25 = sld [smem:[#allocation8 + $0x4c]] }
 0x2dd   : > { %v1786_v32 = vmul.f32 %v1784_v8, %v3301_v16 }
 0x2df   : > { %1638 = vrot.lane.b32.xlu1 %v1631_v39, %s3048_s21  ;;  %1640 = vrot.lane.b32.xlu0 %v1632_v41, %s3048_s21  ;;  %v1991_v39 = vmul.f32 0.0, %v1988_v52  ;;  %v2261_v41 = vstv %s2696_s22  ;;  %s2731_s22 = sld [smem:[#allocation8 + $0x3e]] }
 0x2e0   : > { %v2262_v47 = vmul.f32 0.0, %v2261_v41  ;;  %v2264_v50 = vmul.f32 %v2261_v41, %v3271_v2 }
 0x2e3   : > { %1657 = vrot.lane.b32.xlu1 %v1651_v40, %s3049_s6  ;;  %1659 = vrot.lane.b32.xlu0 %v1652_v57, %s3049_s6  ;;  %v2263_v40 = vmul.f32 %v2261_v41, %v3273_v4  ;;  %v2009_v57 = vstv %s2709_s30  ;;  %s2750_s30 = sld [smem:[#allocation8 + $0x51]] }
 0x2e7   : > { %1661 = vrot.lane.b32.xlu1 %v1653_v60, %s3049_s6  ;;  %1678 = vrot.lane.b32.xlu0 %v1672_v53, %s3050_s7  ;;  %v2010_v60 = vmul.f32 %v2009_v57, %v3273_v4  ;;  %v2011_v53 = vmul.f32 %v2009_v57, %v3271_v2 }
 0x2eb   : > { %1680 = vrot.lane.b32.xlu1 %v1673_v63, %s3050_s7  ;;  %1682 = vrot.lane.b32.xlu0 %v1674_v22, %s3050_s7  ;;  %v2012_v63 = vmul.f32 0.0, %v2009_v57  ;;  %v2283_v22 = vstv %s2703_s20  ;;  %v2353_v57 = vstv %s2731_s22  ;;  %s2744_s20 = sld [smem:[#allocation8 + $0x4b]] }
 0x2ec   : > { %v2284_v51 = vmul.f32 %v2283_v22, %v3273_v4  ;;  %v2286_v26 = vmul.f32 0.0, %v2283_v22  ;;  %s2759_s22 = sld [smem:[#allocation8 + $0x5a]] }
 0x2ef   : > { %1700 = vrot.lane.b32.xlu1 %v1694_v0, %s3051_s8  ;;  %1702 = vrot.lane.b32.xlu0 %v1695_v55, %s3051_s8  ;;  %v2285_v0 = vmul.f32 %v2283_v22, %v3271_v2  ;;  %v2030_v55 = vstv %s2716_s4  ;;  %v1827_v22 = vstv %s2750_s30  ;;  %s2738_s4 = sld [smem:[#allocation8 + $0x45]] }
 0x2f0   : > { %s2766_s30 = sld [smem:[#allocation8 + $0x61]] }
 0x2f3   : > { %1704 = vrot.lane.b32.xlu1 %v1696_v7, %s3051_s8  ;;  %1721 = vrot.lane.b32.xlu0 %v1715_v48, %s3052_s10  ;;  %v2031_v7 = vmul.f32 %v2030_v55, %v3273_v4  ;;  %v2032_v48 = vmul.f32 %v2030_v55, %v3271_v2 }
 0x2f7   : > { %1723 = vrot.lane.b32.xlu1 %v1716_v54, %s3052_s10  ;;  %1725 = vrot.lane.b32.xlu0 %v1717_v6, %s3052_s10  ;;  %v2033_v54 = vmul.f32 0.0, %v2030_v55  ;;  %v2304_v6 = vstv %s2710_s5  ;;  %v2356_v55 = vmul.f32 %v2353_v57, %v3309_v19  ;;  %s2757_s5 = sld [smem:[#allocation8 + $0x58]] }
 0x2f8   : > { %v2305_v11 = vmul.f32 %v2304_v6, %v3273_v4  ;;  %v2307_v25 = vmul.f32 0.0, %v2304_v6 }
 0x2fb   : > { %1742 = vrot.lane.b32.xlu1 %v1736_v59, %s3053_s18  ;;  %1744 = vrot.lane.b32.xlu0 %v1737_v20, %s3053_s18  ;;  %v2306_v59 = vmul.f32 %v2304_v6, %v3271_v2  ;;  %v2325_v20 = vstv %s2717_s24  ;;  %v1830_v6 = vmul.f32 0.0, %v1827_v22  ;;  %s2751_s24 = sld [smem:[#allocation8 + $0x52]] }
 0x2ff   : > { %1746 = vrot.lane.b32.xlu1 %v1738_v23, %s3053_s18  ;;  %1770 = vrot.lane.b32.xlu0 %v1764_v58, %s3048_s21  ;;  %v2326_v23 = vmul.f32 %v2325_v20, %v3273_v4  ;;  %v2327_v58 = vmul.f32 %v2325_v20, %v3271_v2 }
 0x303   : > { %1772 = vrot.lane.b32.xlu1 %v1765_v61, %s3048_s21  ;;  %1774 = vrot.lane.b32.xlu0 %v1766_v15, %s3048_s21  ;;  %v2328_v61 = vmul.f32 0.0, %v2325_v20 }
 0x307   : > { %1931 = vrot.lane.b32.xlu1 %v1925_v28, %s3048_s21  ;;  %1933 = vrot.lane.b32.xlu0 %v1926_v31, %s3048_s21  ;;  %v1785_v31 = vmul.f32 0.0, %v1784_v8 }
 0x30b   : > { %1935 = vrot.lane.b32.xlu1 %v1927_v13, %s3048_s21  ;;  %1952 = vrot.lane.b32.xlu0 %v1946_v29, %s3049_s6  ;;  %v2058_v13 = vstv %s2730_s28  ;;  %s2675_s28 = sld [smem:[#allocation8 + $0x6]] }
 0x30c   : > { %v2059_v14 = vmul.f32 0.0, %v2058_v13  ;;  %v2060_v27 = vmul.f32 %v2058_v13, %v3301_v16 }
 0x30f   : > { %1954 = vrot.lane.b32.xlu1 %v1947_v44, %s3049_s6  ;;  %1956 = vrot.lane.b32.xlu0 %v1948_v33, %s3049_s6  ;;  %v1787_v33 = vmul.f32 %v1784_v8, %v3309_v19 }
 0x313   : > { %2226 = vrot.lane.b32.xlu1 %v2220_v1, %s3048_s21  ;;  %2228 = vrot.lane.b32.xlu0 %v2221_v62, %s3048_s21 }
 0x317   : > { %2230 = vrot.lane.b32.xlu1 %v2222_v5, %s3048_s21  ;;  %1973 = vrot.lane.b32.xlu0 %v1967_v21, %s3050_s7  ;;  %v2061_v5 = vmul.f32 %v2058_v13, %v3309_v19  ;;  %v1805_v21 = vstv %s2743_s27  ;;  %s2758_s27 = sld [smem:[#allocation8 + $0x59]] }
 0x318   : > { %v1806_v38 = vmul.f32 0.0, %v1805_v21 }
 0x31b   : > { %1975 = vrot.lane.b32.xlu1 %v1968_v12, %s3050_s7  ;;  %1977 = vrot.lane.b32.xlu0 %v1969_v34, %s3050_s7 }
 0x31f   : > { %2247 = vrot.lane.b32.xlu1 %v2241_v9, %s3049_s6  ;;  %2249 = vrot.lane.b32.xlu0 %v2242_v49, %s3049_s6  ;;  %v1807_v9 = vmul.f32 %v1805_v21, %v3301_v16  ;;  %v2079_v49 = vstv %s2737_s29  ;;  %s2752_s29 = sld [smem:[#allocation8 + $0x53]] }
 0x323   : > { %2251 = vrot.lane.b32.xlu1 %v2243_v56, %s3049_s6  ;;  %1995 = vrot.lane.b32.xlu0 %v1989_v43, %s3051_s8  ;;  %v1808_v43 = vmul.f32 %v1805_v21, %v3309_v19  ;;  %v1848_v21 = vstv %s2757_s5  ;;  %s3058_s5 = smov 46  }
 0x327   : > { %1997 = vrot.lane.b32.xlu1 %v1990_v46, %s3051_s8  ;;  %1999 = vrot.lane.b32.xlu0 %v1991_v39, %s3051_s8  ;;  %v2080_v46 = vmul.f32 0.0, %v2079_v49 }
 0x32b   : > { %2268 = vrot.lane.b32.xlu1 %v2262_v47, %s3050_s7  ;;  %2270 = vrot.lane.b32.xlu0 %v2263_v40, %s3050_s7  ;;  %v2081_v47 = vmul.f32 %v2079_v49, %v3301_v16  ;;  %v2082_v40 = vmul.f32 %v2079_v49, %v3309_v19 }
 0x32f   : > { %2272 = vrot.lane.b32.xlu1 %v2264_v50, %s3050_s7  ;;  %2016 = vrot.lane.b32.xlu0 %v2010_v60, %s3052_s10 }
 0x333   : > { %2018 = vrot.lane.b32.xlu1 %v2011_v53, %s3052_s10  ;;  %2020 = vrot.lane.b32.xlu0 %v2012_v63, %s3052_s10  ;;  %v2354_v53 = vmul.f32 0.0, %v2353_v57  ;;  %v2355_v63 = vmul.f32 %v2353_v57, %v3301_v16  ;;  %v2122_v57 = vstv %s2751_s24  ;;  %s2669_s24 = sshll.u32 %s3197_s19, 1 }
 0x337   : > { %2290 = vrot.lane.b32.xlu1 %v2284_v51, %s3051_s8  ;;  %2292 = vrot.lane.b32.xlu0 %v2285_v0, %s3051_s8 }
 0x33b   : > { %2294 = vrot.lane.b32.xlu1 %v2286_v26, %s3051_s8  ;;  %2037 = vrot.lane.b32.xlu0 %v2031_v7, %s3053_s18  ;;  %v1828_v26 = vmul.f32 %v1827_v22, %v3301_v16 }
 0x33f   : > { %2039 = vrot.lane.b32.xlu1 %v2032_v48, %s3053_s18  ;;  %2041 = vrot.lane.b32.xlu0 %v2033_v54, %s3053_s18  ;;  %v1829_v54 = vmul.f32 %v1827_v22, %v3309_v19 }
 0x343   : > { %2311 = vrot.lane.b32.xlu1 %v2305_v11, %s3052_s10  ;;  %2313 = vrot.lane.b32.xlu0 %v2306_v59, %s3052_s10  ;;  %v2100_v11 = vstv %s2744_s20  ;;  %s2724_s20 = sld [smem:[#allocation8 + $0x37]] }
 0x347   : > { %2315 = vrot.lane.b32.xlu1 %v2307_v25, %s3052_s10  ;;  %2332 = vrot.lane.b32.xlu0 %v2326_v23, %s3053_s18  ;;  %v2101_v25 = vmul.f32 0.0, %v2100_v11  ;;  %v2102_v23 = vmul.f32 %v2100_v11, %v3301_v16 }
 0x348   : > { %v3852_v15 = vpop.permute.xlu1 %1602 }
 0x349   : > { %4343 = vst [vmem:[#allocation23_spill] sm:$0xff] %v3852_v15  ;;  %v3854_v28 = vpop.permute.xlu0 %1604 }
 0x34a   : > { %4344 = vst [vmem:[#allocation24_spill] sm:$0xff] %v3854_v28 }
 0x34b   : > { %2334 = vrot.lane.b32.xlu1 %v2327_v58, %s3053_s18  ;;  %2336 = vrot.lane.b32.xlu0 %v2328_v61, %s3053_s18  ;;  %v2374_v58 = vstv %s2738_s4  ;;  %s3057_s4 = smov 47  }
 0x34d   : > { %v3859_v29 = vpop.permute.xlu0 %1636  ;;  %v3861_v44 = vpop.permute.xlu1 %1606 }
 0x34e   : > { %4345 = vst [vmem:[#allocation25_spill] sm:$0xff] %v3861_v44 }
 0x34f   : > { %1791 = vrot.lane.b32.xlu1 %v1785_v31, %s3049_s6  ;;  %1793 = vrot.lane.b32.xlu0 %v1786_v32, %s3049_s6  ;;  %v2103_v31 = vmul.f32 %v2100_v11, %v3309_v19  ;;  %v2375_v32 = vmul.f32 0.0, %v2374_v58 }
 0x351   : > { %v3866_v1 = vpop.permute.xlu0 %1640  ;;  %v3868_v62 = vpop.permute.xlu1 %1638 }
 0x353   : > { %1795 = vrot.lane.b32.xlu1 %v1787_v33, %s3049_s6  ;;  %2065 = vrot.lane.b32.xlu0 %v2059_v14, %s3048_s21 }
 0x355   : > { %v3874_v12 = vpop.permute.xlu0 %1659  ;;  %v3876_v34 = vpop.permute.xlu1 %1657 }
 0x357   : > { %2067 = vrot.lane.b32.xlu1 %v2060_v27, %s3048_s21  ;;  %2069 = vrot.lane.b32.xlu0 %v2061_v5, %s3048_s21  ;;  %v2376_v27 = vmul.f32 %v2374_v58, %v3301_v16  ;;  %v2377_v5 = vmul.f32 %v2374_v58, %v3309_v19 }
 0x359   : > { %v3881_v52 = vpop.permute.xlu0 %1678  ;;  %v3883_v56 = vpop.permute.xlu1 %1661 }
 0x35b   : > { %1812 = vrot.lane.b32.xlu1 %v1806_v38, %s3050_s7  ;;  %1814 = vrot.lane.b32.xlu0 %v1807_v9, %s3050_s7 }
 0x35d   : > { %v3888_v39 = vpop.permute.xlu0 %1682  ;;  %v3890_v41 = vpop.permute.xlu1 %1680 }
 0x35e   : > { %v1684_v37 = vsel %vm510_vm4, %v3881_v52, %v3890_v41 }
 0x35f   : > { %1816 = vrot.lane.b32.xlu1 %v1808_v43, %s3050_s7  ;;  %2086 = vrot.lane.b32.xlu0 %v2080_v46, %s3049_s6  ;;  %v1849_v46 = vmul.f32 %v1848_v21, %v3301_v16 }
 0x361   : > { %v3896_v50 = vpop.permute.xlu0 %1702  ;;  %v3898_v60 = vpop.permute.xlu1 %1700 }
 0x363   : > { %2088 = vrot.lane.b32.xlu1 %v2081_v47, %s3049_s6  ;;  %2090 = vrot.lane.b32.xlu0 %v2082_v40, %s3049_s6  ;;  %v1850_v47 = vmul.f32 %v1848_v21, %v3309_v19 }
 0x365   : > { %v3903_v51 = vpop.permute.xlu0 %1721  ;;  %v3905_v0 = vpop.permute.xlu1 %1704 }
 0x367   : > { %2360 = vrot.lane.b32.xlu1 %v2354_v53, %s3048_s21  ;;  %2362 = vrot.lane.b32.xlu0 %v2355_v63, %s3048_s21 }
 0x369   : > { %v3911_v7 = vpop.permute.xlu0 %1725  ;;  %v3913_v48 = vpop.permute.xlu1 %1723 }
 0x36b   : > { %2364 = vrot.lane.b32.xlu1 %v2356_v55, %s3048_s21  ;;  %1834 = vrot.lane.b32.xlu0 %v1828_v26, %s3051_s8  ;;  %s2674_s21 = sld [smem:[#allocation8 + $0x5]] }
 0x36d   : > { %v3918_v59 = vpop.permute.xlu0 %1744  ;;  %v3920_v20 = vpop.permute.xlu1 %1742 }
 0x36f   : > { %1836 = vrot.lane.b32.xlu1 %v1829_v54, %s3051_s8  ;;  %1838 = vrot.lane.b32.xlu0 %v1830_v6, %s3051_s8  ;;  %v1851_v54 = vmul.f32 0.0, %v1848_v21  ;;  %v2123_v6 = vmul.f32 %v2122_v57, %v3301_v16  ;;  %v2124_v21 = vmul.f32 %v2122_v57, %v3309_v19 }
 0x371   : > { %v3925_v61 = vpop.permute.xlu0 %1770  ;;  %v3927_v8 = vpop.permute.xlu1 %1746  ;;  %v1917_v49 = vstv %s2674_s21  ;;  %s3059_s21 = smov 45  }
 0x372   : > { %v1920_v40 = vmul.f32 %v1917_v49, %v3271_v2  ;;  %v1918_v53 = vmul.f32 0.0, %v1917_v49  ;;  %v1919_v22 = vmul.f32 %v1917_v49, %v3273_v4  ;;  %v2125_v49 = vmul.f32 0.0, %v2122_v57 }
 0x373   : > { %2107 = vrot.lane.b32.xlu1 %v2101_v25, %s3050_s7  ;;  %2109 = vrot.lane.b32.xlu0 %v2102_v23, %s3050_s7 }
 0x375   : > { %v3932_v13 = vpop.permute.xlu0 %1774  ;;  %v3934_v33 = vpop.permute.xlu1 %1772 }
 0x376   : > { %v3939_v14 = vsel %vm466_vm2, %v3934_v33, %v3932_v13 }
 0x377   : > { %2111 = vrot.lane.b32.xlu1 %v2103_v31, %s3050_s7  ;;  %2381 = vrot.lane.b32.xlu0 %v2375_v32, %s3049_s6 }
 0x379   : > { %v1934_v38 = vpop.permute.xlu0 %1933  ;;  %v1932_v9 = vpop.permute.xlu1 %1931 }
 0x37a   : > { %v1937_v43 = vsel %vm466_vm2, %v1932_v9, %v1934_v38 }
 0x37b   : > { %2383 = vrot.lane.b32.xlu1 %v2376_v27, %s3049_s6  ;;  %2385 = vrot.lane.b32.xlu0 %v2377_v5, %s3049_s6  ;;  %s2764_s6 = sld [smem:[#allocation8 + $0x5f]]  ;;  %v1942_v25 = vadd.f32 %v1937_v43, %v1918_v53 }
 0x37d   : > { %v1953_v63 = vpop.permute.xlu0 %1952  ;;  %v1936_v55 = vpop.permute.xlu1 %1935 }
 0x37e   : > { %v1938_v26 = vsel %vm466_vm2, %v1934_v38, %v1936_v55  ;;  %v1944_v11 = vadd.f32 %v1936_v55, %v1920_v40 }
 0x37f   : > { %1855 = vrot.lane.b32.xlu1 %v1849_v46, %s3052_s10  ;;  %1857 = vrot.lane.b32.xlu0 %v1850_v47, %s3052_s10  ;;  %v1943_v23 = vadd.f32 %v1938_v26, %v1919_v22  ;;  %v2395_v46 = vstv %s2745_s25  ;;  %s2775_s25 = sshll.u32 %s3032_s15, 5  ;;  %s3060_s15 = smov [#allocation11]  }
 0x380   : > { %v2396_v53 = vmul.f32 0.0, %v2395_v46  ;;  %v2398_v57 = vmul.f32 %v2395_v46, %v3309_v19 }
 0x381   : > { %v1957_v58 = vpop.permute.xlu0 %1956  ;;  %v1955_v31 = vpop.permute.xlu1 %1954  ;;  %v1869_v22 = vstv %s2764_s6  ;;  %s229_s6 = scalar_lea.vmem [#allocation11], %s2669_s24 }
 0x382   : > { %v1965_v32 = vadd.f32 %v1957_v58, %v1944_v11  ;;  %v1958_v27 = vsel %vm488_vm3, %v1953_v63, %v1955_v31  ;;  %v1959_v5 = vsel %vm488_vm3, %v1955_v31, %v1957_v58  ;;  %v2397_v63 = vmul.f32 %v2395_v46, %v3301_v16 }
 0x383   : > { %v1963_v38 = vadd.f32 %v1958_v27, %v1942_v25  ;;  %v1964_v9 = vadd.f32 %v1959_v5, %v1943_v23  ;;  %1859 = vrot.lane.b32.xlu1 %v1851_v54, %s3052_s10  ;;  %2129 = vrot.lane.b32.xlu0 %v2123_v6, %s3051_s8  ;;  %v2212_v54 = vstv %s2675_s28  ;;  %v1870_v11 = vmul.f32 %v1869_v22, %v3301_v16  ;;  %s2553_s28 = sshll.u32 %s229_s6, 4  ;;  %s2554_s28 = int_to_ptr.vmem [resolvable:$true] %s2553_s28 }
 0x384   : > { %v2213_v25 = vmul.f32 0.0, %v2212_v54  ;;  %v1872_v46 = vmul.f32 0.0, %v1869_v22  ;;  %v2214_v45 = vmul.f32 %v2212_v54, %v3273_v4 }
 0x385   : > { %v2229_v43 = vpop.permute.xlu0 %2228  ;;  %v2227_v47 = vpop.permute.xlu1 %2226 }
 0x386   : > { %v2232_v40 = vsel %vm466_vm2, %v2227_v47, %v2229_v43 }
 0x387   : > { %2131 = vrot.lane.b32.xlu1 %v2124_v21, %s3051_s8  ;;  %2133 = vrot.lane.b32.xlu0 %v2125_v49, %s3051_s8  ;;  %v1871_v21 = vmul.f32 %v1869_v22, %v3309_v19  ;;  %v2237_v3 = vadd.f32 %v2232_v40, %v2213_v25  ;;  %v2417_v22 = vstv %s2752_s29 }
 0x389   : > { %v1974_v55 = vpop.permute.xlu0 %1973  ;;  %v2231_v26 = vpop.permute.xlu1 %2230 }
 0x38a   : > { %v2233_v6 = vsel %vm466_vm2, %v2229_v43, %v2231_v26 }
 0x38b   : > { %2402 = vrot.lane.b32.xlu1 %v2396_v53, %s3050_s7  ;;  %2404 = vrot.lane.b32.xlu0 %v2397_v63, %s3050_s7  ;;  %v2215_v53 = vmul.f32 %v2212_v54, %v3271_v2  ;;  %v2143_v63 = vstv %s2758_s27 }
 0x38d   : > { %v1978_v23 = vpop.permute.xlu0 %1977  ;;  %v1976_v58 = vpop.permute.xlu1 %1975 }
 0x38e   : > { %v1981_v31 = vsel %vm510_vm4, %v1978_v23, %v1974_v55  ;;  %v1979_v27 = vsel %vm510_vm4, %v1974_v55, %v1976_v58  ;;  %v1980_v5 = vsel %vm510_vm4, %v1976_v58, %v1978_v23 }
 0x38f   : > { %v1987_v49 = vadd.f32 %v1981_v31, %v1965_v32  ;;  %v1985_v43 = vadd.f32 %v1979_v27, %v1963_v38  ;;  %v1986_v47 = vadd.f32 %v1980_v5, %v1964_v9  ;;  %2406 = vrot.lane.b32.xlu1 %v2398_v57, %s3050_s7  ;;  %1876 = vrot.lane.b32.xlu0 %v1870_v11, %s3053_s18  ;;  %s2765_s7 = sld [smem:[#allocation8 + $0x60]]  ;;  %v2146_v5 = vmul.f32 0.0, %v2143_v63 }
 0x390   : > { %v2144_v32 = vmul.f32 %v2143_v63, %v3301_v16  ;;  %v2145_v38 = vmul.f32 %v2143_v63, %v3309_v19  ;;  %v2239_v9 = vadd.f32 %v2231_v26, %v2215_v53  ;;  %v2238_v57 = vadd.f32 %v2233_v6, %v2214_v45 }
 0x391   : > { %v2250_v36 = vpop.permute.xlu0 %2249  ;;  %v2248_v55 = vpop.permute.xlu1 %2247  ;;  %v2419_v53 = vmul.f32 %v2417_v22, %v3309_v19 }
 0x392   : > { %v2253_v23 = vsel %vm488_vm3, %v2248_v55, %v2250_v36 }
 0x393   : > { %v2258_v58 = vadd.f32 %v2253_v23, %v2237_v3  ;;  %1878 = vrot.lane.b32.xlu1 %v1871_v21, %s3053_s18  ;;  %1880 = vrot.lane.b32.xlu0 %v1872_v46, %s3053_s18  ;;  %v2418_v3 = vmul.f32 %v2417_v22, %v3301_v16 }
 0x395   : > { %v1996_v40 = vpop.permute.xlu0 %1995  ;;  %v2252_v11 = vpop.permute.xlu1 %2251  ;;  %v2164_v55 = vstv %s2765_s7  ;;  %s2551_s7 = scalar_lea.hbm %s4312_s3, %s2775_s25 }
 0x396   : > { %v2006_v54 = vadd.f32 %v1996_v40, %v1985_v43  ;;  %v2254_v25 = vsel %vm488_vm3, %v2250_v36, %v2252_v11  ;;  %v2260_v31 = vadd.f32 %v2252_v11, %v2239_v9  ;;  %v2420_v36 = vmul.f32 0.0, %v2417_v22 }
 0x397   : > { %v2259_v27 = vadd.f32 %v2254_v25, %v2238_v57  ;;  %2150 = vrot.lane.b32.xlu1 %v2144_v32, %s3052_s10  ;;  %2152 = vrot.lane.b32.xlu0 %v2145_v38, %s3052_s10  ;;  %v2438_v9 = vstv %s2759_s22  ;;  %s2539_s22 = scalar_lea.sflag [#allocation6], %s3197_s19 }
 0x399   : > { %v2000_v21 = vpop.permute.xlu0 %1999  ;;  %v1998_v26 = vpop.permute.xlu1 %1997 }
 0x39a   : > { %v2001_v46 = vsel %vm533_vm5, %v1996_v40, %v1998_v26  ;;  %v2002_v45 = vsel %vm533_vm5, %v1998_v26, %v2000_v21  ;;  %v2167_v21 = vmul.f32 0.0, %v2164_v55 }
 0x39b   : > { %v2007_v6 = vadd.f32 %v2001_v46, %v1986_v47  ;;  %v2008_v43 = vadd.f32 %v2002_v45, %v1987_v49  ;;  %2424 = vrot.lane.b32.xlu0 %v2418_v3, %s3051_s8  ;;  %2154 = vrot.lane.b32.xlu1 %v2146_v5, %s3052_s10  ;;  %v2166_v47 = vmul.f32 %v2164_v55, %v3309_v19 }
 0x39c   : > { %v2165_v49 = vmul.f32 %v2164_v55, %v3301_v16 }
 0x39d   : > { %v2271_v23 = vpop.permute.xlu0 %2270  ;;  %v2269_v32 = vpop.permute.xlu1 %2268 }
 0x39e   : > { %v2274_v63 = vsel %vm510_vm4, %v2269_v32, %v2271_v23 }
 0x39f   : > { %v2280_v38 = vadd.f32 %v2274_v63, %v2258_v58  ;;  %2428 = vrot.lane.b32.xlu0 %v2420_v36, %s3051_s8  ;;  %2426 = vrot.lane.b32.xlu1 %v2419_v53, %s3051_s8  ;;  %v2439_v58 = vmul.f32 %v2438_v9, %v3301_v16  ;;  %s2723_s8 = sld [smem:[#allocation8 + $0x36]] }
 0x3a1   : > { %v2017_v57 = vpop.permute.xlu0 %2016  ;;  %v2273_v40 = vpop.permute.xlu1 %2272 }
 0x3a2   : > { %v2027_v11 = vadd.f32 %v2017_v57, %v2006_v54  ;;  %v2275_v22 = vsel %vm510_vm4, %v2271_v23, %v2273_v40  ;;  %v2276_v25 = vsel %vm510_vm4, %v2273_v40, %v2269_v32  ;;  %v2459_v23 = vstv %s2766_s30  ;;  %s2952_s30 = scalar_lea.vmem %s2554_s28, 32 }
 0x3a3   : > { %v2281_v3 = vadd.f32 %v2275_v22, %v2259_v27  ;;  %v2282_v5 = vadd.f32 %v2276_v25, %v2260_v31  ;;  %2173 = vrot.lane.b32.xlu0 %v2166_v47, %s3053_s18  ;;  %2171 = vrot.lane.b32.xlu1 %v2165_v49, %s3053_s18  ;;  %v2441_v31 = vmul.f32 0.0, %v2438_v9  ;;  %v2440_v27 = vmul.f32 %v2438_v9, %v3309_v19  ;;  %p2953_p3 = scmp.ne.s32.totalorder %s2554_s28, %s2952_s30 }
 0x3a5   : > { %v2021_v26 = vpop.permute.xlu0 %2020  ;;  %v2019_v46 = vpop.permute.xlu1 %2018  ;;  %p2954_p11 = pnand %p2953_p3, %p3170_p13 }
 0x3a6   : > { %v2022_v45 = vsel %vm555_vm6, %v2017_v57, %v2019_v46  ;;  %v2023_v36 = vsel %vm555_vm6, %v2019_v46, %v2021_v26 }
 0x3a7   : > { %v2028_v54 = vadd.f32 %v2022_v45, %v2007_v6  ;;  %v2029_v53 = vadd.f32 %v2023_v36, %v2008_v43  ;;  %2445 = vrot.lane.b32.xlu0 %v2439_v58, %s3052_s10  ;;  %2175 = vrot.lane.b32.xlu1 %v2167_v21, %s3053_s18  ;;  %v2461_v6 = vmul.f32 %v2459_v23, %v3309_v19  ;;  %p2955_p5 = pneg %p2954_p11 }
 0x3a8   : > { %v2460_v43 = vmul.f32 %v2459_v23, %v3301_v16 }
 0x3a9   : > { %v2293_v32 = vpop.permute.xlu0 %2292  ;;  %v2291_v63 = vpop.permute.xlu1 %2290 }
 0x3aa   : > { %v2296_v55 = vsel %vm533_vm5, %v2291_v63, %v2293_v32  ;;  %v2301_v47 = vadd.f32 %v2291_v63, %v2280_v38  ;;  %v2462_v38 = vmul.f32 0.0, %v2459_v23 }
 0x3ab   : > { %v2302_v49 = vadd.f32 %v2296_v55, %v2281_v3  ;;  %2449 = vrot.lane.b32.xlu0 %v2441_v31, %s3052_s10  ;;  %2447 = vrot.lane.b32.xlu1 %v2440_v27, %s3052_s10  ;;  %s2673_s10 = sld [smem:[#allocation8 + $0x4]] }
 0x3ad   : > { %v2038_v57 = vpop.permute.xlu0 %2037  ;;  %v2295_v40 = vpop.permute.xlu1 %2294 }
 0x3ae   : > { %v2048_v22 = vadd.f32 %v2038_v57, %v2027_v11  ;;  %v2297_v9 = vsel %vm533_vm5, %v2293_v32, %v2295_v40 }
 0x3af   : > { %v2303_v25 = vadd.f32 %v2297_v9, %v2282_v5  ;;  %2468 = vrot.lane.b32.xlu0 %v2461_v6, %s3053_s18  ;;  %2466 = vrot.lane.b32.xlu1 %v2460_v43, %s3053_s18 }
 0x3b1   : > { %v2042_v3 = vpop.permute.xlu0 %2041  ;;  %v2040_v58 = vpop.permute.xlu1 %2039 }
 0x3b2   : > { %v2043_v21 = vsel %vm577_vm7, %v2038_v57, %v2040_v58  ;;  %v2044_v26 = vsel %vm577_vm7, %v2040_v58, %v2042_v3 }
 0x3b3   : > { %v2049_v46 = vadd.f32 %v2043_v21, %v2028_v54  ;;  %v2050_v45 = vadd.f32 %v2044_v26, %v2029_v53  ;;  %2470 = vrot.lane.b32.xlu1 %v2462_v38, %s3053_s18  ;;  %v2051_v38 = vstv %s2723_s8  ;;  %s2722_s18 = sld [smem:[#allocation8 + $0x35]]  ;;  %s2956_s8 = sshll.u32 %s3060_s15, 4  ;;  %s2957_s8 = int_to_ptr.vmem [resolvable:$false] %s2956_s8 }
 0x3b4   : > { %v2054_v3 = vmul.f32 %v2051_v38, %v3309_v19  ;;  %v2052_v58 = vmul.f32 0.0, %v2051_v38  ;;  %v2053_v26 = vmul.f32 %v2051_v38, %v3301_v16  ;;  %p2959_p7 = scmp.lt.s32.totalorder %s2554_s28, %s2957_s8 }
 0x3b5   : > { %v2314_v36 = vpop.permute.xlu0 %2313  ;;  %v2312_v11 = vpop.permute.xlu1 %2311 }
 0x3b6   : > { %v2317_v31 = vsel %vm555_vm6, %v2312_v11, %v2314_v36  ;;  %v2322_v5 = vadd.f32 %v2312_v11, %v2301_v47  ;;  %v2055_v11 = vadd.f32 %v2052_v58, %v2048_v22 }
 0x3b7   : > { %v2323_v27 = vadd.f32 %v2317_v31, %v2302_v49 }
 0x3b9   : > { %v2333_v32 = vpop.permute.xlu0 %2332  ;;  %v2316_v63 = vpop.permute.xlu1 %2315 }
 0x3ba   : > { %v4019_v23 = vadd.f32 %v2333_v32, %v2322_v5  ;;  %v2318_v55 = vsel %vm555_vm6, %v2314_v36, %v2316_v63  ;;  %v2057_v36 = vadd.f32 %v2054_v3, %v2050_v45  ;;  %v2056_v5 = vadd.f32 %v2053_v26, %v2049_v46 }
 0x3bb   : > { %v2324_v6 = vadd.f32 %v2318_v55, %v2303_v25  ;;  %v1622_v26 = vstv %s2673_s10  ;;  %s2958_s10 = scalar_lea.vmem %s2957_s8, 64 }
 0x3bc   : > { %v1625_v17 = vmul.f32 %v1622_v26, %v3271_v2  ;;  %v1624_v15 = vmul.f32 %v1622_v26, %v3273_v4  ;;  %v1664_v2 = vsel %vm488_vm3, %v3874_v12, %v3883_v56  ;;  %p2960_p10 = scmp.lt.s32.totalorder %s2958_s10, %s2952_s30 }
 0x3bd   : > { %v2337_v43 = vpop.permute.xlu0 %2336  ;;  %v2335_v57 = vpop.permute.xlu1 %2334 }
 0x3be   : > { %v2338_v54 = vsel %vm577_vm7, %v2333_v32, %v2335_v57  ;;  %v2339_v53 = vsel %vm577_vm7, %v2335_v57, %v2337_v43  ;;  %p2961_p12 = por %p2960_p10, %p2959_p7 }
 0x3bf   : > { %v4024_v40 = vadd.f32 %v2338_v54, %v2323_v27  ;;  %v4026_v9 = vadd.f32 %v2339_v53, %v2324_v6 }
 0x3c0   : > { %p2962_p0 = pnand %p2961_p12, %p2955_p5 }
 0x3c1   : > { %v4028_v47 = vpop.permute.xlu0 %1793  ;;  %v4030_v49 = vpop.permute.xlu1 %1791 }
 0x3c5   : > { %v2066_v21 = vpop.permute.xlu0 %2065  ;;  %v4033_v25 = vpop.permute.xlu1 %1795 }
 0x3c9   : > { %v2070_v31 = vpop.permute.xlu0 %2069  ;;  %v2068_v27 = vpop.permute.xlu1 %2067 }
 0x3ca   : > { %v4036_v32 = vadd.f32 %v2070_v31, %v2057_v36  ;;  %v2071_v63 = vsel %vm466_vm2, %v2066_v21, %v2068_v27  ;;  %v2072_v55 = vsel %vm466_vm2, %v2068_v27, %v2070_v31  ;;  %v1623_v31 = vmul.f32 0.0, %v1622_v26 }
 0x3cb   : > { %v4040_v6 = vadd.f32 %v2071_v63, %v2055_v11  ;;  %v4042_v43 = vadd.f32 %v2072_v55, %v2056_v5  ;;  %v1642_v5 = vsel %vm466_vm2, %v3859_v29, %v3868_v62  ;;  %v1663_v27 = vsel %vm488_vm3, %v3876_v34, %v3874_v12 }
 0x3cc   : > { %v1647_v44 = vadd.f32 %v1642_v5, %v1623_v31  ;;  %v1643_v34 = vsel %vm466_vm2, %v3868_v62, %v3866_v1  ;;  %v1649_v31 = vadd.f32 %v3866_v1, %v1625_v17  ;;  %v1707_v17 = vsel %vm533_vm5, %v3896_v50, %v3905_v0 }
 0x3cd   : > { %v4044_v57 = vpop.permute.xlu0 %1814  ;;  %v4046_v54 = vpop.permute.xlu1 %1812  ;;  %v1648_v4 = vadd.f32 %v1643_v34, %v1624_v15  ;;  %v1756_v12 = vstv %s2722_s18  ;;  %v1706_v15 = vsel %vm533_vm5, %v3898_v60, %v3896_v50  ;;  %v1727_v0 = vsel %vm555_vm6, %v3903_v51, %v3913_v48 }
 0x3ce   : > { %v1668_v35 = vadd.f32 %v1663_v27, %v1647_v44  ;;  %v1686_v44 = vsel %vm510_vm4, %v3888_v39, %v3881_v52  ;;  %v1670_v26 = vadd.f32 %v3883_v56, %v1649_v31  ;;  %v1728_v56 = vsel %vm555_vm6, %v3913_v48, %v3911_v7 }
 0x3cf   : > { %v1669_v1 = vadd.f32 %v1664_v2, %v1648_v4  ;;  %v1749_v50 = vsel %vm577_vm7, %v3918_v59, %v3927_v8  ;;  %v1748_v7 = vsel %vm577_vm7, %v3920_v20, %v3918_v59 }
 0x3d0   : > { %v1690_v42 = vadd.f32 %v1684_v37, %v1668_v35  ;;  %v1685_v35 = vsel %vm510_vm4, %v3890_v41, %v3888_v39  ;;  %v1692_v62 = vadd.f32 %v1686_v44, %v1670_v26 }
 0x3d1   : > { %v4048_v53 = vpop.permute.xlu0 %2086  ;;  %v4050_v22 = vpop.permute.xlu1 %1816  ;;  %v1691_v39 = vadd.f32 %v1685_v35, %v1669_v1  ;;  %v1759_v35 = vmul.f32 %v1756_v12, %v3309_v19  ;;  %v1758_v1 = vmul.f32 %v1756_v12, %v3301_v16 }
 0x3d2   : > { %v1711_v37 = vadd.f32 %v3898_v60, %v1690_v42  ;;  %v1713_v41 = vadd.f32 %v1707_v17, %v1692_v62  ;;  %v1757_v60 = vmul.f32 0.0, %v1756_v12  ;;  %v1797_v62 = vsel %vm488_vm3, %v4030_v49, %v4028_v47 }
 0x3d3   : > { %v1712_v2 = vadd.f32 %v1706_v15, %v1691_v39  ;;  %v1818_v15 = vsel %vm510_vm4, %v4046_v54, %v4044_v57  ;;  %v1798_v12 = vsel %vm488_vm3, %v4028_v47, %v4033_v25 }
 0x3d4   : > { %v1732_v52 = vadd.f32 %v3903_v51, %v1711_v37  ;;  %v1734_v44 = vadd.f32 %v1728_v56, %v1713_v41  ;;  %v1776_v51 = vsel %vm466_vm2, %v3925_v61, %v3934_v33 }
 0x3d5   : > { %v4052_v46 = vpop.permute.xlu0 %2090  ;;  %v4054_v45 = vpop.permute.xlu1 %2088  ;;  %v1733_v4 = vadd.f32 %v1727_v0, %v1712_v2 }
 0x3d6   : > { %v1753_v31 = vadd.f32 %v3920_v20, %v1732_v52  ;;  %v1755_v26 = vadd.f32 %v1749_v50, %v1734_v44  ;;  %v1819_v50 = vsel %vm510_vm4, %v4044_v57, %v4050_v22 }
 0x3d7   : > { %v1754_v8 = vadd.f32 %v1748_v7, %v1733_v4 }
 0x3d8   : > { %v1760_v17 = vadd.f32 %v1757_v60, %v1753_v31  ;;  %v1762_v20 = vadd.f32 %v1759_v35, %v1755_v26  ;;  %v1820_v60 = vsel %vm510_vm4, %v4050_v22, %v4046_v54 }
 0x3d9   : > { %v4056_v38 = vpop.permute.xlu0 %2362  ;;  %v4058_v3 = vpop.permute.xlu1 %2360  ;;  %v1761_v56 = vadd.f32 %v1758_v1, %v1754_v8 }
 0x3da   : > { %v1781_v59 = vadd.f32 %v1776_v51, %v1760_v17  ;;  %v1783_v41 = vadd.f32 %v3932_v13, %v1762_v20 }
 0x3db   : > { %v1782_v49 = vadd.f32 %v3939_v14, %v1761_v56  ;;  %v2092_v56 = vsel %vm488_vm3, %v4048_v53, %v4054_v45 }
 0x3dc   : > { %v1802_v33 = vadd.f32 %v1797_v62, %v1781_v59  ;;  %v1804_v44 = vadd.f32 %v4033_v25, %v1783_v41 }
 0x3dd   : > { %v4060_v58 = vpop.permute.xlu0 %1834  ;;  %v4062_v21 = vpop.permute.xlu1 %2364  ;;  %v1803_v47 = vadd.f32 %v1798_v12, %v1782_v49  ;;  %v2093_v12 = vsel %vm488_vm3, %v4054_v45, %v4052_v46 }
 0x3de   : > { %v1824_v39 = vadd.f32 %v1818_v15, %v1802_v33  ;;  %v1826_v57 = vadd.f32 %v1820_v60, %v1804_v44  ;;  %v2097_v60 = vadd.f32 %v2092_v56, %v4040_v6  ;;  %v2098_v53 = vadd.f32 %v2093_v12, %v4042_v43 }
 0x3df   : > { %v1825_v4 = vadd.f32 %v1819_v50, %v1803_v47  ;;  %v2346_v50 = vstv %s2724_s20  ;;  %v2099_v43 = vadd.f32 %v4052_v46, %v4036_v32 }
 0x3e0   : > { %v1845_v2 = vadd.f32 %v4060_v58, %v1824_v39  ;;  %v2347_v44 = vmul.f32 0.0, %v2346_v50 }
 0x3e1   : > { %v4064_v36 = vpop.permute.xlu0 %1838  ;;  %v4066_v11 = vpop.permute.xlu1 %1836 }
 0x3e2   : > { %v1840_v13 = vsel %vm533_vm5, %v4060_v58, %v4066_v11  ;;  %v1841_v14 = vsel %vm533_vm5, %v4066_v11, %v4064_v36 }
 0x3e3   : > { %v1846_v25 = vadd.f32 %v1840_v13, %v1825_v4  ;;  %v1847_v17 = vadd.f32 %v1841_v14, %v1826_v57 }
 0x3e5   : > { %v4074_v63 = vpop.permute.xlu0 %2109  ;;  %v4076_v55 = vpop.permute.xlu1 %2107 }
 0x3e6   : > { %v2113_v39 = vsel %vm510_vm4, %v4076_v55, %v4074_v63 }
 0x3e7   : > { %v2119_v47 = vadd.f32 %v2113_v39, %v2097_v60 }
 0x3e9   : > { %v4083_v29 = vpop.permute.xlu0 %2381  ;;  %v4085_v28 = vpop.permute.xlu1 %2111 }
 0x3ea   : > { %v2115_v4 = vsel %vm510_vm4, %v4085_v28, %v4076_v55 }
 0x3eb   : > { %v2121_v55 = vadd.f32 %v2115_v4, %v2099_v43 }
 0x3ed   : > { %v4098_v5 = vpop.permute.xlu0 %2385  ;;  %v4100_v27 = vpop.permute.xlu1 %2383 }
 0x3f1   : > { %v1858_v42 = vpop.permute.xlu0 %1857  ;;  %v1856_v34 = vpop.permute.xlu1 %1855 }
 0x3f2   : > { %v1866_v7 = vadd.f32 %v1856_v34, %v1845_v2  ;;  %v1861_v54 = vsel %vm555_vm6, %v1856_v34, %v1858_v42  ;;  %v2114_v2 = vsel %vm510_vm4, %v4074_v63, %v4085_v28  ;;  %v2348_v63 = vmul.f32 %v2346_v50, %v3301_v16 }
 0x3f3   : > { %v1867_v1 = vadd.f32 %v1861_v54, %v1846_v25  ;;  %v2120_v13 = vadd.f32 %v2114_v2, %v2098_v53  ;;  %v2349_v54 = vmul.f32 %v2346_v50, %v3309_v19  ;;  %v2350_v25 = vadd.f32 %v2347_v44, %v4019_v23 }
 0x3f4   : > { %v2366_v28 = vsel %vm466_vm2, %v4058_v3, %v4056_v38  ;;  %v2367_v16 = vsel %vm466_vm2, %v4056_v38, %v4062_v21  ;;  %v2387_v23 = vsel %vm488_vm3, %v4083_v29, %v4100_v27 }
 0x3f5   : > { %v4130_v48 = vpop.permute.xlu0 %2129  ;;  %v1860_v37 = vpop.permute.xlu1 %1859 }
 0x3f6   : > { %v1862_v22 = vsel %vm555_vm6, %v1858_v42, %v1860_v37  ;;  %v2140_v6 = vadd.f32 %v4130_v48, %v2119_v47 }
 0x3f7   : > { %v1868_v58 = vadd.f32 %v1862_v22, %v1847_v17 }
 0x3f9   : > { %v4139_v52 = vpop.permute.xlu0 %2133  ;;  %v4141_v61 = vpop.permute.xlu1 %2131 }
 0x3fa   : > { %v2135_v45 = vsel %vm533_vm5, %v4130_v48, %v4141_v61  ;;  %v2136_v22 = vsel %vm533_vm5, %v4141_v61, %v4139_v52  ;;  %v2351_v61 = vadd.f32 %v2348_v63, %v4024_v40 }
 0x3fb   : > { %v2142_v3 = vadd.f32 %v2136_v22, %v2121_v55  ;;  %v420_v55 = vld [vmem:[#allocation9] sm:$0x7f] }
 0x3fc   : > { %v2372_v38 = vadd.f32 %v2367_v16, %v2351_v61  ;;  %v4346_v16 = vld [vmem:[#allocation21_spill] sm:$0xff]  ;;  %v4347_v61 = vld [vmem:[#allocation24_spill] sm:$0xff] }
 0x3fd   : > { %v4148_v0 = vpop.permute.xlu0 %2404  ;;  %v4150_v31 = vpop.permute.xlu1 %2402 }
 0x401   : > { %v1877_v26 = vpop.permute.xlu0 %1876  ;;  %v4166_v35 = vpop.permute.xlu1 %2406 }
 0x402   : > { %v1887_v51 = vadd.f32 %v1877_v26, %v1866_v7  ;;  %v2409_v29 = vsel %vm510_vm4, %v4148_v0, %v4166_v35 }
 0x404   : > { %v1893_v8 = vrot.slane %v1887_v51, 4 }
 0x405   : > { %v1881_v62 = vpop.permute.xlu0 %1880  ;;  %v1879_v59 = vpop.permute.xlu1 %1878 }
 0x406   : > { %v1882_v36 = vsel %vm577_vm7, %v1877_v26, %v1879_v59  ;;  %v1883_v11 = vsel %vm577_vm7, %v1879_v59, %v1881_v62  ;;  %1896 = vrot.lane.b32.xlu0 %v1893_v8, %s3057_s4  ;;  %v2141_v26 = vadd.f32 %v2135_v45, %v2120_v13  ;;  %v2408_v59 = vsel %vm510_vm4, %v4150_v31, %v4148_v0 }
 0x407   : > { %v1888_v20 = vadd.f32 %v1882_v36, %v1867_v1  ;;  %v1889_v15 = vadd.f32 %v1883_v11, %v1868_v58  ;;  %v2371_v1 = vadd.f32 %v2366_v28, %v2350_v25  ;;  %v2388_v58 = vsel %vm488_vm3, %v4100_v27, %v4098_v5 }
 0x408   : > { %v2352_v27 = vadd.f32 %v2349_v54, %v4026_v9  ;;  %v2410_v0 = vsel %vm510_vm4, %v4166_v35, %v4150_v31  ;;  %v1019_v25 = vsel %vm1018_vm8, %v3628_v24, %v3624_v30  ;;  %v421_v24 = vld [vmem:[#allocation9 + $0x8] sm:$0x7f] }
 0x409   : > { %v1894_v34 = vrot.slane %v1888_v20, 4  ;;  %v1895_v33 = vrot.slane %v1889_v15, 4  ;;  %v2153_v42 = vpop.permute.xlu0 %2152  ;;  %v2151_v37 = vpop.permute.xlu1 %2150  ;;  %v2392_v15 = vadd.f32 %v2387_v23, %v2371_v1  ;;  %v4348_v23 = vld [vmem:[#allocation23_spill] sm:$0xff]  ;;  %v4350_v1 = vld [vmem:[#allocation20_spill] sm:$0xff] }
 0x40a   : > { %v2156_v57 = vsel %vm555_vm6, %v2151_v37, %v2153_v42  ;;  %v2161_v51 = vadd.f32 %v2151_v37, %v2140_v6  ;;  %v2373_v12 = vadd.f32 %v4062_v21, %v2352_v27  ;;  %v4353_v27 = vld [vmem:[#allocation18_spill] sm:$0xff] }
 0x40b   : > { %1900 = vrot.lane.b32.xlu0 %v1895_v33, %s3057_s4  ;;  %1898 = vrot.lane.b32.xlu1 %v1894_v34, %s3057_s4  ;;  %v2162_v48 = vadd.f32 %v2156_v57, %v2141_v26  ;;  %v2393_v33 = vadd.f32 %v2388_v58, %v2372_v38  ;;  %v2414_v37 = vadd.f32 %v2408_v59, %v2392_v15  ;;  %v4351_v59 = vld [vmem:[#allocation22_spill] sm:$0xff]  ;;  %v4352_v15 = vld [vmem:[#allocation25_spill] sm:$0xff] }
 0x40c   : > { %v2394_v9 = vadd.f32 %v4098_v5, %v2373_v12 }
 0x40d   : > { %v2425_v41 = vpop.permute.xlu0 %2424  ;;  %v2155_v49 = vpop.permute.xlu1 %2154  ;;  %v2415_v39 = vadd.f32 %v2409_v29, %v2393_v33  ;;  %v1609_v29 = vsel %vm555_vm6, %v4347_v61, %v4352_v15 }
 0x40e   : > { %v2157_v19 = vsel %vm555_vm6, %v2153_v42, %v2155_v49  ;;  %v2435_v2 = vadd.f32 %v2425_v41, %v2414_v37  ;;  %v2416_v13 = vadd.f32 %v2410_v0, %v2394_v9 }
 0x40f   : > { %v2163_v36 = vadd.f32 %v2157_v19, %v2142_v3  ;;  %v1020_v19 = vsel %vm1018_vm8, %v3624_v30, %v4346_v16  ;;  %v1608_v3 = vsel %vm555_vm6, %v4348_v23, %v4347_v61  ;;  %v1315_v30 = vsel %vm1313_vm9, %v3722_v10, %v4351_v59 }
 0x411   : > { %v2429_v14 = vpop.permute.xlu0 %2428  ;;  %v2427_v7 = vpop.permute.xlu1 %2426 }
 0x412   : > { %v2430_v56 = vsel %vm533_vm5, %v2425_v41, %v2427_v7  ;;  %v2431_v45 = vsel %vm533_vm5, %v2427_v7, %v2429_v14 }
 0x413   : > { %v2436_v47 = vadd.f32 %v2430_v56, %v2415_v39  ;;  %v2437_v31 = vadd.f32 %v2431_v45, %v2416_v13 }
 0x415   : > { %v2174_v17 = vpop.permute.xlu0 %2173  ;;  %v2172_v32 = vpop.permute.xlu1 %2171 }
 0x416   : > { %v2177_v46 = vsel %vm577_vm7, %v2172_v32, %v2174_v17  ;;  %v2182_v52 = vadd.f32 %v2172_v32, %v2161_v51  ;;  %v1023_v32 = vmul.f32 %v1019_v25, %v420_v55 }
 0x417   : > { %v2183_v8 = vadd.f32 %v2177_v46, %v2162_v48  ;;  %v1314_v48 = vsel %vm1313_vm9, %v3720_v18, %v3722_v10 }
 0x418   : > { %v2188_v62 = vrot.slane %v2182_v52, 3  ;;  %v1318_v52 = vmul.f32 %v1314_v48, %v420_v55  ;;  %v1027_v38 = vrot.slane %v1023_v32, 1 }
 0x419   : > { %v2189_v11 = vrot.slane %v2183_v8, 3  ;;  %v2446_v40 = vpop.permute.xlu0 %2445  ;;  %v2176_v20 = vpop.permute.xlu1 %2175  ;;  %v4349_v8 = vld [vmem:[#allocation19_spill] sm:$0xff] }
 0x41a   : > { %v2178_v34 = vsel %vm577_vm7, %v2174_v17, %v2176_v20  ;;  %2191 = vrot.lane.b32.xlu1 %v2188_v62, %s3058_s5  ;;  %v2456_v44 = vadd.f32 %v2446_v40, %v2435_v2  ;;  %v730_v58 = vsel %vm729_vm11, %v4350_v1, %v4349_v8  ;;  %v1024_v62 = vmul.f32 %v1020_v19, %v421_v24  ;;  %v4354_v1 = vld [vmem:[#allocation17_spill] sm:$0xff] }
 0x41b   : > { %v2184_v42 = vadd.f32 %v2178_v34, %v2163_v36  ;;  %2193 = vrot.lane.b32.xlu0 %v2189_v11, %s3058_s5  ;;  %v1612_v11 = vmul.f32 %v1608_v3, %v420_v55  ;;  %v1322_v20 = vrot.slane %v1318_v52, 2  ;;  %v731_v33 = vsel %vm729_vm11, %v4349_v8, %v4353_v27 }
 0x41c   : > { %v1028_v12 = vrot.slane %v1024_v62, 1  ;;  %v735_v0 = vmul.f32 %v731_v33, %v421_v24 }
 0x41d   : > { %v2190_v49 = vrot.slane %v2184_v42, 3  ;;  %v2450_v50 = vpop.permute.xlu0 %2449  ;;  %v2448_v60 = vpop.permute.xlu1 %2447  ;;  %v1319_v42 = vmul.f32 %v1315_v30, %v421_v24 }
 0x41e   : > { %v2451_v53 = vsel %vm555_vm6, %v2446_v40, %v2448_v60  ;;  %v2452_v57 = vsel %vm555_vm6, %v2448_v60, %v2450_v50  ;;  %v734_v40 = vmul.f32 %v730_v58, %v420_v55  ;;  %v1613_v50 = vmul.f32 %v1609_v29, %v421_v24 }
 0x41f   : > { %2195 = vrot.lane.b32.xlu1 %v2190_v49, %s3058_s5  ;;  %v2457_v21 = vadd.f32 %v2451_v53, %v2436_v47  ;;  %v2458_v26 = vadd.f32 %v2452_v57, %v2437_v31  ;;  %v1616_v49 = vrot.slane %v1612_v11, 3  ;;  %v1323_v9 = vrot.slane %v1319_v42, 2 }
 0x420   : > { %v1031_v10 = vadd.f32 %v1027_v38, %v734_v40 }
 0x421   : > { %v2469_v4 = vpop.permute.xlu0 %2468  ;;  %v2467_v6 = vpop.permute.xlu1 %2466 }
 0x422   : > { %v2472_v43 = vsel %vm577_vm7, %v2467_v6, %v2469_v4  ;;  %v2477_v63 = vadd.f32 %v2467_v6, %v2456_v44  ;;  %v1326_v2 = vadd.f32 %v1322_v20, %v1031_v10  ;;  %v1032_v44 = vadd.f32 %v1028_v12, %v735_v0 }
 0x423   : > { %v2478_v35 = vadd.f32 %v2472_v43, %v2457_v21 }
 0x424   : > { %v2483_v41 = vrot.slane %v2477_v63, 2  ;;  %v1620_v21 = vadd.f32 %v1616_v49, %v1326_v2  ;;  %v1327_v31 = vadd.f32 %v1323_v9, %v1032_v44 }
 0x425   : > { %v2484_v54 = vrot.slane %v2478_v35, 2  ;;  %v2471_v5 = vpop.permute.xlu1 %2470 }
 0x426   : > { %v2473_v22 = vsel %vm577_vm7, %v2469_v4, %v2471_v5  ;;  %2486 = vrot.lane.b32.xlu0 %v2483_v41, %s3059_s21  ;;  %v1617_v4 = vrot.slane %v1613_v50, 3 }
 0x427   : > { %v2479_v14 = vadd.f32 %v2473_v22, %v2458_v26  ;;  %2488 = vrot.lane.b32.xlu1 %v2484_v54, %s3059_s21 }
 0x428   : > { %v1621_v54 = vadd.f32 %v1617_v4, %v1327_v31 }
 0x429   : > { %v2485_v7 = vrot.slane %v2479_v14, 2 }
 0x42b   : > { %2490 = vrot.lane.b32.xlu0 %v2485_v7, %s3059_s21 }
 0x478   : > { %v1897_v51 = vpop.permute.xlu0 %1896 }
 0x47d   : > { %v1899_v28 = vpop.permute.xlu1 %1898  ;;  %v1901_v17 = vpop.permute.xlu0 %1900 }
 0x47e   : > { %v1903_v36 = vsel %vm1902_vm10, %v1897_v51, %v1899_v28  ;;  %v1904_v39 = vsel %vm1902_vm10, %v1899_v28, %v1901_v17 }
 0x47f   : > { %v1907_v37 = vmul.f32 %v1903_v36, %v420_v55  ;;  %v1908_v47 = vmul.f32 %v1904_v39, %v421_v24 }
 0x481   : > { %v1911_v45 = vrot.slane %v1907_v37, 4  ;;  %v1912_v35 = vrot.slane %v1908_v47, 4 }
 0x483   : > { %v1915_v41 = vadd.f32 %v1911_v45, %v1620_v21  ;;  %v1916_v25 = vadd.f32 %v1912_v35, %v1621_v54 }
 0x48c   : > { %v2192_v46 = vpop.permute.xlu1 %2191 }
 0x48d   : > { %v2194_v18 = vpop.permute.xlu0 %2193 }
 0x48e   : > { %v2198_v34 = vsel %vm2197_vm12, %v2192_v46, %v2194_v18 }
 0x48f   : > { %v2202_v60 = vmul.f32 %v2198_v34, %v420_v55 }
 0x491   : > { %v2196_v56 = vpop.permute.xlu1 %2195  ;;  %v2206_v6 = vrot.slane %v2202_v60, 5 }
 0x492   : > { %v2199_v53 = vsel %vm2197_vm12, %v2194_v18, %v2196_v56 }
 0x493   : > { %v2203_v57 = vmul.f32 %v2199_v53, %v421_v24  ;;  %v2210_v5 = vadd.f32 %v2206_v6, %v1915_v41 }
 0x495   : > { %v2207_v22 = vrot.slane %v2203_v57, 5 }
 0x497   : > { %v2211_v17 = vadd.f32 %v2207_v22, %v1916_v25 }
 0x498   : > { %v2487_v13 = vpop.permute.xlu0 %2486 }
 0x499   : > { %v2489_v43 = vpop.permute.xlu1 %2488 }
 0x49a   : > { %v2493_v63 = vsel %vm2492_vm13, %v2487_v13, %v2489_v43 }
 0x49b   : > { %v2497_v26 = vmul.f32 %v2493_v63, %v420_v55 }
 0x49d   : > { %v2501_v14 = vrot.slane %v2497_v26, 6  ;;  %v2491_v7 = vpop.permute.xlu0 %2490 }
 0x49e   : > { %v2494_v51 = vsel %vm2492_vm13, %v2489_v43, %v2491_v7 }
 0x49f   : > { %v2505_v28 = vadd.f32 %v2501_v14, %v2210_v5  ;;  %v2498_v48 = vmul.f32 %v2494_v51, %v421_v24 }
 0x4a1   : > { %v2767_v32 = vmul.f32 -1.442695, %v2505_v28  ;;  %v2502_v16 = vrot.slane %v2498_v48, 6 }
 0x4a3   : > { %2875 = vpow2.f32 %v2767_v32  ;;  %v2506_v19 = vadd.f32 %v2502_v16, %v2211_v17 }
 0x4a5   : > { %v2768_v46 = vmul.f32 -1.442695, %v2506_v19 }
 0x4a7   : > { %2877 = vpow2.f32 %v2768_v46 }
 0x4b0   : > { %v2876_v55 = vpop.eup %2875 }
 0x4b1   : > { %v2513_v52 = vadd.f32 1.0, %v2876_v55 }
 0x4b3   : > { %2879 = vrcp.f32 %v2513_v52 }
 0x4b4   : > { %v2878_v61 = vpop.eup %2877 }
 0x4b5   : > { %v2514_v23 = vadd.f32 1.0, %v2878_v61 }
 0x4b7   : > { %2881 = vrcp.f32 %v2514_v23 }
 0x4c0   : > { %v2880_v3 = vpop.eup %2879 }
 0x4c4   : > { %v2882_v8 = vpop.eup %2881 }
 0x4c5   : > { %v2521_v24 = vcombine.low %v2880_v3, %v2882_v8 }
 0x4c7   : > { %v2528_v58 = vrot.slane %v2521_v24, %v4354_v1 }
 0x4c9   : > { %v2535_v18 = vrot.slane %v2528_v58, %v4354_v1 }
 0x4cb   : > { %2537 = vst.msk [vmem:[%s229_s6] sm:$0x3] %vm3215_vm1, %v2535_v18 }
 0x4cc   : > { %2965 = shalt.err (!%p2962_p0)
}
 0x4cd   : > { %s2966_s18 = scalar_lea.hbm %s2551_s7, 32  ;;  %s2970_s4 = scalar_lea.hbm %s4312_s3, 64 }
 0x4ce   : > { %p2967_p1 = scmp.ne.s32.totalorder %s2551_s7, %s2966_s18  ;;  %p2971_p6 = scmp.lt.s32.totalorder %s2551_s7, %s4312_s3 }
 0x4cf   : > { %p2972_p8 = scmp.lt.s32.totalorder %s2970_s4, %s2966_s18 }
 0x4d0   : > { %p2968_p2 = pnand %p2967_p1, %p3170_p13 }
 0x4d1   : > { %p2973_p9 = por %p2972_p8, %p2971_p6 }
 0x4d2   : > { %p2969_p4 = pneg %p2968_p2 }
 0x4d4   : > { %p2974_p3 = pnand %p2973_p9, %p2969_p4 }
 0x4d6   : > { %2977 = shalt.err (!%p2974_p3)
}
 0x4d7   : > { %2786 = dma.vmem_to_hbm [thread:$0]  (%p3170_p13), %s2554_s28, 32, %s2551_s7, %s2539_s22  }
 0x4d8 PF: > { %s2565_s24 = sand.u32 1, %s3020_s12   ;;  %p4356_p11 = scmp.ne.s32.totalorder %s4325_s23, 0 }
 0x4d9   : > { %p4357_p5 = scmp.ge.s32.totalorder %s3040_s17, 2  ;;  %s2566_s25 = scalar_lea.sflag [#allocation6], %s2565_s24 }
 0x4db   : > { %p2800_p7 = pnand %p4357_p5, %p4356_p11 }
 0x4dd   : > { %p2801_p10 = pneg %p2800_p7 }
 0x4df   : > { %3015 = dma.done.wait (%p2801_p10), %s2566_s25, 32  }
 0x4e0   : > { %3017 = vsyncadd (%p2801_p10), %s2566_s25, 4294967264  ;;  %s21_s17 = sadd.s32 1, %s3040_s17   ;;  %s4358_s12 = smov %s3024_s13 }
 0x4e1   : > { %p18_p12 = scmp.ge.s32.totalorder %s21_s17, 4   ;;  %s4359_s13 = smov %s3028_s14 }
 0x4e2   : > { %s4360_s14 = smov %s3179_s26  ;;  %s4361_s15 = smov %s3036_s16 }
 0x4e3   : > { %s4362_s16 = smov %s4364_s9  ;;  %20 = sbr.rel (!%p18_p12) target bundleno = 8 (0x8), region = 94 }
 0x4e8   :  { %2571 = vsyncpa [#allocation5], 1 }
 0x4e9   :  { %2573 = vsyncpa [#allocation5 + $0x1], 1 }
 0x4ea   :  { %2574 = vsyncpa [#allocation10], 1 }
 0x4eb   :  { %2575 = vsyncpa [#allocation6], 1 }
 0x4ec   :  { %2577 = vsyncpa [#allocation6 + $0x1], 1 }
 0x4ed   :  { %2578 = vsyncpa [#allocation7], 1 }
 0x4ee   :  { %2580 = vsyncpa [#allocation7 + $0x1], 1 }

</bundles_post_ra>
